<compile_context>
chip_gen: v6e
topology: v6e:2x2x1
jax: 0.10.0
libtpu: 0.0.40
codegen_flags: <defaults>
</compile_context>

<pallas_src>
import functools
import numpy as np

import jax
import jax.numpy as jnp
from jax.experimental import pallas as pl
from jax.experimental.pallas import tpu as pltpu

NUM_CLASSES = 10
HIDDEN = 32

# synthetic spatial / channel configuration
H16 = W16 = 16
HW16 = H16 * W16          # 256
H8 = W8 = 8
HW8 = H8 * W8             # 64

C_A1 = C_A2 = 8           # audio ConvBlock channels
C_I11 = C_I12 = 8         # image ConvBlock one channels
C_I21 = C_I22 = 16        # image ConvBlock two channels


# ---------------------------------------------------------------------------
# The single fused Pallas kernel
# ---------------------------------------------------------------------------
def _fused_avmnist_kernel(
    a_ref, i_ref,
    aw1, ab1, aw2, ab2, afw, afb,
    iw11, ib11, iw12, ib12, iw21, ib21, iw22, ib22, ifw, ifb,
    hwa, hwi, hb1, hw2, hb2, hw3, hb3,
    sel16, sel8,
    o_ref):
    f32 = jnp.float32
    lanes16 = a_ref.shape[1]            # Bc * 256 (batch chunk on the lane axis)
    bc = lanes16 // HW16
    lanes8 = bc * HW8

    def tap_masks(h, w, lanes):
        """Per-tap f32 edge masks (also kill cross-sample roll contamination)."""
        lane = jax.lax.broadcasted_iota(jnp.int32, (1, lanes), 1)
        j = jnp.bitwise_and(lane, w - 1)
        i = jnp.bitwise_and(lane >> int(np.log2(w)), h - 1)
        row = {-1: i != 0, 0: None, 1: i != h - 1}
        col = {-1: j != 0, 0: None, 1: j != w - 1}
        masks = {}
        for di in (-1, 0, 1):
            for dj in (-1, 0, 1):
                r, c = row[di], col[dj]
                if r is None and c is None:
                    masks[(di, dj)] = None
                elif r is None:
                    masks[(di, dj)] = c.astype(f32)
                elif c is None:
                    masks[(di, dj)] = r.astype(f32)
                else:
                    masks[(di, dj)] = jnp.logical_and(r, c).astype(f32)
        return masks

    masks16 = tap_masks(H16, W16, lanes16)
    masks8 = tap_masks(H8, W8, lanes8)

    def conv3x3(x, w_ref, b_ref, w, masks):
        """3x3 'same' conv (+folded-BN bias) + ReLU on (Cin, Bc*H*W) activations."""
        lanes = x.shape[1]
        cin = x.shape[0]
        pieces = []
        for di in (-1, 0, 1):
            for dj in (-1, 0, 1):
                s = di * w + dj
                p = x if s == 0 else pltpu.roll(x, shift=(-s) % lanes, axis=1)
                m = masks[(di, dj)]
                if m is not None:
                    p = p * m
                pieces.append(p)
        if cin == 1:
            # first conv of each encoder: 9 VPU broadcast-MACs, no MXU issue
            wv = w_ref[...]                               # (cout, 9)
            acc = None
            for t, p in enumerate(pieces):
                term = wv[:, t:t + 1] * p                 # (cout,1)*(1,L)
                acc = term if acc is None else acc + term
            y = acc
        else:
            stk = jnp.concatenate(pieces, axis=0)         # (9*cin, lanes)
            y = jnp.dot(w_ref[...], stk, preferred_element_type=f32)
        return jnp.maximum(y + b_ref[...], 0.0)           # (cout, lanes)

    def maxpool2x2(x, w, sel_ref):
        """2x2/2 max pool: 2 rolls + 2 max, then one 0/1 compaction matmul."""
        lanes = x.shape[1]
        m = jnp.maximum(x, pltpu.roll(x, shift=(lanes - 1) % lanes, axis=1))
        m = jnp.maximum(m, pltpu.roll(m, shift=(lanes - w) % lanes, axis=1))
        return jnp.dot(m, sel_ref[...], preferred_element_type=f32)

    def fc(x, w_ref, b_ref):
        """Flatten((C, Bc*P)) @ W + b with per-channel, per-sample block weights."""
        c, k = x.shape
        acc = None
        for ci in range(c):
            part = jnp.dot(x[ci:ci + 1, :], w_ref[ci * k:(ci + 1) * k, :],
                           preferred_element_type=f32)
            acc = part if acc is None else acc + part
        return acc + b_ref[...]                           # (1, Bc*HIDDEN)

    # ---- audio encoder: ConvBlock -> MaxPool(2,2) -> Flatten -> Linear
    h = conv3x3(a_ref[...], aw1, ab1, W16, masks16)       # (8, Bc*256)
    h = conv3x3(h, aw2, ab2, W16, masks16)                # (8, Bc*256)
    h = maxpool2x2(h, W16, sel16)                         # (8, Bc*64)
    emb_a = fc(h, afw, afb)                               # (1, Bc*HIDDEN)

    # ---- image encoder: [ConvBlock -> MaxPool] x2 -> Flatten -> Linear
    h = conv3x3(i_ref[...], iw11, ib11, W16, masks16)     # (8, Bc*256)
    h = conv3x3(h, iw12, ib12, W16, masks16)              # (8, Bc*256)
    h = maxpool2x2(h, W16, sel16)                         # (8, Bc*64)
    h = conv3x3(h, iw21, ib21, W8, masks8)                # (16, Bc*64)
    h = conv3x3(h, iw22, ib22, W8, masks8)                # (16, Bc*64)
    h = maxpool2x2(h, W8, sel8)                           # (16, Bc*16)
    emb_i = fc(h, ifw, ifb)                               # (1, Bc*HIDDEN)

    # ---- fusion (concat == split-weight sum) + MLP head, whole chunk at once
    h1 = jnp.dot(emb_a, hwa[...], preferred_element_type=f32)
    h1 = h1 + jnp.dot(emb_i, hwi[...], preferred_element_type=f32)
    h1 = jnp.maximum(h1 + hb1[...], 0.0)
    h2 = jnp.maximum(jnp.dot(h1, hw2[...], preferred_element_type=f32) + hb2[...], 0.0)
    logits = jnp.dot(h2, hw3[...], preferred_element_type=f32) + hb3[...]
    o_ref[0] = logits                                     # (1, Bc*NUM_CLASSES)


# ---------------------------------------------------------------------------
# Forward wrapper (single pallas_call; only free reshapes in XLA)
# ---------------------------------------------------------------------------
@functools.partial(jax.jit, static_argnames=("num_chunks",))
def avmnist_forward(A, I, kparams, *, num_chunks=1):
    """kparams must be built with prepare_params(..., batch_chunk=B // num_chunks)."""
    b = A.shape[0]
    assert b % num_chunks == 0
    bc = b // num_chunks
    a_in = A.reshape(1, b * HW16).astype(jnp.float32)
    i_in = I.reshape(1, b * HW16).astype(jnp.float32)
    args = (a_in, i_in) + tuple(kparams)

    chunk_spec = pl.BlockSpec((1, bc * HW16), lambda g: (0, g))

    def full_spec(x):
        return pl.BlockSpec(x.shape, lambda g, _nd=x.ndim: (0,) * _nd)

    in_specs = [chunk_spec, chunk_spec] + [full_spec(x) for x in kparams]

    out = pl.pallas_call(
        _fused_avmnist_kernel,
        out_shape=jax.ShapeDtypeStruct((num_chunks, 1, bc * NUM_CLASSES), jnp.float32),
        grid=(num_chunks,),
        in_specs=in_specs,
        out_specs=pl.BlockSpec((1, 1, bc * NUM_CLASSES), lambda g: (g, 0, 0)),
        compiler_params=pltpu.CompilerParams(dimension_semantics=("parallel",)),
    )(*args)
    return out.reshape(b, NUM_CLASSES)


# ---------------------------------------------------------------------------
# Parameters: PyTorch-style layouts, then one-time kernel-layout preparation
# ---------------------------------------------------------------------------
def make_params(key, *, hidden_dim):
    def dense(k, fan_in, fan_out):
        kw, kb = jax.random.split(k)
        w = jax.random.normal(kw, (fan_out, fan_in), jnp.float32) / jnp.sqrt(float(fan_in))
        b = 0.01 * jax.random.normal(kb, (fan_out,), jnp.float32)
        return w, b

    def conv(k, cin, cout):
        kw, kb, kg, kbt, km, kv = jax.random.split(k, 6)
        w = jax.random.normal(kw, (cout, cin, 3, 3), jnp.float32) / jnp.sqrt(float(cin * 9))
        b = 0.01 * jax.random.normal(kb, (cout,), jnp.float32)
        bn = (1.0 + 0.1 * jax.random.normal(kg, (cout,), jnp.float32),   # gamma
              0.1 * jax.random.normal(kbt, (cout,), jnp.float32),        # beta
              0.1 * jax.random.normal(km, (cout,), jnp.float32),         # running mean
              jax.random.uniform(kv, (cout,), jnp.float32, 0.5, 1.5))    # running var
        return (w, b, bn)

    ks = jax.random.split(key, 11)
    audio_flat = C_A2 * (H16 // 2) * (W16 // 2)     # 512
    image_flat = C_I22 * (H16 // 4) * (W16 // 4)    # 256
    return {
        "audio": {"conv1": conv(ks[0], 1, C_A1), "conv2": conv(ks[1], C_A1, C_A2),
                  "fc": dense(ks[2], audio_flat, hidden_dim)},
        "image": {"conv11": conv(ks[3], 1, C_I11), "conv12": conv(ks[4], C_I11, C_I12),
                  "conv21": conv(ks[5], C_I12, C_I21), "conv22": conv(ks[6], C_I21, C_I22),
                  "fc": dense(ks[7], image_flat, hidden_dim)},
        "head": (dense(ks[8], 2 * hidden_dim, hidden_dim),        # fc_fusion
                 dense(ks[9], hidden_dim, hidden_dim // 2),       # fc_intermediate
                 dense(ks[10], hidden_dim // 2, NUM_CLASSES)),    # fc_out
    }


def _pool_selector(h, w, bc):
    """Exact 0/1 compaction matrix: picks the top-left anchor of every 2x2 cell."""
    hp, wp = h // 2, w // 2
    hw, pp = h * w, hp * wp
    sel = np.zeros((bc * hw, bc * pp), np.float32)
    for b in range(bc):
        for ip in range(hp):
            for jp in range(wp):
                sel[b * hw + 2 * ip * w + 2 * jp, b * pp + ip * wp + jp] = 1.0
    return jnp.asarray(sel)


def prepare_params(params, *, batch_chunk):
    """One-time: fold eval-mode BN, rearrange to kernel layouts, build the
    per-batch-chunk block-diagonal FC / head weights and the pool selectors."""
    bc = batch_chunk
    f32 = jnp.float32

    def conv_prep(wbbn):
        w, b, (gamma, beta, mean, var) = wbbn
        scale = gamma / jnp.sqrt(var + 1e-5)
        w_f = w * scale[:, None, None, None]
        b_f = (b - mean) * scale + beta
        cout, cin = w.shape[0], w.shape[1]
        # column order = (kh, kw, cin), matching the kernel's tap/concat order
        wk = jnp.transpose(w_f, (0, 2, 3, 1)).reshape(cout, 9 * cin)
        return wk.astype(f32), b_f.reshape(cout, 1).astype(f32)

    def block_diag(wt):
        # wt: (K, N) per-sample weight -> (bc*K, bc*N) block-diagonal over samples
        if bc == 1:
            return wt
        k, n = wt.shape
        eye = jnp.eye(bc, dtype=wt.dtype)
        return (eye[:, None, :, None] * wt[None, :, None, :]).reshape(bc * k, bc * n)

    def fc_prep(wb, c, pp):
        w, b = wb                                   # torch Linear: (H, c*pp)
        h = w.shape[0]
        wc = jnp.transpose(w.reshape(h, c, pp), (1, 2, 0))      # (c, pp, h)
        blocks = [block_diag(wc[ci]) for ci in range(c)]        # (bc*pp, bc*h) each
        w_flat = jnp.concatenate(blocks, axis=0)                # (c*bc*pp, bc*h)
        b_flat = jnp.tile(b.reshape(1, h), (1, bc))
        return w_flat.astype(f32), b_flat.astype(f32)

    def head_prep(wb):
        w, b = wb                                   # (out, in)
        return (block_diag(jnp.transpose(w)).astype(f32),
                jnp.tile(b.reshape(1, -1), (1, bc)).astype(f32))

    pa, pi, head = params["audio"], params["image"], params["head"]
    aw1, ab1 = conv_prep(pa["conv1"])
    aw2, ab2 = conv_prep(pa["conv2"])
    afw, afb = fc_prep(pa["fc"], C_A2, (H16 // 2) * (W16 // 2))
    iw11, ib11 = conv_prep(pi["conv11"])
    iw12, ib12 = conv_prep(pi["conv12"])
    iw21, ib21 = conv_prep(pi["conv21"])
    iw22, ib22 = conv_prep(pi["conv22"])
    ifw, ifb = fc_prep(pi["fc"], C_I22, (H16 // 4) * (W16 // 4))

    (w1, b1), (w2, b2), (w3, b3) = head
    w1t = jnp.transpose(w1)                         # (2*HIDDEN, HIDDEN)
    hwa = block_diag(w1t[:HIDDEN]).astype(f32)      # concat([audio, image]) split
    hwi = block_diag(w1t[HIDDEN:]).astype(f32)
    hb1 = jnp.tile(b1.reshape(1, -1), (1, bc)).astype(f32)
    hw2, hb2 = head_prep((w2, b2))
    hw3, hb3 = head_prep((w3, b3))

    sel16 = _pool_selector(H16, W16, bc)
    sel8 = _pool_selector(H8, W8, bc)

    return (aw1, ab1, aw2, ab2, afw, afb,
            iw11, ib11, iw12, ib12, iw21, ib21, iw22, ib22, ifw, ifb,
            hwa, hwi, hb1, hw2, hb2, hw3, hb3,
            sel16, sel8)


# ---------------------------------------------------------------------------
# Pure-XLA reference (mirrors the PyTorch module) for a numerical check
# ---------------------------------------------------------------------------
@jax.jit
def reference_forward(A, I, params):
    hp = jax.lax.Precision.HIGHEST

    def conv_bn_relu(x, w, b, bn):
        gamma, beta, mean, var = bn
        y = jax.lax.conv_general_dilated(
            x, w, window_strides=(1, 1), padding=((1, 1), (1, 1)),
            dimension_numbers=("NCHW", "OIHW", "NCHW"), precision=hp)
        y = y + b[None, :, None, None]
        y = (y - mean[None, :, None, None]) / jnp.sqrt(var[None, :, None, None] + 1e-5)
        y = y * gamma[None, :, None, None] + beta[None, :, None, None]
        return jnp.maximum(y, 0.0)

    def maxpool(x):
        return jax.lax.reduce_window(x, -jnp.inf, jax.lax.max,
                                     (1, 1, 2, 2), (1, 1, 2, 2), "VALID")

    def linear(x, w, b):
        return jnp.dot(x, w.T, precision=hp) + b

    pa, pi = params["audio"], params["image"]
    x = A[:, None, :, :]
    x = conv_bn_relu(x, *pa["conv1"])
    x = conv_bn_relu(x, *pa["conv2"])
    x = maxpool(x)
    audio = linear(x.reshape(x.shape[0], -1), *pa["fc"])
    x = I
    x = conv_bn_relu(x, *pi["conv11"])
    x = conv_bn_relu(x, *pi["conv12"])
    x = maxpool(x)
    x = conv_bn_relu(x, *pi["conv21"])
    x = conv_bn_relu(x, *pi["conv22"])
    x = maxpool(x)
    image = linear(x.reshape(x.shape[0], -1), *pi["fc"])
    fused = jnp.concatenate([audio, image], axis=1)
    (w1, b1), (w2, b2), (w3, b3) = params["head"]
    h = jnp.maximum(linear(fused, w1, b1), 0.0)
    h = jnp.maximum(linear(h, w2, b2), 0.0)
    return linear(h, w3, b3)


# ---------------------------------------------------------------------------
if __name__ == "__main__":
    key = jax.random.PRNGKey(0)
    k_a, k_i, k_p = jax.random.split(key, 3)

    B = 2
    # TODO(synk): on v7x set NUM_CHUNKS = 2 to split the batch across both
    # TensorCores (kparams must then be prepared with batch_chunk = B // 2).
    NUM_CHUNKS = 1

    A = jax.random.normal(k_a, (B, H16, W16), jnp.float32)        # audio spectrogram
    I = jax.random.normal(k_i, (B, 1, H16, W16), jnp.float32)     # image
    params = make_params(k_p, hidden_dim=HIDDEN)
    kparams = prepare_params(params, batch_chunk=B // NUM_CHUNKS)

    logits = avmnist_forward(A, I, kparams, num_chunks=NUM_CHUNKS)
    jax.block_until_ready(logits)
    assert logits.shape == (B, NUM_CLASSES) and logits.dtype == jnp.float32
    assert bool(jnp.all(jnp.isfinite(logits)))

    ref = reference_forward(A, I, params)
    err = float(jnp.max(jnp.abs(logits - ref)))
    # Default (non-HIGHEST) MXU precision inside the kernel vs HIGHEST reference.
    assert err < 5e-2, f"Pallas kernel mismatch vs XLA reference: max abs err {err}"
    print("KERNEL_OK")
</pallas_src>

<mosaic_0001>
module attributes {stable_mosaic.version = 11 : i64} {
  func.func @_fused_avmnist_kernel(%arg0: i32, %arg1: memref<1x512xf32, #tpu.memory_space<vmem>>, %arg2: memref<1x512xf32, #tpu.memory_space<vmem>>, %arg3: memref<8x9xf32, #tpu.memory_space<vmem>>, %arg4: memref<8x1xf32, #tpu.memory_space<vmem>>, %arg5: memref<8x72xf32, #tpu.memory_space<vmem>>, %arg6: memref<8x1xf32, #tpu.memory_space<vmem>>, %arg7: memref<1024x64xf32, #tpu.memory_space<vmem>>, %arg8: memref<1x64xf32, #tpu.memory_space<vmem>>, %arg9: memref<8x9xf32, #tpu.memory_space<vmem>>, %arg10: memref<8x1xf32, #tpu.memory_space<vmem>>, %arg11: memref<8x72xf32, #tpu.memory_space<vmem>>, %arg12: memref<8x1xf32, #tpu.memory_space<vmem>>, %arg13: memref<16x72xf32, #tpu.memory_space<vmem>>, %arg14: memref<16x1xf32, #tpu.memory_space<vmem>>, %arg15: memref<16x144xf32, #tpu.memory_space<vmem>>, %arg16: memref<16x1xf32, #tpu.memory_space<vmem>>, %arg17: memref<512x64xf32, #tpu.memory_space<vmem>>, %arg18: memref<1x64xf32, #tpu.memory_space<vmem>>, %arg19: memref<64x64xf32, #tpu.memory_space<vmem>>, %arg20: memref<64x64xf32, #tpu.memory_space<vmem>>, %arg21: memref<1x64xf32, #tpu.memory_space<vmem>>, %arg22: memref<64x32xf32, #tpu.memory_space<vmem>>, %arg23: memref<1x32xf32, #tpu.memory_space<vmem>>, %arg24: memref<32x20xf32, #tpu.memory_space<vmem>>, %arg25: memref<1x20xf32, #tpu.memory_space<vmem>>, %arg26: memref<512x128xf32, #tpu.memory_space<vmem>>, %arg27: memref<128x32xf32, #tpu.memory_space<vmem>>, %arg28: memref<1x1x20xf32, #tpu.memory_space<vmem>>) attributes {dimension_semantics = [#tpu.dimension_semantics<parallel>], iteration_bounds = array<i64: 1>, scalar_prefetch = 0 : i64, scratch_operands = 0 : i64, tpu.core_type = #tpu.core_type<tc>, window_params = [{transform_indices = @transform_0, window_bounds = array<i64: 1, 512>}, {transform_indices = @transform_1, window_bounds = array<i64: 1, 512>}, {pipeline_mode = #tpu.pipeline_mode<synchronous>, transform_indices = @transform_2, window_bounds = array<i64: 8, 9>}, {pipeline_mode = #tpu.pipeline_mode<synchronous>, transform_indices = @transform_3, window_bounds = array<i64: 8, 1>}, {pipeline_mode = #tpu.pipeline_mode<synchronous>, transform_indices = @transform_4, window_bounds = array<i64: 8, 72>}, {pipeline_mode = #tpu.pipeline_mode<synchronous>, transform_indices = @transform_5, window_bounds = array<i64: 8, 1>}, {pipeline_mode = #tpu.pipeline_mode<synchronous>, transform_indices = @transform_6, window_bounds = array<i64: 1024, 64>}, {pipeline_mode = #tpu.pipeline_mode<synchronous>, transform_indices = @transform_7, window_bounds = array<i64: 1, 64>}, {pipeline_mode = #tpu.pipeline_mode<synchronous>, transform_indices = @transform_8, window_bounds = array<i64: 8, 9>}, {pipeline_mode = #tpu.pipeline_mode<synchronous>, transform_indices = @transform_9, window_bounds = array<i64: 8, 1>}, {pipeline_mode = #tpu.pipeline_mode<synchronous>, transform_indices = @transform_10, window_bounds = array<i64: 8, 72>}, {pipeline_mode = #tpu.pipeline_mode<synchronous>, transform_indices = @transform_11, window_bounds = array<i64: 8, 1>}, {pipeline_mode = #tpu.pipeline_mode<synchronous>, transform_indices = @transform_12, window_bounds = array<i64: 16, 72>}, {pipeline_mode = #tpu.pipeline_mode<synchronous>, transform_indices = @transform_13, window_bounds = array<i64: 16, 1>}, {pipeline_mode = #tpu.pipeline_mode<synchronous>, transform_indices = @transform_14, window_bounds = array<i64: 16, 144>}, {pipeline_mode = #tpu.pipeline_mode<synchronous>, transform_indices = @transform_15, window_bounds = array<i64: 16, 1>}, {pipeline_mode = #tpu.pipeline_mode<synchronous>, transform_indices = @transform_16, window_bounds = array<i64: 512, 64>}, {pipeline_mode = #tpu.pipeline_mode<synchronous>, transform_indices = @transform_17, window_bounds = array<i64: 1, 64>}, {pipeline_mode = #tpu.pipeline_mode<synchronous>, transform_indices = @transform_18, window_bounds = array<i64: 64, 64>}, {pipeline_mode = #tpu.pipeline_mode<synchronous>, transform_indices = @transform_19, window_bounds = array<i64: 64, 64>}, {pipeline_mode = #tpu.pipeline_mode<synchronous>, transform_indices = @transform_20, window_bounds = array<i64: 1, 64>}, {pipeline_mode = #tpu.pipeline_mode<synchronous>, transform_indices = @transform_21, window_bounds = array<i64: 64, 32>}, {pipeline_mode = #tpu.pipeline_mode<synchronous>, transform_indices = @transform_22, window_bounds = array<i64: 1, 32>}, {pipeline_mode = #tpu.pipeline_mode<synchronous>, transform_indices = @transform_23, window_bounds = array<i64: 32, 20>}, {pipeline_mode = #tpu.pipeline_mode<synchronous>, transform_indices = @transform_24, window_bounds = array<i64: 1, 20>}, {pipeline_mode = #tpu.pipeline_mode<synchronous>, transform_indices = @transform_25, window_bounds = array<i64: 512, 128>}, {pipeline_mode = #tpu.pipeline_mode<synchronous>, transform_indices = @transform_26, window_bounds = array<i64: 128, 32>}, {transform_indices = @transform_27, window_bounds = array<i64: 1, 1, 20>}]} {
    %0 = tpu.iota {dimensions = array<i32: 1>} : vector<1x512xi32>
    %c15_i32 = arith.constant 15 : i32
    %1 = vector.broadcast %c15_i32 : i32 to vector<1x512xi32>
    %2 = arith.andi %0, %1 : vector<1x512xi32>
    %c4_i32 = arith.constant 4 : i32
    %3 = vector.broadcast %c4_i32 : i32 to vector<1x512xi32>
    %4 = arith.shrsi %0, %3 : vector<1x512xi32>
    %c15_i32_0 = arith.constant 15 : i32
    %5 = vector.broadcast %c15_i32_0 : i32 to vector<1x512xi32>
    %6 = arith.andi %4, %5 : vector<1x512xi32>
    %c0_i32 = arith.constant 0 : i32
    %7 = vector.broadcast %c0_i32 : i32 to vector<1x512xi32>
    %8 = arith.cmpi ne, %6, %7 : vector<1x512xi32>
    %c15_i32_1 = arith.constant 15 : i32
    %9 = vector.broadcast %c15_i32_1 : i32 to vector<1x512xi32>
    %10 = arith.cmpi ne, %6, %9 : vector<1x512xi32>
    %c0_i32_2 = arith.constant 0 : i32
    %11 = vector.broadcast %c0_i32_2 : i32 to vector<1x512xi32>
    %12 = arith.cmpi ne, %2, %11 : vector<1x512xi32>
    %c15_i32_3 = arith.constant 15 : i32
    %13 = vector.broadcast %c15_i32_3 : i32 to vector<1x512xi32>
    %14 = arith.cmpi ne, %2, %13 : vector<1x512xi32>
    %15 = arith.andi %8, %12 : vector<1x512xi1>
    %16 = arith.extui %15 : vector<1x512xi1> to vector<1x512xi32>
    %17 = arith.sitofp %16 : vector<1x512xi32> to vector<1x512xf32>
    %18 = arith.extui %8 : vector<1x512xi1> to vector<1x512xi32>
    %19 = arith.sitofp %18 : vector<1x512xi32> to vector<1x512xf32>
    %20 = arith.andi %8, %14 : vector<1x512xi1>
    %21 = arith.extui %20 : vector<1x512xi1> to vector<1x512xi32>
    %22 = arith.sitofp %21 : vector<1x512xi32> to vector<1x512xf32>
    %23 = arith.extui %12 : vector<1x512xi1> to vector<1x512xi32>
    %24 = arith.sitofp %23 : vector<1x512xi32> to vector<1x512xf32>
    %25 = arith.extui %14 : vector<1x512xi1> to vector<1x512xi32>
    %26 = arith.sitofp %25 : vector<1x512xi32> to vector<1x512xf32>
    %27 = arith.andi %10, %12 : vector<1x512xi1>
    %28 = arith.extui %27 : vector<1x512xi1> to vector<1x512xi32>
    %29 = arith.sitofp %28 : vector<1x512xi32> to vector<1x512xf32>
    %30 = arith.extui %10 : vector<1x512xi1> to vector<1x512xi32>
    %31 = arith.sitofp %30 : vector<1x512xi32> to vector<1x512xf32>
    %32 = arith.andi %10, %14 : vector<1x512xi1>
    %33 = arith.extui %32 : vector<1x512xi1> to vector<1x512xi32>
    %34 = arith.sitofp %33 : vector<1x512xi32> to vector<1x512xf32>
    %35 = tpu.iota {dimensions = array<i32: 1>} : vector<1x128xi32>
    %c7_i32 = arith.constant 7 : i32
    %36 = vector.broadcast %c7_i32 : i32 to vector<1x128xi32>
    %37 = arith.andi %35, %36 : vector<1x128xi32>
    %c3_i32 = arith.constant 3 : i32
    %38 = vector.broadcast %c3_i32 : i32 to vector<1x128xi32>
    %39 = arith.shrsi %35, %38 : vector<1x128xi32>
    %c7_i32_4 = arith.constant 7 : i32
    %40 = vector.broadcast %c7_i32_4 : i32 to vector<1x128xi32>
    %41 = arith.andi %39, %40 : vector<1x128xi32>
    %c0_i32_5 = arith.constant 0 : i32
    %42 = vector.broadcast %c0_i32_5 : i32 to vector<1x128xi32>
    %43 = arith.cmpi ne, %41, %42 : vector<1x128xi32>
    %c7_i32_6 = arith.constant 7 : i32
    %44 = vector.broadcast %c7_i32_6 : i32 to vector<1x128xi32>
    %45 = arith.cmpi ne, %41, %44 : vector<1x128xi32>
    %c0_i32_7 = arith.constant 0 : i32
    %46 = vector.broadcast %c0_i32_7 : i32 to vector<1x128xi32>
    %47 = arith.cmpi ne, %37, %46 : vector<1x128xi32>
    %c7_i32_8 = arith.constant 7 : i32
    %48 = vector.broadcast %c7_i32_8 : i32 to vector<1x128xi32>
    %49 = arith.cmpi ne, %37, %48 : vector<1x128xi32>
    %50 = arith.andi %43, %47 : vector<1x128xi1>
    %51 = arith.extui %50 : vector<1x128xi1> to vector<1x128xi32>
    %52 = arith.sitofp %51 : vector<1x128xi32> to vector<1x128xf32>
    %53 = arith.extui %43 : vector<1x128xi1> to vector<1x128xi32>
    %54 = arith.sitofp %53 : vector<1x128xi32> to vector<1x128xf32>
    %55 = arith.andi %43, %49 : vector<1x128xi1>
    %56 = arith.extui %55 : vector<1x128xi1> to vector<1x128xi32>
    %57 = arith.sitofp %56 : vector<1x128xi32> to vector<1x128xf32>
    %58 = arith.extui %47 : vector<1x128xi1> to vector<1x128xi32>
    %59 = arith.sitofp %58 : vector<1x128xi32> to vector<1x128xf32>
    %60 = arith.extui %49 : vector<1x128xi1> to vector<1x128xi32>
    %61 = arith.sitofp %60 : vector<1x128xi32> to vector<1x128xf32>
    %62 = arith.andi %45, %47 : vector<1x128xi1>
    %63 = arith.extui %62 : vector<1x128xi1> to vector<1x128xi32>
    %64 = arith.sitofp %63 : vector<1x128xi32> to vector<1x128xf32>
    %65 = arith.extui %45 : vector<1x128xi1> to vector<1x128xi32>
    %66 = arith.sitofp %65 : vector<1x128xi32> to vector<1x128xf32>
    %67 = arith.andi %45, %49 : vector<1x128xi1>
    %68 = arith.extui %67 : vector<1x128xi1> to vector<1x128xi32>
    %69 = arith.sitofp %68 : vector<1x128xi32> to vector<1x128xf32>
    %c0 = arith.constant 0 : index
    %c0_9 = arith.constant 0 : index
    %70 = vector.load %arg1[%c0, %c0_9] : memref<1x512xf32, #tpu.memory_space<vmem>>, vector<1x512xf32>
    %c17_i32 = arith.constant 17 : i32
    %71 = tpu.dynamic_rotate %70 by %c17_i32 dim 1 : vector<1x512xf32>, i32 -> vector<1x512xf32>
    %72 = arith.mulf %71, %17 : vector<1x512xf32>
    %c16_i32 = arith.constant 16 : i32
    %73 = tpu.dynamic_rotate %70 by %c16_i32 dim 1 : vector<1x512xf32>, i32 -> vector<1x512xf32>
    %74 = arith.mulf %73, %19 : vector<1x512xf32>
    %c15_i32_10 = arith.constant 15 : i32
    %75 = tpu.dynamic_rotate %70 by %c15_i32_10 dim 1 : vector<1x512xf32>, i32 -> vector<1x512xf32>
    %76 = arith.mulf %75, %22 : vector<1x512xf32>
    %c1_i32 = arith.constant 1 : i32
    %77 = tpu.dynamic_rotate %70 by %c1_i32 dim 1 : vector<1x512xf32>, i32 -> vector<1x512xf32>
    %78 = arith.mulf %77, %24 : vector<1x512xf32>
    %c511_i32 = arith.constant 511 : i32
    %79 = tpu.dynamic_rotate %70 by %c511_i32 dim 1 : vector<1x512xf32>, i32 -> vector<1x512xf32>
    %80 = arith.mulf %79, %26 : vector<1x512xf32>
    %c497_i32 = arith.constant 497 : i32
    %81 = tpu.dynamic_rotate %70 by %c497_i32 dim 1 : vector<1x512xf32>, i32 -> vector<1x512xf32>
    %82 = arith.mulf %81, %29 : vector<1x512xf32>
    %c496_i32 = arith.constant 496 : i32
    %83 = tpu.dynamic_rotate %70 by %c496_i32 dim 1 : vector<1x512xf32>, i32 -> vector<1x512xf32>
    %84 = arith.mulf %83, %31 : vector<1x512xf32>
    %c495_i32 = arith.constant 495 : i32
    %85 = tpu.dynamic_rotate %70 by %c495_i32 dim 1 : vector<1x512xf32>, i32 -> vector<1x512xf32>
    %86 = arith.mulf %85, %34 : vector<1x512xf32>
    %c0_11 = arith.constant 0 : index
    %c0_12 = arith.constant 0 : index
    %87 = vector.load %arg3[%c0_11, %c0_12] : memref<8x9xf32, #tpu.memory_space<vmem>>, vector<8x9xf32>
    %88 = vector.extract_strided_slice %87 {offsets = [0, 0], sizes = [8, 1], strides = [1, 1]} : vector<8x9xf32> to vector<8x1xf32>
    %89 = vector.broadcast %88 : vector<8x1xf32> to vector<8x512xf32>
    %90 = vector.broadcast %72 : vector<1x512xf32> to vector<8x512xf32>
    %91 = arith.mulf %89, %90 : vector<8x512xf32>
    %92 = vector.extract_strided_slice %87 {offsets = [0, 1], sizes = [8, 1], strides = [1, 1]} : vector<8x9xf32> to vector<8x1xf32>
    %93 = vector.broadcast %92 : vector<8x1xf32> to vector<8x512xf32>
    %94 = vector.broadcast %74 : vector<1x512xf32> to vector<8x512xf32>
    %95 = arith.mulf %93, %94 : vector<8x512xf32>
    %96 = arith.addf %91, %95 : vector<8x512xf32>
    %97 = vector.extract_strided_slice %87 {offsets = [0, 2], sizes = [8, 1], strides = [1, 1]} : vector<8x9xf32> to vector<8x1xf32>
    %98 = vector.broadcast %97 : vector<8x1xf32> to vector<8x512xf32>
    %99 = vector.broadcast %76 : vector<1x512xf32> to vector<8x512xf32>
    %100 = arith.mulf %98, %99 : vector<8x512xf32>
    %101 = arith.addf %96, %100 : vector<8x512xf32>
    %102 = vector.extract_strided_slice %87 {offsets = [0, 3], sizes = [8, 1], strides = [1, 1]} : vector<8x9xf32> to vector<8x1xf32>
    %103 = vector.broadcast %102 : vector<8x1xf32> to vector<8x512xf32>
    %104 = vector.broadcast %78 : vector<1x512xf32> to vector<8x512xf32>
    %105 = arith.mulf %103, %104 : vector<8x512xf32>
    %106 = arith.addf %101, %105 : vector<8x512xf32>
    %107 = vector.extract_strided_slice %87 {offsets = [0, 4], sizes = [8, 1], strides = [1, 1]} : vector<8x9xf32> to vector<8x1xf32>
    %108 = vector.broadcast %107 : vector<8x1xf32> to vector<8x512xf32>
    %109 = vector.broadcast %70 : vector<1x512xf32> to vector<8x512xf32>
    %110 = arith.mulf %108, %109 : vector<8x512xf32>
    %111 = arith.addf %106, %110 : vector<8x512xf32>
    %112 = vector.extract_strided_slice %87 {offsets = [0, 5], sizes = [8, 1], strides = [1, 1]} : vector<8x9xf32> to vector<8x1xf32>
    %113 = vector.broadcast %112 : vector<8x1xf32> to vector<8x512xf32>
    %114 = vector.broadcast %80 : vector<1x512xf32> to vector<8x512xf32>
    %115 = arith.mulf %113, %114 : vector<8x512xf32>
    %116 = arith.addf %111, %115 : vector<8x512xf32>
    %117 = vector.extract_strided_slice %87 {offsets = [0, 6], sizes = [8, 1], strides = [1, 1]} : vector<8x9xf32> to vector<8x1xf32>
    %118 = vector.broadcast %117 : vector<8x1xf32> to vector<8x512xf32>
    %119 = vector.broadcast %82 : vector<1x512xf32> to vector<8x512xf32>
    %120 = arith.mulf %118, %119 : vector<8x512xf32>
    %121 = arith.addf %116, %120 : vector<8x512xf32>
    %122 = vector.extract_strided_slice %87 {offsets = [0, 7], sizes = [8, 1], strides = [1, 1]} : vector<8x9xf32> to vector<8x1xf32>
    %123 = vector.broadcast %122 : vector<8x1xf32> to vector<8x512xf32>
    %124 = vector.broadcast %84 : vector<1x512xf32> to vector<8x512xf32>
    %125 = arith.mulf %123, %124 : vector<8x512xf32>
    %126 = arith.addf %121, %125 : vector<8x512xf32>
    %127 = vector.extract_strided_slice %87 {offsets = [0, 8], sizes = [8, 1], strides = [1, 1]} : vector<8x9xf32> to vector<8x1xf32>
    %128 = vector.broadcast %127 : vector<8x1xf32> to vector<8x512xf32>
    %129 = vector.broadcast %86 : vector<1x512xf32> to vector<8x512xf32>
    %130 = arith.mulf %128, %129 : vector<8x512xf32>
    %131 = arith.addf %126, %130 : vector<8x512xf32>
    %c0_13 = arith.constant 0 : index
    %c0_14 = arith.constant 0 : index
    %132 = vector.load %arg4[%c0_13, %c0_14] : memref<8x1xf32, #tpu.memory_space<vmem>>, vector<8x1xf32>
    %133 = vector.broadcast %132 : vector<8x1xf32> to vector<8x512xf32>
    %134 = arith.addf %131, %133 : vector<8x512xf32>
    %cst = arith.constant 0.000000e+00 : f32
    %135 = vector.broadcast %cst : f32 to vector<8x512xf32>
    %136 = arith.maximumf %134, %135 : vector<8x512xf32>
    %c17_i32_15 = arith.constant 17 : i32
    %137 = tpu.dynamic_rotate %136 by %c17_i32_15 dim 1 : vector<8x512xf32>, i32 -> vector<8x512xf32>
    %138 = vector.broadcast %17 : vector<1x512xf32> to vector<8x512xf32>
    %139 = arith.mulf %137, %138 : vector<8x512xf32>
    %c16_i32_16 = arith.constant 16 : i32
    %140 = tpu.dynamic_rotate %136 by %c16_i32_16 dim 1 : vector<8x512xf32>, i32 -> vector<8x512xf32>
    %141 = vector.broadcast %19 : vector<1x512xf32> to vector<8x512xf32>
    %142 = arith.mulf %140, %141 : vector<8x512xf32>
    %c15_i32_17 = arith.constant 15 : i32
    %143 = tpu.dynamic_rotate %136 by %c15_i32_17 dim 1 : vector<8x512xf32>, i32 -> vector<8x512xf32>
    %144 = vector.broadcast %22 : vector<1x512xf32> to vector<8x512xf32>
    %145 = arith.mulf %143, %144 : vector<8x512xf32>
    %c1_i32_18 = arith.constant 1 : i32
    %146 = tpu.dynamic_rotate %136 by %c1_i32_18 dim 1 : vector<8x512xf32>, i32 -> vector<8x512xf32>
    %147 = vector.broadcast %24 : vector<1x512xf32> to vector<8x512xf32>
    %148 = arith.mulf %146, %147 : vector<8x512xf32>
    %c511_i32_19 = arith.constant 511 : i32
    %149 = tpu.dynamic_rotate %136 by %c511_i32_19 dim 1 : vector<8x512xf32>, i32 -> vector<8x512xf32>
    %150 = vector.broadcast %26 : vector<1x512xf32> to vector<8x512xf32>
    %151 = arith.mulf %149, %150 : vector<8x512xf32>
    %c497_i32_20 = arith.constant 497 : i32
    %152 = tpu.dynamic_rotate %136 by %c497_i32_20 dim 1 : vector<8x512xf32>, i32 -> vector<8x512xf32>
    %153 = vector.broadcast %29 : vector<1x512xf32> to vector<8x512xf32>
    %154 = arith.mulf %152, %153 : vector<8x512xf32>
    %c496_i32_21 = arith.constant 496 : i32
    %155 = tpu.dynamic_rotate %136 by %c496_i32_21 dim 1 : vector<8x512xf32>, i32 -> vector<8x512xf32>
    %156 = vector.broadcast %31 : vector<1x512xf32> to vector<8x512xf32>
    %157 = arith.mulf %155, %156 : vector<8x512xf32>
    %c495_i32_22 = arith.constant 495 : i32
    %158 = tpu.dynamic_rotate %136 by %c495_i32_22 dim 1 : vector<8x512xf32>, i32 -> vector<8x512xf32>
    %159 = vector.broadcast %34 : vector<1x512xf32> to vector<8x512xf32>
    %160 = arith.mulf %158, %159 : vector<8x512xf32>
    %161 = tpu.concatenate %139, %142, %145, %148, %136, %151, %154, %157, %160 in 0 : vector<8x512xf32>, vector<8x512xf32>, vector<8x512xf32>, vector<8x512xf32>, vector<8x512xf32>, vector<8x512xf32>, vector<8x512xf32>, vector<8x512xf32>, vector<8x512xf32> -> vector<72x512xf32>
    %c0_23 = arith.constant 0 : index
    %c0_24 = arith.constant 0 : index
    %162 = vector.load %arg5[%c0_23, %c0_24] : memref<8x72xf32, #tpu.memory_space<vmem>>, vector<8x72xf32>
    %cst_25 = arith.constant dense<0.000000e+00> : vector<8x512xf32>
    %163 = tpu.matmul %162, %161, %cst_25 {dimension_numbers = #tpu.dot_dimension_numbers<[1], [0], [0], [1], [0, 0, 1, 1], [], []>} : vector<8x72xf32>, vector<72x512xf32>, vector<8x512xf32> -> vector<8x512xf32>
    %c0_26 = arith.constant 0 : index
    %c0_27 = arith.constant 0 : index
    %164 = vector.load %arg6[%c0_26, %c0_27] : memref<8x1xf32, #tpu.memory_space<vmem>>, vector<8x1xf32>
    %165 = vector.broadcast %164 : vector<8x1xf32> to vector<8x512xf32>
    %166 = arith.addf %163, %165 : vector<8x512xf32>
    %cst_28 = arith.constant 0.000000e+00 : f32
    %167 = vector.broadcast %cst_28 : f32 to vector<8x512xf32>
    %168 = arith.maximumf %166, %167 : vector<8x512xf32>
    %c511_i32_29 = arith.constant 511 : i32
    %169 = tpu.dynamic_rotate %168 by %c511_i32_29 dim 1 : vector<8x512xf32>, i32 -> vector<8x512xf32>
    %170 = arith.maximumf %168, %169 : vector<8x512xf32>
    %c496_i32_30 = arith.constant 496 : i32
    %171 = tpu.dynamic_rotate %170 by %c496_i32_30 dim 1 : vector<8x512xf32>, i32 -> vector<8x512xf32>
    %172 = arith.maximumf %170, %171 : vector<8x512xf32>
    %c0_31 = arith.constant 0 : index
    %c0_32 = arith.constant 0 : index
    %173 = vector.load %arg26[%c0_31, %c0_32] : memref<512x128xf32, #tpu.memory_space<vmem>>, vector<512x128xf32>
    %cst_33 = arith.constant dense<0.000000e+00> : vector<8x128xf32>
    %174 = tpu.matmul %172, %173, %cst_33 {dimension_numbers = #tpu.dot_dimension_numbers<[1], [0], [0], [1], [0, 0, 1, 1], [], []>} : vector<8x512xf32>, vector<512x128xf32>, vector<8x128xf32> -> vector<8x128xf32>
    %175 = vector.extract_strided_slice %174 {offsets = [0, 0], sizes = [1, 128], strides = [1, 1]} : vector<8x128xf32> to vector<1x128xf32>
    %c0_34 = arith.constant 0 : index
    %c0_35 = arith.constant 0 : index
    %176 = vector.load %arg7[%c0_34, %c0_35] : memref<1024x64xf32, #tpu.memory_space<vmem>>, vector<128x64xf32>
    %cst_36 = arith.constant dense<0.000000e+00> : vector<1x64xf32>
    %177 = tpu.matmul %175, %176, %cst_36 {dimension_numbers = #tpu.dot_dimension_numbers<[1], [0], [0], [1], [0, 0, 1, 1], [], []>} : vector<1x128xf32>, vector<128x64xf32>, vector<1x64xf32> -> vector<1x64xf32>
    %178 = vector.extract_strided_slice %174 {offsets = [1, 0], sizes = [1, 128], strides = [1, 1]} : vector<8x128xf32> to vector<1x128xf32>
    %c128 = arith.constant 128 : index
    %c0_37 = arith.constant 0 : index
    %179 = vector.load %arg7[%c128, %c0_37] : memref<1024x64xf32, #tpu.memory_space<vmem>>, vector<128x64xf32>
    %cst_38 = arith.constant dense<0.000000e+00> : vector<1x64xf32>
    %180 = tpu.matmul %178, %179, %cst_38 {dimension_numbers = #tpu.dot_dimension_numbers<[1], [0], [0], [1], [0, 0, 1, 1], [], []>} : vector<1x128xf32>, vector<128x64xf32>, vector<1x64xf32> -> vector<1x64xf32>
    %181 = arith.addf %177, %180 : vector<1x64xf32>
    %182 = vector.extract_strided_slice %174 {offsets = [2, 0], sizes = [1, 128], strides = [1, 1]} : vector<8x128xf32> to vector<1x128xf32>
    %c256 = arith.constant 256 : index
    %c0_39 = arith.constant 0 : index
    %183 = vector.load %arg7[%c256, %c0_39] : memref<1024x64xf32, #tpu.memory_space<vmem>>, vector<128x64xf32>
    %cst_40 = arith.constant dense<0.000000e+00> : vector<1x64xf32>
    %184 = tpu.matmul %182, %183, %cst_40 {dimension_numbers = #tpu.dot_dimension_numbers<[1], [0], [0], [1], [0, 0, 1, 1], [], []>} : vector<1x128xf32>, vector<128x64xf32>, vector<1x64xf32> -> vector<1x64xf32>
    %185 = arith.addf %181, %184 : vector<1x64xf32>
    %186 = vector.extract_strided_slice %174 {offsets = [3, 0], sizes = [1, 128], strides = [1, 1]} : vector<8x128xf32> to vector<1x128xf32>
    %c384 = arith.constant 384 : index
    %c0_41 = arith.constant 0 : index
    %187 = vector.load %arg7[%c384, %c0_41] : memref<1024x64xf32, #tpu.memory_space<vmem>>, vector<128x64xf32>
    %cst_42 = arith.constant dense<0.000000e+00> : vector<1x64xf32>
    %188 = tpu.matmul %186, %187, %cst_42 {dimension_numbers = #tpu.dot_dimension_numbers<[1], [0], [0], [1], [0, 0, 1, 1], [], []>} : vector<1x128xf32>, vector<128x64xf32>, vector<1x64xf32> -> vector<1x64xf32>
    %189 = arith.addf %185, %188 : vector<1x64xf32>
    %190 = vector.extract_strided_slice %174 {offsets = [4, 0], sizes = [1, 128], strides = [1, 1]} : vector<8x128xf32> to vector<1x128xf32>
    %c512 = arith.constant 512 : index
    %c0_43 = arith.constant 0 : index
    %191 = vector.load %arg7[%c512, %c0_43] : memref<1024x64xf32, #tpu.memory_space<vmem>>, vector<128x64xf32>
    %cst_44 = arith.constant dense<0.000000e+00> : vector<1x64xf32>
    %192 = tpu.matmul %190, %191, %cst_44 {dimension_numbers = #tpu.dot_dimension_numbers<[1], [0], [0], [1], [0, 0, 1, 1], [], []>} : vector<1x128xf32>, vector<128x64xf32>, vector<1x64xf32> -> vector<1x64xf32>
    %193 = arith.addf %189, %192 : vector<1x64xf32>
    %194 = vector.extract_strided_slice %174 {offsets = [5, 0], sizes = [1, 128], strides = [1, 1]} : vector<8x128xf32> to vector<1x128xf32>
    %c640 = arith.constant 640 : index
    %c0_45 = arith.constant 0 : index
    %195 = vector.load %arg7[%c640, %c0_45] : memref<1024x64xf32, #tpu.memory_space<vmem>>, vector<128x64xf32>
    %cst_46 = arith.constant dense<0.000000e+00> : vector<1x64xf32>
    %196 = tpu.matmul %194, %195, %cst_46 {dimension_numbers = #tpu.dot_dimension_numbers<[1], [0], [0], [1], [0, 0, 1, 1], [], []>} : vector<1x128xf32>, vector<128x64xf32>, vector<1x64xf32> -> vector<1x64xf32>
    %197 = arith.addf %193, %196 : vector<1x64xf32>
    %198 = vector.extract_strided_slice %174 {offsets = [6, 0], sizes = [1, 128], strides = [1, 1]} : vector<8x128xf32> to vector<1x128xf32>
    %c768 = arith.constant 768 : index
    %c0_47 = arith.constant 0 : index
    %199 = vector.load %arg7[%c768, %c0_47] : memref<1024x64xf32, #tpu.memory_space<vmem>>, vector<128x64xf32>
    %cst_48 = arith.constant dense<0.000000e+00> : vector<1x64xf32>
    %200 = tpu.matmul %198, %199, %cst_48 {dimension_numbers = #tpu.dot_dimension_numbers<[1], [0], [0], [1], [0, 0, 1, 1], [], []>} : vector<1x128xf32>, vector<128x64xf32>, vector<1x64xf32> -> vector<1x64xf32>
    %201 = arith.addf %197, %200 : vector<1x64xf32>
    %202 = vector.extract_strided_slice %174 {offsets = [7, 0], sizes = [1, 128], strides = [1, 1]} : vector<8x128xf32> to vector<1x128xf32>
    %c896 = arith.constant 896 : index
    %c0_49 = arith.constant 0 : index
    %203 = vector.load %arg7[%c896, %c0_49] : memref<1024x64xf32, #tpu.memory_space<vmem>>, vector<128x64xf32>
    %cst_50 = arith.constant dense<0.000000e+00> : vector<1x64xf32>
    %204 = tpu.matmul %202, %203, %cst_50 {dimension_numbers = #tpu.dot_dimension_numbers<[1], [0], [0], [1], [0, 0, 1, 1], [], []>} : vector<1x128xf32>, vector<128x64xf32>, vector<1x64xf32> -> vector<1x64xf32>
    %205 = arith.addf %201, %204 : vector<1x64xf32>
    %c0_51 = arith.constant 0 : index
    %c0_52 = arith.constant 0 : index
    %206 = vector.load %arg8[%c0_51, %c0_52] : memref<1x64xf32, #tpu.memory_space<vmem>>, vector<1x64xf32>
    %207 = arith.addf %205, %206 : vector<1x64xf32>
    %c0_53 = arith.constant 0 : index
    %c0_54 = arith.constant 0 : index
    %208 = vector.load %arg2[%c0_53, %c0_54] : memref<1x512xf32, #tpu.memory_space<vmem>>, vector<1x512xf32>
    %c17_i32_55 = arith.constant 17 : i32
    %209 = tpu.dynamic_rotate %208 by %c17_i32_55 dim 1 : vector<1x512xf32>, i32 -> vector<1x512xf32>
    %210 = arith.mulf %209, %17 : vector<1x512xf32>
    %c16_i32_56 = arith.constant 16 : i32
    %211 = tpu.dynamic_rotate %208 by %c16_i32_56 dim 1 : vector<1x512xf32>, i32 -> vector<1x512xf32>
    %212 = arith.mulf %211, %19 : vector<1x512xf32>
    %c15_i32_57 = arith.constant 15 : i32
    %213 = tpu.dynamic_rotate %208 by %c15_i32_57 dim 1 : vector<1x512xf32>, i32 -> vector<1x512xf32>
    %214 = arith.mulf %213, %22 : vector<1x512xf32>
    %c1_i32_58 = arith.constant 1 : i32
    %215 = tpu.dynamic_rotate %208 by %c1_i32_58 dim 1 : vector<1x512xf32>, i32 -> vector<1x512xf32>
    %216 = arith.mulf %215, %24 : vector<1x512xf32>
    %c511_i32_59 = arith.constant 511 : i32
    %217 = tpu.dynamic_rotate %208 by %c511_i32_59 dim 1 : vector<1x512xf32>, i32 -> vector<1x512xf32>
    %218 = arith.mulf %217, %26 : vector<1x512xf32>
    %c497_i32_60 = arith.constant 497 : i32
    %219 = tpu.dynamic_rotate %208 by %c497_i32_60 dim 1 : vector<1x512xf32>, i32 -> vector<1x512xf32>
    %220 = arith.mulf %219, %29 : vector<1x512xf32>
    %c496_i32_61 = arith.constant 496 : i32
    %221 = tpu.dynamic_rotate %208 by %c496_i32_61 dim 1 : vector<1x512xf32>, i32 -> vector<1x512xf32>
    %222 = arith.mulf %221, %31 : vector<1x512xf32>
    %c495_i32_62 = arith.constant 495 : i32
    %223 = tpu.dynamic_rotate %208 by %c495_i32_62 dim 1 : vector<1x512xf32>, i32 -> vector<1x512xf32>
    %224 = arith.mulf %223, %34 : vector<1x512xf32>
    %c0_63 = arith.constant 0 : index
    %c0_64 = arith.constant 0 : index
    %225 = vector.load %arg9[%c0_63, %c0_64] : memref<8x9xf32, #tpu.memory_space<vmem>>, vector<8x9xf32>
    %226 = vector.extract_strided_slice %225 {offsets = [0, 0], sizes = [8, 1], strides = [1, 1]} : vector<8x9xf32> to vector<8x1xf32>
    %227 = vector.broadcast %226 : vector<8x1xf32> to vector<8x512xf32>
    %228 = vector.broadcast %210 : vector<1x512xf32> to vector<8x512xf32>
    %229 = arith.mulf %227, %228 : vector<8x512xf32>
    %230 = vector.extract_strided_slice %225 {offsets = [0, 1], sizes = [8, 1], strides = [1, 1]} : vector<8x9xf32> to vector<8x1xf32>
    %231 = vector.broadcast %230 : vector<8x1xf32> to vector<8x512xf32>
    %232 = vector.broadcast %212 : vector<1x512xf32> to vector<8x512xf32>
    %233 = arith.mulf %231, %232 : vector<8x512xf32>
    %234 = arith.addf %229, %233 : vector<8x512xf32>
    %235 = vector.extract_strided_slice %225 {offsets = [0, 2], sizes = [8, 1], strides = [1, 1]} : vector<8x9xf32> to vector<8x1xf32>
    %236 = vector.broadcast %235 : vector<8x1xf32> to vector<8x512xf32>
    %237 = vector.broadcast %214 : vector<1x512xf32> to vector<8x512xf32>
    %238 = arith.mulf %236, %237 : vector<8x512xf32>
    %239 = arith.addf %234, %238 : vector<8x512xf32>
    %240 = vector.extract_strided_slice %225 {offsets = [0, 3], sizes = [8, 1], strides = [1, 1]} : vector<8x9xf32> to vector<8x1xf32>
    %241 = vector.broadcast %240 : vector<8x1xf32> to vector<8x512xf32>
    %242 = vector.broadcast %216 : vector<1x512xf32> to vector<8x512xf32>
    %243 = arith.mulf %241, %242 : vector<8x512xf32>
    %244 = arith.addf %239, %243 : vector<8x512xf32>
    %245 = vector.extract_strided_slice %225 {offsets = [0, 4], sizes = [8, 1], strides = [1, 1]} : vector<8x9xf32> to vector<8x1xf32>
    %246 = vector.broadcast %245 : vector<8x1xf32> to vector<8x512xf32>
    %247 = vector.broadcast %208 : vector<1x512xf32> to vector<8x512xf32>
    %248 = arith.mulf %246, %247 : vector<8x512xf32>
    %249 = arith.addf %244, %248 : vector<8x512xf32>
    %250 = vector.extract_strided_slice %225 {offsets = [0, 5], sizes = [8, 1], strides = [1, 1]} : vector<8x9xf32> to vector<8x1xf32>
    %251 = vector.broadcast %250 : vector<8x1xf32> to vector<8x512xf32>
    %252 = vector.broadcast %218 : vector<1x512xf32> to vector<8x512xf32>
    %253 = arith.mulf %251, %252 : vector<8x512xf32>
    %254 = arith.addf %249, %253 : vector<8x512xf32>
    %255 = vector.extract_strided_slice %225 {offsets = [0, 6], sizes = [8, 1], strides = [1, 1]} : vector<8x9xf32> to vector<8x1xf32>
    %256 = vector.broadcast %255 : vector<8x1xf32> to vector<8x512xf32>
    %257 = vector.broadcast %220 : vector<1x512xf32> to vector<8x512xf32>
    %258 = arith.mulf %256, %257 : vector<8x512xf32>
    %259 = arith.addf %254, %258 : vector<8x512xf32>
    %260 = vector.extract_strided_slice %225 {offsets = [0, 7], sizes = [8, 1], strides = [1, 1]} : vector<8x9xf32> to vector<8x1xf32>
    %261 = vector.broadcast %260 : vector<8x1xf32> to vector<8x512xf32>
    %262 = vector.broadcast %222 : vector<1x512xf32> to vector<8x512xf32>
    %263 = arith.mulf %261, %262 : vector<8x512xf32>
    %264 = arith.addf %259, %263 : vector<8x512xf32>
    %265 = vector.extract_strided_slice %225 {offsets = [0, 8], sizes = [8, 1], strides = [1, 1]} : vector<8x9xf32> to vector<8x1xf32>
    %266 = vector.broadcast %265 : vector<8x1xf32> to vector<8x512xf32>
    %267 = vector.broadcast %224 : vector<1x512xf32> to vector<8x512xf32>
    %268 = arith.mulf %266, %267 : vector<8x512xf32>
    %269 = arith.addf %264, %268 : vector<8x512xf32>
    %c0_65 = arith.constant 0 : index
    %c0_66 = arith.constant 0 : index
    %270 = vector.load %arg10[%c0_65, %c0_66] : memref<8x1xf32, #tpu.memory_space<vmem>>, vector<8x1xf32>
    %271 = vector.broadcast %270 : vector<8x1xf32> to vector<8x512xf32>
    %272 = arith.addf %269, %271 : vector<8x512xf32>
    %cst_67 = arith.constant 0.000000e+00 : f32
    %273 = vector.broadcast %cst_67 : f32 to vector<8x512xf32>
    %274 = arith.maximumf %272, %273 : vector<8x512xf32>
    %c17_i32_68 = arith.constant 17 : i32
    %275 = tpu.dynamic_rotate %274 by %c17_i32_68 dim 1 : vector<8x512xf32>, i32 -> vector<8x512xf32>
    %276 = vector.broadcast %17 : vector<1x512xf32> to vector<8x512xf32>
    %277 = arith.mulf %275, %276 : vector<8x512xf32>
    %c16_i32_69 = arith.constant 16 : i32
    %278 = tpu.dynamic_rotate %274 by %c16_i32_69 dim 1 : vector<8x512xf32>, i32 -> vector<8x512xf32>
    %279 = vector.broadcast %19 : vector<1x512xf32> to vector<8x512xf32>
    %280 = arith.mulf %278, %279 : vector<8x512xf32>
    %c15_i32_70 = arith.constant 15 : i32
    %281 = tpu.dynamic_rotate %274 by %c15_i32_70 dim 1 : vector<8x512xf32>, i32 -> vector<8x512xf32>
    %282 = vector.broadcast %22 : vector<1x512xf32> to vector<8x512xf32>
    %283 = arith.mulf %281, %282 : vector<8x512xf32>
    %c1_i32_71 = arith.constant 1 : i32
    %284 = tpu.dynamic_rotate %274 by %c1_i32_71 dim 1 : vector<8x512xf32>, i32 -> vector<8x512xf32>
    %285 = vector.broadcast %24 : vector<1x512xf32> to vector<8x512xf32>
    %286 = arith.mulf %284, %285 : vector<8x512xf32>
    %c511_i32_72 = arith.constant 511 : i32
    %287 = tpu.dynamic_rotate %274 by %c511_i32_72 dim 1 : vector<8x512xf32>, i32 -> vector<8x512xf32>
    %288 = vector.broadcast %26 : vector<1x512xf32> to vector<8x512xf32>
    %289 = arith.mulf %287, %288 : vector<8x512xf32>
    %c497_i32_73 = arith.constant 497 : i32
    %290 = tpu.dynamic_rotate %274 by %c497_i32_73 dim 1 : vector<8x512xf32>, i32 -> vector<8x512xf32>
    %291 = vector.broadcast %29 : vector<1x512xf32> to vector<8x512xf32>
    %292 = arith.mulf %290, %291 : vector<8x512xf32>
    %c496_i32_74 = arith.constant 496 : i32
    %293 = tpu.dynamic_rotate %274 by %c496_i32_74 dim 1 : vector<8x512xf32>, i32 -> vector<8x512xf32>
    %294 = vector.broadcast %31 : vector<1x512xf32> to vector<8x512xf32>
    %295 = arith.mulf %293, %294 : vector<8x512xf32>
    %c495_i32_75 = arith.constant 495 : i32
    %296 = tpu.dynamic_rotate %274 by %c495_i32_75 dim 1 : vector<8x512xf32>, i32 -> vector<8x512xf32>
    %297 = vector.broadcast %34 : vector<1x512xf32> to vector<8x512xf32>
    %298 = arith.mulf %296, %297 : vector<8x512xf32>
    %299 = tpu.concatenate %277, %280, %283, %286, %274, %289, %292, %295, %298 in 0 : vector<8x512xf32>, vector<8x512xf32>, vector<8x512xf32>, vector<8x512xf32>, vector<8x512xf32>, vector<8x512xf32>, vector<8x512xf32>, vector<8x512xf32>, vector<8x512xf32> -> vector<72x512xf32>
    %c0_76 = arith.constant 0 : index
    %c0_77 = arith.constant 0 : index
    %300 = vector.load %arg11[%c0_76, %c0_77] : memref<8x72xf32, #tpu.memory_space<vmem>>, vector<8x72xf32>
    %cst_78 = arith.constant dense<0.000000e+00> : vector<8x512xf32>
    %301 = tpu.matmul %300, %299, %cst_78 {dimension_numbers = #tpu.dot_dimension_numbers<[1], [0], [0], [1], [0, 0, 1, 1], [], []>} : vector<8x72xf32>, vector<72x512xf32>, vector<8x512xf32> -> vector<8x512xf32>
    %c0_79 = arith.constant 0 : index
    %c0_80 = arith.constant 0 : index
    %302 = vector.load %arg12[%c0_79, %c0_80] : memref<8x1xf32, #tpu.memory_space<vmem>>, vector<8x1xf32>
    %303 = vector.broadcast %302 : vector<8x1xf32> to vector<8x512xf32>
    %304 = arith.addf %301, %303 : vector<8x512xf32>
    %cst_81 = arith.constant 0.000000e+00 : f32
    %305 = vector.broadcast %cst_81 : f32 to vector<8x512xf32>
    %306 = arith.maximumf %304, %305 : vector<8x512xf32>
    %c511_i32_82 = arith.constant 511 : i32
    %307 = tpu.dynamic_rotate %306 by %c511_i32_82 dim 1 : vector<8x512xf32>, i32 -> vector<8x512xf32>
    %308 = arith.maximumf %306, %307 : vector<8x512xf32>
    %c496_i32_83 = arith.constant 496 : i32
    %309 = tpu.dynamic_rotate %308 by %c496_i32_83 dim 1 : vector<8x512xf32>, i32 -> vector<8x512xf32>
    %310 = arith.maximumf %308, %309 : vector<8x512xf32>
    %c0_84 = arith.constant 0 : index
    %c0_85 = arith.constant 0 : index
    %311 = vector.load %arg26[%c0_84, %c0_85] : memref<512x128xf32, #tpu.memory_space<vmem>>, vector<512x128xf32>
    %cst_86 = arith.constant dense<0.000000e+00> : vector<8x128xf32>
    %312 = tpu.matmul %310, %311, %cst_86 {dimension_numbers = #tpu.dot_dimension_numbers<[1], [0], [0], [1], [0, 0, 1, 1], [], []>} : vector<8x512xf32>, vector<512x128xf32>, vector<8x128xf32> -> vector<8x128xf32>
    %c9_i32 = arith.constant 9 : i32
    %313 = tpu.dynamic_rotate %312 by %c9_i32 dim 1 : vector<8x128xf32>, i32 -> vector<8x128xf32>
    %314 = vector.broadcast %52 : vector<1x128xf32> to vector<8x128xf32>
    %315 = arith.mulf %313, %314 : vector<8x128xf32>
    %c8_i32 = arith.constant 8 : i32
    %316 = tpu.dynamic_rotate %312 by %c8_i32 dim 1 : vector<8x128xf32>, i32 -> vector<8x128xf32>
    %317 = vector.broadcast %54 : vector<1x128xf32> to vector<8x128xf32>
    %318 = arith.mulf %316, %317 : vector<8x128xf32>
    %c7_i32_87 = arith.constant 7 : i32
    %319 = tpu.dynamic_rotate %312 by %c7_i32_87 dim 1 : vector<8x128xf32>, i32 -> vector<8x128xf32>
    %320 = vector.broadcast %57 : vector<1x128xf32> to vector<8x128xf32>
    %321 = arith.mulf %319, %320 : vector<8x128xf32>
    %c1_i32_88 = arith.constant 1 : i32
    %322 = tpu.dynamic_rotate %312 by %c1_i32_88 dim 1 : vector<8x128xf32>, i32 -> vector<8x128xf32>
    %323 = vector.broadcast %59 : vector<1x128xf32> to vector<8x128xf32>
    %324 = arith.mulf %322, %323 : vector<8x128xf32>
    %c127_i32 = arith.constant 127 : i32
    %325 = tpu.dynamic_rotate %312 by %c127_i32 dim 1 : vector<8x128xf32>, i32 -> vector<8x128xf32>
    %326 = vector.broadcast %61 : vector<1x128xf32> to vector<8x128xf32>
    %327 = arith.mulf %325, %326 : vector<8x128xf32>
    %c121_i32 = arith.constant 121 : i32
    %328 = tpu.dynamic_rotate %312 by %c121_i32 dim 1 : vector<8x128xf32>, i32 -> vector<8x128xf32>
    %329 = vector.broadcast %64 : vector<1x128xf32> to vector<8x128xf32>
    %330 = arith.mulf %328, %329 : vector<8x128xf32>
    %c120_i32 = arith.constant 120 : i32
    %331 = tpu.dynamic_rotate %312 by %c120_i32 dim 1 : vector<8x128xf32>, i32 -> vector<8x128xf32>
    %332 = vector.broadcast %66 : vector<1x128xf32> to vector<8x128xf32>
    %333 = arith.mulf %331, %332 : vector<8x128xf32>
    %c119_i32 = arith.constant 119 : i32
    %334 = tpu.dynamic_rotate %312 by %c119_i32 dim 1 : vector<8x128xf32>, i32 -> vector<8x128xf32>
    %335 = vector.broadcast %69 : vector<1x128xf32> to vector<8x128xf32>
    %336 = arith.mulf %334, %335 : vector<8x128xf32>
    %337 = tpu.concatenate %315, %318, %321, %324, %312, %327, %330, %333, %336 in 0 : vector<8x128xf32>, vector<8x128xf32>, vector<8x128xf32>, vector<8x128xf32>, vector<8x128xf32>, vector<8x128xf32>, vector<8x128xf32>, vector<8x128xf32>, vector<8x128xf32> -> vector<72x128xf32>
    %c0_89 = arith.constant 0 : index
    %c0_90 = arith.constant 0 : index
    %338 = vector.load %arg13[%c0_89, %c0_90] : memref<16x72xf32, #tpu.memory_space<vmem>>, vector<16x72xf32>
    %cst_91 = arith.constant dense<0.000000e+00> : vector<16x128xf32>
    %339 = tpu.matmul %338, %337, %cst_91 {dimension_numbers = #tpu.dot_dimension_numbers<[1], [0], [0], [1], [0, 0, 1, 1], [], []>} : vector<16x72xf32>, vector<72x128xf32>, vector<16x128xf32> -> vector<16x128xf32>
    %c0_92 = arith.constant 0 : index
    %c0_93 = arith.constant 0 : index
    %340 = vector.load %arg14[%c0_92, %c0_93] : memref<16x1xf32, #tpu.memory_space<vmem>>, vector<16x1xf32>
    %341 = vector.broadcast %340 : vector<16x1xf32> to vector<16x128xf32>
    %342 = arith.addf %339, %341 : vector<16x128xf32>
    %cst_94 = arith.constant 0.000000e+00 : f32
    %343 = vector.broadcast %cst_94 : f32 to vector<16x128xf32>
    %344 = arith.maximumf %342, %343 : vector<16x128xf32>
    %c9_i32_95 = arith.constant 9 : i32
    %345 = tpu.dynamic_rotate %344 by %c9_i32_95 dim 1 : vector<16x128xf32>, i32 -> vector<16x128xf32>
    %346 = vector.broadcast %52 : vector<1x128xf32> to vector<16x128xf32>
    %347 = arith.mulf %345, %346 : vector<16x128xf32>
    %c8_i32_96 = arith.constant 8 : i32
    %348 = tpu.dynamic_rotate %344 by %c8_i32_96 dim 1 : vector<16x128xf32>, i32 -> vector<16x128xf32>
    %349 = vector.broadcast %54 : vector<1x128xf32> to vector<16x128xf32>
    %350 = arith.mulf %348, %349 : vector<16x128xf32>
    %c7_i32_97 = arith.constant 7 : i32
    %351 = tpu.dynamic_rotate %344 by %c7_i32_97 dim 1 : vector<16x128xf32>, i32 -> vector<16x128xf32>
    %352 = vector.broadcast %57 : vector<1x128xf32> to vector<16x128xf32>
    %353 = arith.mulf %351, %352 : vector<16x128xf32>
    %c1_i32_98 = arith.constant 1 : i32
    %354 = tpu.dynamic_rotate %344 by %c1_i32_98 dim 1 : vector<16x128xf32>, i32 -> vector<16x128xf32>
    %355 = vector.broadcast %59 : vector<1x128xf32> to vector<16x128xf32>
    %356 = arith.mulf %354, %355 : vector<16x128xf32>
    %c127_i32_99 = arith.constant 127 : i32
    %357 = tpu.dynamic_rotate %344 by %c127_i32_99 dim 1 : vector<16x128xf32>, i32 -> vector<16x128xf32>
    %358 = vector.broadcast %61 : vector<1x128xf32> to vector<16x128xf32>
    %359 = arith.mulf %357, %358 : vector<16x128xf32>
    %c121_i32_100 = arith.constant 121 : i32
    %360 = tpu.dynamic_rotate %344 by %c121_i32_100 dim 1 : vector<16x128xf32>, i32 -> vector<16x128xf32>
    %361 = vector.broadcast %64 : vector<1x128xf32> to vector<16x128xf32>
    %362 = arith.mulf %360, %361 : vector<16x128xf32>
    %c120_i32_101 = arith.constant 120 : i32
    %363 = tpu.dynamic_rotate %344 by %c120_i32_101 dim 1 : vector<16x128xf32>, i32 -> vector<16x128xf32>
    %364 = vector.broadcast %66 : vector<1x128xf32> to vector<16x128xf32>
    %365 = arith.mulf %363, %364 : vector<16x128xf32>
    %c119_i32_102 = arith.constant 119 : i32
    %366 = tpu.dynamic_rotate %344 by %c119_i32_102 dim 1 : vector<16x128xf32>, i32 -> vector<16x128xf32>
    %367 = vector.broadcast %69 : vector<1x128xf32> to vector<16x128xf32>
    %368 = arith.mulf %366, %367 : vector<16x128xf32>
    %369 = tpu.concatenate %347, %350, %353, %356, %344, %359, %362, %365, %368 in 0 : vector<16x128xf32>, vector<16x128xf32>, vector<16x128xf32>, vector<16x128xf32>, vector<16x128xf32>, vector<16x128xf32>, vector<16x128xf32>, vector<16x128xf32>, vector<16x128xf32> -> vector<144x128xf32>
    %c0_103 = arith.constant 0 : index
    %c0_104 = arith.constant 0 : index
    %370 = vector.load %arg15[%c0_103, %c0_104] : memref<16x144xf32, #tpu.memory_space<vmem>>, vector<16x144xf32>
    %cst_105 = arith.constant dense<0.000000e+00> : vector<16x128xf32>
    %371 = tpu.matmul %370, %369, %cst_105 {dimension_numbers = #tpu.dot_dimension_numbers<[1], [0], [0], [1], [0, 0, 1, 1], [], []>} : vector<16x144xf32>, vector<144x128xf32>, vector<16x128xf32> -> vector<16x128xf32>
    %c0_106 = arith.constant 0 : index
    %c0_107 = arith.constant 0 : index
    %372 = vector.load %arg16[%c0_106, %c0_107] : memref<16x1xf32, #tpu.memory_space<vmem>>, vector<16x1xf32>
    %373 = vector.broadcast %372 : vector<16x1xf32> to vector<16x128xf32>
    %374 = arith.addf %371, %373 : vector<16x128xf32>
    %cst_108 = arith.constant 0.000000e+00 : f32
    %375 = vector.broadcast %cst_108 : f32 to vector<16x128xf32>
    %376 = arith.maximumf %374, %375 : vector<16x128xf32>
    %c127_i32_109 = arith.constant 127 : i32
    %377 = tpu.dynamic_rotate %376 by %c127_i32_109 dim 1 : vector<16x128xf32>, i32 -> vector<16x128xf32>
    %378 = arith.maximumf %376, %377 : vector<16x128xf32>
    %c120_i32_110 = arith.constant 120 : i32
    %379 = tpu.dynamic_rotate %378 by %c120_i32_110 dim 1 : vector<16x128xf32>, i32 -> vector<16x128xf32>
    %380 = arith.maximumf %378, %379 : vector<16x128xf32>
    %c0_111 = arith.constant 0 : index
    %c0_112 = arith.constant 0 : index
    %381 = vector.load %arg27[%c0_111, %c0_112] : memref<128x32xf32, #tpu.memory_space<vmem>>, vector<128x32xf32>
    %cst_113 = arith.constant dense<0.000000e+00> : vector<16x32xf32>
    %382 = tpu.matmul %380, %381, %cst_113 {dimension_numbers = #tpu.dot_dimension_numbers<[1], [0], [0], [1], [0, 0, 1, 1], [], []>} : vector<16x128xf32>, vector<128x32xf32>, vector<16x32xf32> -> vector<16x32xf32>
    %383 = vector.extract_strided_slice %382 {offsets = [0, 0], sizes = [1, 32], strides = [1, 1]} : vector<16x32xf32> to vector<1x32xf32>
    %c0_114 = arith.constant 0 : index
    %c0_115 = arith.constant 0 : index
    %384 = vector.load %arg17[%c0_114, %c0_115] : memref<512x64xf32, #tpu.memory_space<vmem>>, vector<32x64xf32>
    %cst_116 = arith.constant dense<0.000000e+00> : vector<1x64xf32>
    %385 = tpu.matmul %383, %384, %cst_116 {dimension_numbers = #tpu.dot_dimension_numbers<[1], [0], [0], [1], [0, 0, 1, 1], [], []>} : vector<1x32xf32>, vector<32x64xf32>, vector<1x64xf32> -> vector<1x64xf32>
    %386 = vector.extract_strided_slice %382 {offsets = [1, 0], sizes = [1, 32], strides = [1, 1]} : vector<16x32xf32> to vector<1x32xf32>
    %c32 = arith.constant 32 : index
    %c0_117 = arith.constant 0 : index
    %387 = vector.load %arg17[%c32, %c0_117] : memref<512x64xf32, #tpu.memory_space<vmem>>, vector<32x64xf32>
    %cst_118 = arith.constant dense<0.000000e+00> : vector<1x64xf32>
    %388 = tpu.matmul %386, %387, %cst_118 {dimension_numbers = #tpu.dot_dimension_numbers<[1], [0], [0], [1], [0, 0, 1, 1], [], []>} : vector<1x32xf32>, vector<32x64xf32>, vector<1x64xf32> -> vector<1x64xf32>
    %389 = arith.addf %385, %388 : vector<1x64xf32>
    %390 = vector.extract_strided_slice %382 {offsets = [2, 0], sizes = [1, 32], strides = [1, 1]} : vector<16x32xf32> to vector<1x32xf32>
    %c64 = arith.constant 64 : index
    %c0_119 = arith.constant 0 : index
    %391 = vector.load %arg17[%c64, %c0_119] : memref<512x64xf32, #tpu.memory_space<vmem>>, vector<32x64xf32>
    %cst_120 = arith.constant dense<0.000000e+00> : vector<1x64xf32>
    %392 = tpu.matmul %390, %391, %cst_120 {dimension_numbers = #tpu.dot_dimension_numbers<[1], [0], [0], [1], [0, 0, 1, 1], [], []>} : vector<1x32xf32>, vector<32x64xf32>, vector<1x64xf32> -> vector<1x64xf32>
    %393 = arith.addf %389, %392 : vector<1x64xf32>
    %394 = vector.extract_strided_slice %382 {offsets = [3, 0], sizes = [1, 32], strides = [1, 1]} : vector<16x32xf32> to vector<1x32xf32>
    %c96 = arith.constant 96 : index
    %c0_121 = arith.constant 0 : index
    %395 = vector.load %arg17[%c96, %c0_121] : memref<512x64xf32, #tpu.memory_space<vmem>>, vector<32x64xf32>
    %cst_122 = arith.constant dense<0.000000e+00> : vector<1x64xf32>
    %396 = tpu.matmul %394, %395, %cst_122 {dimension_numbers = #tpu.dot_dimension_numbers<[1], [0], [0], [1], [0, 0, 1, 1], [], []>} : vector<1x32xf32>, vector<32x64xf32>, vector<1x64xf32> -> vector<1x64xf32>
    %397 = arith.addf %393, %396 : vector<1x64xf32>
    %398 = vector.extract_strided_slice %382 {offsets = [4, 0], sizes = [1, 32], strides = [1, 1]} : vector<16x32xf32> to vector<1x32xf32>
    %c128_123 = arith.constant 128 : index
    %c0_124 = arith.constant 0 : index
    %399 = vector.load %arg17[%c128_123, %c0_124] : memref<512x64xf32, #tpu.memory_space<vmem>>, vector<32x64xf32>
    %cst_125 = arith.constant dense<0.000000e+00> : vector<1x64xf32>
    %400 = tpu.matmul %398, %399, %cst_125 {dimension_numbers = #tpu.dot_dimension_numbers<[1], [0], [0], [1], [0, 0, 1, 1], [], []>} : vector<1x32xf32>, vector<32x64xf32>, vector<1x64xf32> -> vector<1x64xf32>
    %401 = arith.addf %397, %400 : vector<1x64xf32>
    %402 = vector.extract_strided_slice %382 {offsets = [5, 0], sizes = [1, 32], strides = [1, 1]} : vector<16x32xf32> to vector<1x32xf32>
    %c160 = arith.constant 160 : index
    %c0_126 = arith.constant 0 : index
    %403 = vector.load %arg17[%c160, %c0_126] : memref<512x64xf32, #tpu.memory_space<vmem>>, vector<32x64xf32>
    %cst_127 = arith.constant dense<0.000000e+00> : vector<1x64xf32>
    %404 = tpu.matmul %402, %403, %cst_127 {dimension_numbers = #tpu.dot_dimension_numbers<[1], [0], [0], [1], [0, 0, 1, 1], [], []>} : vector<1x32xf32>, vector<32x64xf32>, vector<1x64xf32> -> vector<1x64xf32>
    %405 = arith.addf %401, %404 : vector<1x64xf32>
    %406 = vector.extract_strided_slice %382 {offsets = [6, 0], sizes = [1, 32], strides = [1, 1]} : vector<16x32xf32> to vector<1x32xf32>
    %c192 = arith.constant 192 : index
    %c0_128 = arith.constant 0 : index
    %407 = vector.load %arg17[%c192, %c0_128] : memref<512x64xf32, #tpu.memory_space<vmem>>, vector<32x64xf32>
    %cst_129 = arith.constant dense<0.000000e+00> : vector<1x64xf32>
    %408 = tpu.matmul %406, %407, %cst_129 {dimension_numbers = #tpu.dot_dimension_numbers<[1], [0], [0], [1], [0, 0, 1, 1], [], []>} : vector<1x32xf32>, vector<32x64xf32>, vector<1x64xf32> -> vector<1x64xf32>
    %409 = arith.addf %405, %408 : vector<1x64xf32>
    %410 = vector.extract_strided_slice %382 {offsets = [7, 0], sizes = [1, 32], strides = [1, 1]} : vector<16x32xf32> to vector<1x32xf32>
    %c224 = arith.constant 224 : index
    %c0_130 = arith.constant 0 : index
    %411 = vector.load %arg17[%c224, %c0_130] : memref<512x64xf32, #tpu.memory_space<vmem>>, vector<32x64xf32>
    %cst_131 = arith.constant dense<0.000000e+00> : vector<1x64xf32>
    %412 = tpu.matmul %410, %411, %cst_131 {dimension_numbers = #tpu.dot_dimension_numbers<[1], [0], [0], [1], [0, 0, 1, 1], [], []>} : vector<1x32xf32>, vector<32x64xf32>, vector<1x64xf32> -> vector<1x64xf32>
    %413 = arith.addf %409, %412 : vector<1x64xf32>
    %414 = vector.extract_strided_slice %382 {offsets = [8, 0], sizes = [1, 32], strides = [1, 1]} : vector<16x32xf32> to vector<1x32xf32>
    %c256_132 = arith.constant 256 : index
    %c0_133 = arith.constant 0 : index
    %415 = vector.load %arg17[%c256_132, %c0_133] : memref<512x64xf32, #tpu.memory_space<vmem>>, vector<32x64xf32>
    %cst_134 = arith.constant dense<0.000000e+00> : vector<1x64xf32>
    %416 = tpu.matmul %414, %415, %cst_134 {dimension_numbers = #tpu.dot_dimension_numbers<[1], [0], [0], [1], [0, 0, 1, 1], [], []>} : vector<1x32xf32>, vector<32x64xf32>, vector<1x64xf32> -> vector<1x64xf32>
    %417 = arith.addf %413, %416 : vector<1x64xf32>
    %418 = vector.extract_strided_slice %382 {offsets = [9, 0], sizes = [1, 32], strides = [1, 1]} : vector<16x32xf32> to vector<1x32xf32>
    %c288 = arith.constant 288 : index
    %c0_135 = arith.constant 0 : index
    %419 = vector.load %arg17[%c288, %c0_135] : memref<512x64xf32, #tpu.memory_space<vmem>>, vector<32x64xf32>
    %cst_136 = arith.constant dense<0.000000e+00> : vector<1x64xf32>
    %420 = tpu.matmul %418, %419, %cst_136 {dimension_numbers = #tpu.dot_dimension_numbers<[1], [0], [0], [1], [0, 0, 1, 1], [], []>} : vector<1x32xf32>, vector<32x64xf32>, vector<1x64xf32> -> vector<1x64xf32>
    %421 = arith.addf %417, %420 : vector<1x64xf32>
    %422 = vector.extract_strided_slice %382 {offsets = [10, 0], sizes = [1, 32], strides = [1, 1]} : vector<16x32xf32> to vector<1x32xf32>
    %c320 = arith.constant 320 : index
    %c0_137 = arith.constant 0 : index
    %423 = vector.load %arg17[%c320, %c0_137] : memref<512x64xf32, #tpu.memory_space<vmem>>, vector<32x64xf32>
    %cst_138 = arith.constant dense<0.000000e+00> : vector<1x64xf32>
    %424 = tpu.matmul %422, %423, %cst_138 {dimension_numbers = #tpu.dot_dimension_numbers<[1], [0], [0], [1], [0, 0, 1, 1], [], []>} : vector<1x32xf32>, vector<32x64xf32>, vector<1x64xf32> -> vector<1x64xf32>
    %425 = arith.addf %421, %424 : vector<1x64xf32>
    %426 = vector.extract_strided_slice %382 {offsets = [11, 0], sizes = [1, 32], strides = [1, 1]} : vector<16x32xf32> to vector<1x32xf32>
    %c352 = arith.constant 352 : index
    %c0_139 = arith.constant 0 : index
    %427 = vector.load %arg17[%c352, %c0_139] : memref<512x64xf32, #tpu.memory_space<vmem>>, vector<32x64xf32>
    %cst_140 = arith.constant dense<0.000000e+00> : vector<1x64xf32>
    %428 = tpu.matmul %426, %427, %cst_140 {dimension_numbers = #tpu.dot_dimension_numbers<[1], [0], [0], [1], [0, 0, 1, 1], [], []>} : vector<1x32xf32>, vector<32x64xf32>, vector<1x64xf32> -> vector<1x64xf32>
    %429 = arith.addf %425, %428 : vector<1x64xf32>
    %430 = vector.extract_strided_slice %382 {offsets = [12, 0], sizes = [1, 32], strides = [1, 1]} : vector<16x32xf32> to vector<1x32xf32>
    %c384_141 = arith.constant 384 : index
    %c0_142 = arith.constant 0 : index
    %431 = vector.load %arg17[%c384_141, %c0_142] : memref<512x64xf32, #tpu.memory_space<vmem>>, vector<32x64xf32>
    %cst_143 = arith.constant dense<0.000000e+00> : vector<1x64xf32>
    %432 = tpu.matmul %430, %431, %cst_143 {dimension_numbers = #tpu.dot_dimension_numbers<[1], [0], [0], [1], [0, 0, 1, 1], [], []>} : vector<1x32xf32>, vector<32x64xf32>, vector<1x64xf32> -> vector<1x64xf32>
    %433 = arith.addf %429, %432 : vector<1x64xf32>
    %434 = vector.extract_strided_slice %382 {offsets = [13, 0], sizes = [1, 32], strides = [1, 1]} : vector<16x32xf32> to vector<1x32xf32>
    %c416 = arith.constant 416 : index
    %c0_144 = arith.constant 0 : index
    %435 = vector.load %arg17[%c416, %c0_144] : memref<512x64xf32, #tpu.memory_space<vmem>>, vector<32x64xf32>
    %cst_145 = arith.constant dense<0.000000e+00> : vector<1x64xf32>
    %436 = tpu.matmul %434, %435, %cst_145 {dimension_numbers = #tpu.dot_dimension_numbers<[1], [0], [0], [1], [0, 0, 1, 1], [], []>} : vector<1x32xf32>, vector<32x64xf32>, vector<1x64xf32> -> vector<1x64xf32>
    %437 = arith.addf %433, %436 : vector<1x64xf32>
    %438 = vector.extract_strided_slice %382 {offsets = [14, 0], sizes = [1, 32], strides = [1, 1]} : vector<16x32xf32> to vector<1x32xf32>
    %c448 = arith.constant 448 : index
    %c0_146 = arith.constant 0 : index
    %439 = vector.load %arg17[%c448, %c0_146] : memref<512x64xf32, #tpu.memory_space<vmem>>, vector<32x64xf32>
    %cst_147 = arith.constant dense<0.000000e+00> : vector<1x64xf32>
    %440 = tpu.matmul %438, %439, %cst_147 {dimension_numbers = #tpu.dot_dimension_numbers<[1], [0], [0], [1], [0, 0, 1, 1], [], []>} : vector<1x32xf32>, vector<32x64xf32>, vector<1x64xf32> -> vector<1x64xf32>
    %441 = arith.addf %437, %440 : vector<1x64xf32>
    %442 = vector.extract_strided_slice %382 {offsets = [15, 0], sizes = [1, 32], strides = [1, 1]} : vector<16x32xf32> to vector<1x32xf32>
    %c480 = arith.constant 480 : index
    %c0_148 = arith.constant 0 : index
    %443 = vector.load %arg17[%c480, %c0_148] : memref<512x64xf32, #tpu.memory_space<vmem>>, vector<32x64xf32>
    %cst_149 = arith.constant dense<0.000000e+00> : vector<1x64xf32>
    %444 = tpu.matmul %442, %443, %cst_149 {dimension_numbers = #tpu.dot_dimension_numbers<[1], [0], [0], [1], [0, 0, 1, 1], [], []>} : vector<1x32xf32>, vector<32x64xf32>, vector<1x64xf32> -> vector<1x64xf32>
    %445 = arith.addf %441, %444 : vector<1x64xf32>
    %c0_150 = arith.constant 0 : index
    %c0_151 = arith.constant 0 : index
    %446 = vector.load %arg18[%c0_150, %c0_151] : memref<1x64xf32, #tpu.memory_space<vmem>>, vector<1x64xf32>
    %447 = arith.addf %445, %446 : vector<1x64xf32>
    %c0_152 = arith.constant 0 : index
    %c0_153 = arith.constant 0 : index
    %448 = vector.load %arg19[%c0_152, %c0_153] : memref<64x64xf32, #tpu.memory_space<vmem>>, vector<64x64xf32>
    %cst_154 = arith.constant dense<0.000000e+00> : vector<1x64xf32>
    %449 = tpu.matmul %207, %448, %cst_154 {dimension_numbers = #tpu.dot_dimension_numbers<[1], [0], [0], [1], [0, 0, 1, 1], [], []>} : vector<1x64xf32>, vector<64x64xf32>, vector<1x64xf32> -> vector<1x64xf32>
    %c0_155 = arith.constant 0 : index
    %c0_156 = arith.constant 0 : index
    %450 = vector.load %arg20[%c0_155, %c0_156] : memref<64x64xf32, #tpu.memory_space<vmem>>, vector<64x64xf32>
    %cst_157 = arith.constant dense<0.000000e+00> : vector<1x64xf32>
    %451 = tpu.matmul %447, %450, %cst_157 {dimension_numbers = #tpu.dot_dimension_numbers<[1], [0], [0], [1], [0, 0, 1, 1], [], []>} : vector<1x64xf32>, vector<64x64xf32>, vector<1x64xf32> -> vector<1x64xf32>
    %452 = arith.addf %449, %451 : vector<1x64xf32>
    %c0_158 = arith.constant 0 : index
    %c0_159 = arith.constant 0 : index
    %453 = vector.load %arg21[%c0_158, %c0_159] : memref<1x64xf32, #tpu.memory_space<vmem>>, vector<1x64xf32>
    %454 = arith.addf %452, %453 : vector<1x64xf32>
    %cst_160 = arith.constant 0.000000e+00 : f32
    %455 = vector.broadcast %cst_160 : f32 to vector<1x64xf32>
    %456 = arith.maximumf %454, %455 : vector<1x64xf32>
    %c0_161 = arith.constant 0 : index
    %c0_162 = arith.constant 0 : index
    %457 = vector.load %arg22[%c0_161, %c0_162] : memref<64x32xf32, #tpu.memory_space<vmem>>, vector<64x32xf32>
    %cst_163 = arith.constant dense<0.000000e+00> : vector<1x32xf32>
    %458 = tpu.matmul %456, %457, %cst_163 {dimension_numbers = #tpu.dot_dimension_numbers<[1], [0], [0], [1], [0, 0, 1, 1], [], []>} : vector<1x64xf32>, vector<64x32xf32>, vector<1x32xf32> -> vector<1x32xf32>
    %c0_164 = arith.constant 0 : index
    %c0_165 = arith.constant 0 : index
    %459 = vector.load %arg23[%c0_164, %c0_165] : memref<1x32xf32, #tpu.memory_space<vmem>>, vector<1x32xf32>
    %460 = arith.addf %458, %459 : vector<1x32xf32>
    %cst_166 = arith.constant 0.000000e+00 : f32
    %461 = vector.broadcast %cst_166 : f32 to vector<1x32xf32>
    %462 = arith.maximumf %460, %461 : vector<1x32xf32>
    %c0_167 = arith.constant 0 : index
    %c0_168 = arith.constant 0 : index
    %463 = vector.load %arg24[%c0_167, %c0_168] : memref<32x20xf32, #tpu.memory_space<vmem>>, vector<32x20xf32>
    %cst_169 = arith.constant dense<0.000000e+00> : vector<1x20xf32>
    %464 = tpu.matmul %462, %463, %cst_169 {dimension_numbers = #tpu.dot_dimension_numbers<[1], [0], [0], [1], [0, 0, 1, 1], [], []>} : vector<1x32xf32>, vector<32x20xf32>, vector<1x20xf32> -> vector<1x20xf32>
    %c0_170 = arith.constant 0 : index
    %c0_171 = arith.constant 0 : index
    %465 = vector.load %arg25[%c0_170, %c0_171] : memref<1x20xf32, #tpu.memory_space<vmem>>, vector<1x20xf32>
    %466 = arith.addf %464, %465 : vector<1x20xf32>
    %c0_172 = arith.constant 0 : index
    %c0_173 = arith.constant 0 : index
    %c0_174 = arith.constant 0 : index
    %467 = vector.load %arg28[%c0_172, %c0_173, %c0_174] : memref<1x1x20xf32, #tpu.memory_space<vmem>>, vector<1x1x20xf32>
    %468 = vector.shape_cast %467 : vector<1x1x20xf32> to vector<1x20xf32>
    %469 = vector.shape_cast %466 : vector<1x20xf32> to vector<1x1x20xf32>
    tpu.vector_store %arg28[%c0_172, %c0_173, %c0_174], %469 {strides = array<i32>} : memref<1x1x20xf32, #tpu.memory_space<vmem>>, vector<1x1x20xf32>,
    return
  }
  func.func @transform_0(%arg0: i32) -> (i32, i32) {
    %c0_i32 = arith.constant 0 : i32
    %c0_i32_0 = arith.constant 0 : i32
    return %c0_i32, %arg0 : i32, i32
  }
  func.func @transform_1(%arg0: i32) -> (i32, i32) {
    %c0_i32 = arith.constant 0 : i32
    %c0_i32_0 = arith.constant 0 : i32
    return %c0_i32, %arg0 : i32, i32
  }
  func.func @transform_2(%arg0: i32) -> (i32, i32) {
    %c0_i32 = arith.constant 0 : i32
    %c0_i32_0 = arith.constant 0 : i32
    %c0_i32_1 = arith.constant 0 : i32
    return %c0_i32, %c0_i32_0 : i32, i32
  }
  func.func @transform_3(%arg0: i32) -> (i32, i32) {
    %c0_i32 = arith.constant 0 : i32
    %c0_i32_0 = arith.constant 0 : i32
    %c0_i32_1 = arith.constant 0 : i32
    return %c0_i32, %c0_i32_0 : i32, i32
  }
  func.func @transform_4(%arg0: i32) -> (i32, i32) {
    %c0_i32 = arith.constant 0 : i32
    %c0_i32_0 = arith.constant 0 : i32
    %c0_i32_1 = arith.constant 0 : i32
    return %c0_i32, %c0_i32_0 : i32, i32
  }
  func.func @transform_5(%arg0: i32) -> (i32, i32) {
    %c0_i32 = arith.constant 0 : i32
    %c0_i32_0 = arith.constant 0 : i32
    %c0_i32_1 = arith.constant 0 : i32
    return %c0_i32, %c0_i32_0 : i32, i32
  }
  func.func @transform_6(%arg0: i32) -> (i32, i32) {
    %c0_i32 = arith.constant 0 : i32
    %c0_i32_0 = arith.constant 0 : i32
    %c0_i32_1 = arith.constant 0 : i32
    return %c0_i32, %c0_i32_0 : i32, i32
  }
  func.func @transform_7(%arg0: i32) -> (i32, i32) {
    %c0_i32 = arith.constant 0 : i32
    %c0_i32_0 = arith.constant 0 : i32
    %c0_i32_1 = arith.constant 0 : i32
    return %c0_i32, %c0_i32_0 : i32, i32
  }
  func.func @transform_8(%arg0: i32) -> (i32, i32) {
    %c0_i32 = arith.constant 0 : i32
    %c0_i32_0 = arith.constant 0 : i32
    %c0_i32_1 = arith.constant 0 : i32
    return %c0_i32, %c0_i32_0 : i32, i32
  }
  func.func @transform_9(%arg0: i32) -> (i32, i32) {
    %c0_i32 = arith.constant 0 : i32
    %c0_i32_0 = arith.constant 0 : i32
    %c0_i32_1 = arith.constant 0 : i32
    return %c0_i32, %c0_i32_0 : i32, i32
  }
  func.func @transform_10(%arg0: i32) -> (i32, i32) {
    %c0_i32 = arith.constant 0 : i32
    %c0_i32_0 = arith.constant 0 : i32
    %c0_i32_1 = arith.constant 0 : i32
    return %c0_i32, %c0_i32_0 : i32, i32
  }
  func.func @transform_11(%arg0: i32) -> (i32, i32) {
    %c0_i32 = arith.constant 0 : i32
    %c0_i32_0 = arith.constant 0 : i32
    %c0_i32_1 = arith.constant 0 : i32
    return %c0_i32, %c0_i32_0 : i32, i32
  }
  func.func @transform_12(%arg0: i32) -> (i32, i32) {
    %c0_i32 = arith.constant 0 : i32
    %c0_i32_0 = arith.constant 0 : i32
    %c0_i32_1 = arith.constant 0 : i32
    return %c0_i32, %c0_i32_0 : i32, i32
  }
  func.func @transform_13(%arg0: i32) -> (i32, i32) {
    %c0_i32 = arith.constant 0 : i32
    %c0_i32_0 = arith.constant 0 : i32
    %c0_i32_1 = arith.constant 0 : i32
    return %c0_i32, %c0_i32_0 : i32, i32
  }
  func.func @transform_14(%arg0: i32) -> (i32, i32) {
    %c0_i32 = arith.constant 0 : i32
    %c0_i32_0 = arith.constant 0 : i32
    %c0_i32_1 = arith.constant 0 : i32
    return %c0_i32, %c0_i32_0 : i32, i32
  }
  func.func @transform_15(%arg0: i32) -> (i32, i32) {
    %c0_i32 = arith.constant 0 : i32
    %c0_i32_0 = arith.constant 0 : i32
    %c0_i32_1 = arith.constant 0 : i32
    return %c0_i32, %c0_i32_0 : i32, i32
  }
  func.func @transform_16(%arg0: i32) -> (i32, i32) {
    %c0_i32 = arith.constant 0 : i32
    %c0_i32_0 = arith.constant 0 : i32
    %c0_i32_1 = arith.constant 0 : i32
    return %c0_i32, %c0_i32_0 : i32, i32
  }
  func.func @transform_17(%arg0: i32) -> (i32, i32) {
    %c0_i32 = arith.constant 0 : i32
    %c0_i32_0 = arith.constant 0 : i32
    %c0_i32_1 = arith.constant 0 : i32
    return %c0_i32, %c0_i32_0 : i32, i32
  }
  func.func @transform_18(%arg0: i32) -> (i32, i32) {
    %c0_i32 = arith.constant 0 : i32
    %c0_i32_0 = arith.constant 0 : i32
    %c0_i32_1 = arith.constant 0 : i32
    return %c0_i32, %c0_i32_0 : i32, i32
  }
  func.func @transform_19(%arg0: i32) -> (i32, i32) {
    %c0_i32 = arith.constant 0 : i32
    %c0_i32_0 = arith.constant 0 : i32
    %c0_i32_1 = arith.constant 0 : i32
    return %c0_i32, %c0_i32_0 : i32, i32
  }
  func.func @transform_20(%arg0: i32) -> (i32, i32) {
    %c0_i32 = arith.constant 0 : i32
    %c0_i32_0 = arith.constant 0 : i32
    %c0_i32_1 = arith.constant 0 : i32
    return %c0_i32, %c0_i32_0 : i32, i32
  }
  func.func @transform_21(%arg0: i32) -> (i32, i32) {
    %c0_i32 = arith.constant 0 : i32
    %c0_i32_0 = arith.constant 0 : i32
    %c0_i32_1 = arith.constant 0 : i32
    return %c0_i32, %c0_i32_0 : i32, i32
  }
  func.func @transform_22(%arg0: i32) -> (i32, i32) {
    %c0_i32 = arith.constant 0 : i32
    %c0_i32_0 = arith.constant 0 : i32
    %c0_i32_1 = arith.constant 0 : i32
    return %c0_i32, %c0_i32_0 : i32, i32
  }
  func.func @transform_23(%arg0: i32) -> (i32, i32) {
    %c0_i32 = arith.constant 0 : i32
    %c0_i32_0 = arith.constant 0 : i32
    %c0_i32_1 = arith.constant 0 : i32
    return %c0_i32, %c0_i32_0 : i32, i32
  }
  func.func @transform_24(%arg0: i32) -> (i32, i32) {
    %c0_i32 = arith.constant 0 : i32
    %c0_i32_0 = arith.constant 0 : i32
    %c0_i32_1 = arith.constant 0 : i32
    return %c0_i32, %c0_i32_0 : i32, i32
  }
  func.func @transform_25(%arg0: i32) -> (i32, i32) {
    %c0_i32 = arith.constant 0 : i32
    %c0_i32_0 = arith.constant 0 : i32
    %c0_i32_1 = arith.constant 0 : i32
    return %c0_i32, %c0_i32_0 : i32, i32
  }
  func.func @transform_26(%arg0: i32) -> (i32, i32) {
    %c0_i32 = arith.constant 0 : i32
    %c0_i32_0 = arith.constant 0 : i32
    %c0_i32_1 = arith.constant 0 : i32
    return %c0_i32, %c0_i32_0 : i32, i32
  }
  func.func @transform_27(%arg0: i32) -> (i32, i32, i32) {
    %c0_i32 = arith.constant 0 : i32
    %c0_i32_0 = arith.constant 0 : i32
    %c0_i32_1 = arith.constant 0 : i32
    return %arg0, %c0_i32, %c0_i32_0 : i32, i32, i32
  }
}

</mosaic_0001>

<bundles_post_ra>
// kernel: avmnist_forward.1
= control target key start
LH: loop header
LB: loop body
LE: loop exit
PB: predicated region body
PF: predicated region fallthrough
CT: control target
= control target key end

     0   :  { %v86_v0 = vlaneseq  ;;  %v9304_v1 = vmov 1   ;;  %v9294_v2 = vmov 0   ;;  %v9307_v11 = vmov 0.0   ;;  %s9340_s30 = smov 17   ;;  %s9336_s29 = smov 1   ;;  %s9252_s0 = inlined_call_operand.vmem [shape: f32[1,512], index: 0, kind: input, shape index: {}]   ;;  %s9253_s2 = inlined_call_operand.vmem [shape: f32[8,9], index: 2, kind: input, shape index: {}]   ;;  %s9254_s3 = inlined_call_operand.vmem [shape: f32[8,1], index: 3, kind: input, shape index: {}]   ;;  %s9255_s5 = inlined_call_operand.vmem [shape: f32[8,1], index: 5, kind: input, shape index: {}]   ;;  %s9256_s4 = inlined_call_operand.vmem [shape: f32[8,72], index: 4, kind: input, shape index: {}]   ;;  %s9257_s25 = inlined_call_operand.vmem [shape: f32[512,128], index: 25, kind: input, shape index: {}]   ;;  %s9258_s1 = inlined_call_operand.vmem [shape: f32[1,512], index: 1, kind: input, shape index: {}]   ;;  %s9259_s8 = inlined_call_operand.vmem [shape: f32[8,9], index: 8, kind: input, shape index: {}]   ;;  %s9260_s9 = inlined_call_operand.vmem [shape: f32[8,1], index: 9, kind: input, shape index: {}]   ;;  %s9261_s6 = inlined_call_operand.vmem [shape: f32[1024,64], index: 6, kind: input, shape index: {}]   ;;  %s9262_s11 = inlined_call_operand.vmem [shape: f32[8,1], index: 11, kind: input, shape index: {}]   ;;  %s9263_s10 = inlined_call_operand.vmem [shape: f32[8,72], index: 10, kind: input, shape index: {}]   ;;  %s9264_s12 = inlined_call_operand.vmem [shape: f32[16,72], index: 12, kind: input, shape index: {}]   ;;  %s9265_s13 = inlined_call_operand.vmem [shape: f32[16,1], index: 13, kind: input, shape index: {}]   ;;  %s9266_s14 = inlined_call_operand.vmem [shape: f32[16,144], index: 14, kind: input, shape index: {}]   ;;  %s9267_s15 = inlined_call_operand.vmem [shape: f32[16,1], index: 15, kind: input, shape index: {}]   ;;  %s9268_s26 = inlined_call_operand.vmem [shape: f32[128,32], index: 26, kind: input, shape index: {}]   ;;  %s9269_s16 = inlined_call_operand.vmem [shape: f32[512,64], index: 16, kind: input, shape index: {}]   ;;  %s9270_s18 = inlined_call_operand.vmem [shape: f32[64,64], index: 18, kind: input, shape index: {}]   ;;  %s9271_s7 = inlined_call_operand.vmem [shape: f32[1,64], index: 7, kind: input, shape index: {}]   ;;  %s9272_s19 = inlined_call_operand.vmem [shape: f32[64,64], index: 19, kind: input, shape index: {}]   ;;  %s9273_s17 = inlined_call_operand.vmem [shape: f32[1,64], index: 17, kind: input, shape index: {}]   ;;  %s9274_s21 = inlined_call_operand.vmem [shape: f32[64,32], index: 21, kind: input, shape index: {}]   ;;  %s9275_s23 = inlined_call_operand.vmem [shape: f32[32,20], index: 23, kind: input, shape index: {}]   ;;  %s9276_s20 = inlined_call_operand.vmem [shape: f32[1,64], index: 20, kind: input, shape index: {}]   ;;  %s9277_s22 = inlined_call_operand.vmem [shape: f32[1,32], index: 22, kind: input, shape index: {}]   ;;  %s9278_s24 = inlined_call_operand.vmem [shape: f32[1,20], index: 24, kind: input, shape index: {}]   ;;  %s9279_s27 = inlined_call_operand.vmem [shape: f32[1,1,20], index: 27, kind: output, shape index: {}]  }
   0x1   :  { %9371 = sst [smem:[#allocation29_spill]] %s9252_s0  ;;  %5763 = vset.pattern.permute.xlu1 %v9304_v1  ;;  %5762 = vset.pattern.permute.xlu0 %v9294_v2  ;;  %v9300_v15 = vmov 2   ;;  %v9299_v16 = vmov 3   ;;  %v9298_v17 = vmov 4   ;;  %v9297_v18 = vmov 6  }
   0x2   :  { %9372 = sst [smem:[#allocation30_spill]] %s9253_s2  ;;  %v6065_v3 = vshrl.u32 %v86_v0, 7  ;;  %835 = vmatprep.mubr.f32.mxu0 %v9307_v11  ;;  %906 = vmatprep.mubr.f32.mxu1 %v9307_v11  ;;  %v9296_v19 = vmov 5   ;;  %s9334_s2 = smov 113   ;;  %v9293_v20 = vmov 7   ;;  %v9292_v21 = vmov 8  }
   0x3   :  { %9373 = sst [smem:[#allocation31_spill]] %s9254_s3  ;;  %s9332_s3 = smov 111   ;;  %v6189_v31 = vand.u32 127, %v86_v0  ;;  %v9392_v56 = vmov 0  ;;  %v9398_v61 = vmov 0  ;;  %v9402_v63 = vmov 0 }
   0x4   :  { %9374 = sst [smem:[#allocation32_spill]] %s9255_s5  ;;  %9383 = vst [vmem:[#allocation2_spill] sm:$0xff] %v6065_v3  ;;  %v6071_v5 = vsub.s32 0, %v6065_v3  ;;  %v9301_v6 = vsub.s32 2, %v6065_v3  ;;  %v9302_v7 = vsub.s32 3, %v6065_v3  ;;  %v9303_v8 = vsub.s32 1, %v6065_v3 }
   0x5   :  { %9375 = sst [smem:[#allocation33_spill]] %s9256_s4  ;;  %v90_v34 = vadd.s32 384, %v6189_v31  ;;  %v89_v37 = vadd.s32 256, %v6189_v31  ;;  %v95_v38 = vshra.s32 %v6189_v31, 4  ;;  %v88_v39 = vadd.s32 128, %v6189_v31  ;;  %s9521_s5 = smov 1  }
   0x6   :  { %9376 = sst [smem:[#allocation34_spill]] %s9257_s25  ;;  %v91_v44 = vand.u32 15, %v6189_v31 }
   0x7   :  { %9377 = sst [smem:[#allocation35_spill]] %s9258_s1  ;;  %s9338_s1 = smov 127   ;;  %v98_v40 = vshra.s32 %v90_v34, 4  ;;  %v97_v43 = vshra.s32 %v89_v37, 4  ;;  %v6208_v45 = vand.u32 15, %v95_v38  ;;  %v96_v46 = vshra.s32 %v88_v39, 4 }
   0x8   :  { %9378 = sst [smem:[#allocation36_spill]] %s9259_s8  ;;  %v94_v47 = vand.u32 15, %v90_v34  ;;  %v92_v49 = vand.u32 15, %v88_v39  ;;  %v93_v52 = vand.u32 15, %v89_v37  ;;  %vm6219_vm1 = vcmp.ne.s32.totalorder %v91_v44, 0 }
   0x9   :  { %9379 = sst [smem:[#allocation37_spill]] %s9260_s9  ;;  %v6210_v48 = vand.u32 15, %v98_v40  ;;  %v6216_v53 = vand.u32 15, %v97_v43  ;;  %vm9283_vm0 = vcmp.ne.s32.totalorder %v6208_v45, 0  ;;  %v6223_v55 = vand.u32 15, %v96_v46 }
   0xa   :  { %9380 = sst [smem:[#allocation38_spill]] %s9261_s6  ;;  %s9342_s6 = smov 16   ;;  %vm6226_vm3 = vcmp.ne.s32.totalorder %v94_v47, 0  ;;  %vm6230_vm4 = vcmp.ne.s32.totalorder %v92_v49, 0  ;;  %vm6242_vm5 = vmand %vm9283_vm0, %vm6219_vm1  ;;  %vm6247_vm7 = vcmp.ne.s32.totalorder %v93_v52, 0  ;;  %vm6260_vm10 = vcmp.ne.s32.totalorder %v92_v49, 15 }
   0xb   :  { %9381 = sst [smem:[#allocation39_spill]] %s9262_s11  ;;  %s9344_s11 = smov 15   ;;  %vm9282_vm2 = vcmp.ne.s32.totalorder %v6210_v48, 0  ;;  %v9393_v56 = vsel %vm6226_vm3, 4294967295, %v9392_v56  ;;  %vm9291_vm6 = vcmp.ne.s32.totalorder %v6216_v53, 0  ;;  %v9399_v61 = vsel %vm6247_vm7, 4294967295, %v9398_v61 }
   0xc   :  { %9382 = sst [smem:[#allocation40_spill]] %s9263_s10  ;;  %s5911_s10 = smov 112   ;;  %vm6255_vm8 = vmand %vm9282_vm2, %vm6226_vm3  ;;  %vm9284_vm9 = vcmp.ne.s32.totalorder %v6223_v55, 0  ;;  %v9403_v63 = vsel %vm6260_vm10, 4294967295, %v9402_v63  ;;  %vm6272_vm12 = vcmp.ne.s32.totalorder %v93_v52, 15  ;;  %vm6284_vm14 = vcmp.ne.s32.totalorder %v91_v44, 15 }
   0xd   :  { %s9384_s9 = sld [smem:[#allocation29_spill]]  ;;  %vm6268_vm11 = vmand %vm9284_vm9, %vm6230_vm4  ;;  %vm6300_vm2 = vcmp.ne.s32.totalorder %v94_v47, 15  ;;  %v6315_v43 = vsel %vm6242_vm5, 1.0, %v9307_v11  ;;  %vm9419_vm3 = vcmp.ne.s32.totalorder %v6208_v45, 0  ;;  %v6331_v46 = vsel %vm6255_vm8, 1.0, %v9307_v11 }
   0xe   :  { %s9388_s0 = sld [smem:[#allocation30_spill]]  ;;  %vm6280_vm13 = vmand %vm9291_vm6, %vm6247_vm7  ;;  %9418 = vst [vmem:[#allocation6_spill] sm:$0xff] %v6315_v43  ;;  %vm108_vm8 = vcmp.ne.s32.totalorder %v6223_v55, 15  ;;  %v6355_v62 = vsel %vm6268_vm11, 1.0, %v9307_v11  ;;  %v6444_v54 = vsel %vm6300_vm2, 1.0, %v9307_v11 }
   0xf   :  { %s9389_s4 = sld [smem:[#allocation31_spill]]  ;;  %vm6296_vm15 = vmand %vm9284_vm9, %vm6260_vm10  ;;  %9422 = vst [vmem:[#allocation7_spill] sm:$0xff] %v6331_v46  ;;  %vm9425_vm10 = vcmp.ne.s32.totalorder %v6210_v48, 0 }
  0x10   :  { %vm6308_vm0 = vmand %vm9291_vm6, %vm6272_vm12  ;;  %vm107_vm6 = vcmp.ne.s32.totalorder %v6208_v45, 15  ;;  %v6341_v49 = vsel %vm9425_vm10, 1.0, %v9307_v11  ;;  %9428 = vst [vmem:[#allocation10_spill] sm:$0xff] %v6355_v62  ;;  %v6376_v0 = vsel %vm6296_vm15, 1.0, %v9307_v11  ;;  %s9485_s28 = sld [smem:[#allocation32_spill]] }
  0x11   :  { %vm6323_vm7 = vmand %vm9419_vm3, %vm6284_vm14  ;;  %9426 = vst [vmem:[#allocation9_spill] sm:$0xff] %v6341_v49  ;;  %s9508_s8 = sld [smem:[#allocation33_spill]] }
  0x12   :  { %vm9423_vm5 = vmmov %vm9419_vm3  ;;  %v6396_v38 = vsel %vm6323_vm7, 1.0, %v9307_v11  ;;  %vm9440_vm7 = vnez %v9399_v61  ;;  %9442 = vst [vmem:[#allocation16_spill] sm:$0xff] %v6444_v54  ;;  %v6456_v61 = vsel %vm6272_vm12, 1.0, %v9307_v11  ;;  %v9448_v54 = vmov 0.0   ;;  %s9510_s25 = sld [smem:[#allocation34_spill]] }
  0x13   :  { %v226_v4 = vld [vmem:[%s9384_s9] sm:$0xf]  ;;  %v6336_v47 = vsel %vm9423_vm5, 1.0, %v9307_v11  ;;  %vm9427_vm3 = vmmov %vm9425_vm10  ;;  %vm9429_vm10 = vcmp.ne.s32.totalorder %v6223_v55, 0  ;;  %vm9431_vm5 = vcmp.ne.s32.totalorder %v6216_v53, 0  ;;  %9437 = vst [vmem:[#allocation15_spill] sm:$0xff] %v6396_v38 }
  0x14   :  { %v6078_v9 = vrot.slane %v226_v4, %v9301_v6  ;;  %v6081_v10 = vrot.slane %v226_v4, %v6071_v5  ;;  %v6091_v12 = vrot.slane %v226_v4, %v9302_v7  ;;  %v6095_v13 = vrot.slane %v226_v4, %v9303_v8  ;;  %v384_v14 = vld [vmem:[%s9388_s0] sm:$0xff]  ;;  %9424 = vst [vmem:[#allocation8_spill] sm:$0xff] %v6336_v47  ;;  %vm142_vm9 = vmand %vm9427_vm3, %vm6300_vm2  ;;  %s9518_s0 = sld [smem:[#allocation36_spill]]  ;;  %s9560_s9 = smov 17  }
  0x15   :  { %v618_v22 = vld [vmem:[%s9389_s4] sm:$0xff]  ;;  %vm109_vm3 = vcmp.ne.s32.totalorder %v6216_v53, 15  ;;  %v6418_v44 = vsel %vm9440_vm7, 1.0, %v9307_v11  ;;  %v6439_v6 = vsel %vm6284_vm14, 1.0, %v9307_v11  ;;  %9444 = vst [vmem:[#allocation17_spill] sm:$0xff] %v6456_v61  ;;  %v6511_v40 = vsel %vm107_vm6, 1.0, %v9448_v54 }
  0x16   :  { %9385 = vst [vmem:[#allocation3_spill] sm:$0xff] %v6078_v9  ;;  %252 = vrot.lane.b32.xlu1 %v6078_v9, %s9340_s30  ;;  %248 = vrot.lane.b32.xlu0 %v6081_v10, %s9340_s30  ;;  %9386 = vst [vmem:[#allocation4_spill] sm:$0xff] %v6091_v12  ;;  %s9512_s4 = sld [smem:[#allocation35_spill]] }
  0x17   :  { %9387 = vst [vmem:[#allocation5_spill] sm:$0xff] %v6095_v13  ;;  %9457 = vst [vmem:[#allocation22_spill] sm:$0xff] %v6511_v40  ;;  %v6527_v40 = vsel %vm108_vm8, 1.0, %v9448_v54 }
  0x1a   :  { %254 = vrot.lane.b32.xlu1 %v6091_v12, %s9340_s30  ;;  %250 = vrot.lane.b32.xlu0 %v6095_v13, %s9340_s30 }
  0x1e   :  { %267 = vrot.lane.b32.xlu1 %v6095_v13, %s9342_s6  ;;  %265 = vrot.lane.b32.xlu0 %v6081_v10, %s9342_s6 }
  0x22   :  { %271 = vrot.lane.b32.xlu1 %v6091_v12, %s9342_s6  ;;  %269 = vrot.lane.b32.xlu0 %v6078_v9, %s9342_s6 }
  0x26   :  { %411 = vperm.xlu1 %5763, %v384_v14   ;;  %387 = vperm.xlu0 %5762, %v384_v14  }
  0x2a   :  { %282 = vrot.lane.b32.xlu1 %v6081_v10, %s9344_s11  ;;  %284 = vrot.lane.b32.xlu0 %v6095_v13, %s9344_s11 }
  0x2b   :  { %5764 = vset.pattern.permute.xlu1 %v9300_v15  ;;  %5765 = vset.pattern.permute.xlu0 %v9299_v16  ;;  %v6423_v16 = vsel %vm6219_vm1, 1.0, %v9307_v11 }
  0x2e   :  { %286 = vrot.lane.b32.xlu1 %v6078_v9, %s9344_s11  ;;  %288 = vrot.lane.b32.xlu0 %v6091_v12, %s9344_s11 }
  0x32   :  { %439 = vperm.xlu1 %5764, %v384_v14   ;;  %299 = vrot.lane.b32.xlu0 %v6081_v10, %s9336_s29 }
  0x36   :  { %301 = vrot.lane.b32.xlu1 %v6095_v13, %s9336_s29  ;;  %303 = vrot.lane.b32.xlu0 %v6078_v9, %s9336_s29 }
  0x37   :  { %5766 = vset.pattern.permute.xlu1 %v9298_v17  ;;  %v6404_v17 = vsel %vm6230_vm4, 1.0, %v9307_v11 }
  0x3a   :  { %305 = vrot.lane.b32.xlu1 %v6091_v12, %s9336_s29  ;;  %467 = vperm.xlu0 %5765, %v384_v14  }
  0x3e   :  { %495 = vperm.xlu1 %5766, %v384_v14   ;;  %318 = vrot.lane.b32.xlu0 %v6095_v13, %s9338_s1 }
  0x3f   :  { %5768 = vset.pattern.permute.xlu0 %v9297_v18  ;;  %v6399_v18 = vsel %vm142_vm9, 1.0, %v9307_v11  ;;  %vm9441_vm9 = vnez %v9393_v56 }
  0x40   :  { %v6428_v57 = vsel %vm9441_vm9, 1.0, %v9307_v11 }
  0x42   :  { %316 = vrot.lane.b32.xlu1 %v6081_v10, %s9338_s1  ;;  %322 = vrot.lane.b32.xlu0 %v6091_v12, %s9338_s1 }
  0x43   :  { %5767 = vset.pattern.permute.xlu1 %v9296_v19 }
  0x46   :  { %320 = vrot.lane.b32.xlu1 %v6078_v9, %s9338_s1  ;;  %333 = vrot.lane.b32.xlu0 %v6081_v10, %s9334_s2 }
  0x4a   :  { %507 = vperm.xlu1 %5767, %v384_v14   ;;  %337 = vrot.lane.b32.xlu0 %v6078_v9, %s9334_s2 }
  0x4e   :  { %335 = vrot.lane.b32.xlu1 %v6095_v13, %s9334_s2  ;;  %535 = vperm.xlu0 %5768, %v384_v14  }
  0x4f   :  { %5771 = vset.pattern.permute.xlu1 %v9294_v2 }
  0x52   :  { %339 = vrot.lane.b32.xlu1 %v6091_v12, %s9334_s2  ;;  %354 = vrot.lane.b32.xlu0 %v6078_v9, %s5911_s10 }
  0x53   :  { %5769 = vset.pattern.permute.xlu0 %v9293_v20  ;;  %v6365_v20 = vsel %vm9431_vm5, 1.0, %v9307_v11  ;;  %vm110_vm5 = vcmp.ne.s32.totalorder %v6210_v48, 15 }
  0x54   :  { %9432 = vst [vmem:[#allocation12_spill] sm:$0xff] %v6365_v20  ;;  %vm170_vm15 = vmand %vm110_vm5, %vm9441_vm9  ;;  %vm9450_vm9 = vcmp.lt.s32.totalorder %v6189_v31, 16  ;;  %v6620_v55 = vsel %vm110_vm5, 1.0, %v9448_v54 }
  0x55   :  { %9468 = vst [vmem:[#allocation24_spill] sm:$0xff] %v6620_v55 }
  0x56   :  { %350 = vrot.lane.b32.xlu1 %v6081_v10, %s5911_s10  ;;  %563 = vperm.xlu0 %5769, %v384_v14  }
  0x5a   :  { %352 = vrot.lane.b32.xlu1 %v6095_v13, %s5911_s10  ;;  %371 = vrot.lane.b32.xlu0 %v6078_v9, %s9332_s3 }
  0x5b   :  { %5770 = vset.pattern.permute.xlu0 %v9292_v21  ;;  %v6360_v21 = vsel %vm9429_vm10, 1.0, %v9307_v11  ;;  %vm6383_vm10 = vmand %vm107_vm6, %vm6219_vm1  ;;  %vm9443_vm1 = vnez %v9403_v63 }
  0x5c   :  { %9430 = vst [vmem:[#allocation11_spill] sm:$0xff] %v6360_v21  ;;  %v6451_v8 = vsel %vm9443_vm1, 1.0, %v9307_v11  ;;  %v6477_v56 = vsel %vm6383_vm10, 1.0, %v9448_v54 }
  0x5d   :  { %9449 = vst [vmem:[#allocation18_spill] sm:$0xff] %v6477_v56 }
  0x5e   :  { %356 = vrot.lane.b32.xlu1 %v6091_v12, %s5911_s10  ;;  %591 = vperm.xlu0 %5770, %v384_v14   ;;  %v6391_v14 = vsel %vm6308_vm0, 1.0, %v9307_v11 }
  0x5f   :  { %9436 = vst [vmem:[#allocation14_spill] sm:$0xff] %v6391_v14 }
  0x62   :  { %367 = vrot.lane.b32.xlu1 %v6081_v10, %s9332_s3  ;;  %5792 = vset.pattern.permute.xlu0 %v9294_v2  ;;  %v6371_v2 = vsel %vm6280_vm13, 1.0, %v9307_v11  ;;  %vm6410_vm13 = vmand %vm108_vm8, %vm6230_vm4 }
  0x63   :  { %9433 = vst [vmem:[#allocation13_spill] sm:$0xff] %v6371_v2  ;;  %vm169_vm4 = vmand %vm109_vm3, %vm9440_vm7  ;;  %vm9445_vm7 = vcmp.lt.s32.totalorder %v6189_v31, 17 }
  0x64   :  { %vm9446_vm0 = vmmov %vm9445_vm7 }
  0x65   :  { %vm9447_vm11 = vmmov %vm9446_vm0 }
  0x66   :  { %369 = vrot.lane.b32.xlu1 %v6095_v13, %s9332_s3 }
  0x6a   :  { %373 = vrot.lane.b32.xlu1 %v6091_v12, %s9332_s3  ;;  %v6490_v12 = vsel %vm6410_vm13, 1.0, %v9448_v54 }
  0x6b   :  { %9452 = vst [vmem:[#allocation19_spill] sm:$0xff] %v6490_v12 }
  0x6e   :  { %621 = vperm.xlu1 %5771, %v618_v22  }
  0x88   :  { %v6172_v23 = vpop.permute.xlu1 %252  ;;  %v6174_v24 = vpop.permute.xlu0 %248 }
  0x8c   :  { %v6176_v25 = vpop.permute.xlu1 %254  ;;  %v6178_v26 = vpop.permute.xlu0 %250 }
  0x8d   :  { %v257_v1 = vsel %vm9445_vm7, %v6172_v23, %v6176_v25  ;;  %v260_v3 = vsel %vm9446_vm0, %v6176_v25, %v6174_v24  ;;  %v259_v11 = vsel %vm9447_vm11, %v6174_v24, %v6178_v26  ;;  %vm9451_vm7 = vmmov %vm9450_vm9  ;;  %v6493_v24 = vsel %vm169_vm4, 1.0, %v9448_v54 }
  0x8e   :  { %9453 = vst [vmem:[#allocation20_spill] sm:$0xff] %v6493_v24  ;;  %vm9454_vm11 = vmmov %vm9446_vm0  ;;  %v261_v24 = vmul.f32 %v6315_v43, %v260_v3  ;;  %v264_v12 = vmul.f32 %v6331_v46, %v257_v1  ;;  %v6532_v1 = vsel %vm109_vm3, 1.0, %v9448_v54  ;;  %vm9460_vm0 = vcmp.lt.s32.totalorder %v6189_v31, 15 }
  0x8f   :  { %v258_v19 = vsel %vm9454_vm11, %v6178_v26, %v6172_v23  ;;  %vm9455_vm10 = vmmov %vm9451_vm7  ;;  %v262_v23 = vmul.f32 %v6355_v62, %v259_v11  ;;  %9459 = vst [vmem:[#allocation23_spill] sm:$0xff] %v6532_v1 }
  0x90   :  { %v6180_v27 = vpop.permute.xlu1 %267  ;;  %v6182_v28 = vpop.permute.xlu0 %265  ;;  %vm9458_vm13 = vmmov %vm9451_vm7  ;;  %v393_v43 = vrot.slane %v261_v24, %v6071_v5 }
  0x91   :  { %v276_v61 = vsel %vm9450_vm9, %v6182_v28, %v6180_v27  ;;  %vm9461_vm4 = vmmov %vm9460_vm0 }
  0x92   :  { %vm9463_vm9 = vmmov %vm9460_vm0 }
  0x94   :  { %v6184_v29 = vpop.permute.xlu1 %271  ;;  %v6186_v30 = vpop.permute.xlu0 %269 }
  0x95   :  { %v277_v25 = vsel %vm9451_vm7, %v6184_v29, %v6182_v28  ;;  %v275_v9 = vsel %vm9455_vm10, %v6180_v27, %v6186_v30  ;;  %v6506_v28 = vsel %vm170_vm15, 1.0, %v9448_v54  ;;  %v274_v26 = vsel %vm9458_vm13, %v6186_v30, %v6184_v29  ;;  %vm9462_vm15 = vmmov %vm9460_vm0 }
  0x96   :  { %9456 = vst [vmem:[#allocation21_spill] sm:$0xff] %v6506_v28  ;;  %v279_v28 = vmul.f32 %v6360_v21, %v276_v61  ;;  %v278_v13 = vmul.f32 %v6336_v47, %v277_v25  ;;  %v280_v3 = vmul.f32 %v6365_v20, %v275_v9  ;;  %v263_v61 = vmul.f32 %v6371_v2, %v258_v19 }
  0x97   :  { %v281_v25 = vmul.f32 %v6341_v49, %v274_v26  ;;  %vm9464_vm7 = vcmp.lt.s32.totalorder %v6189_v31, 1  ;;  %v397_v19 = vrot.slane %v262_v23, %v6071_v5  ;;  %vm324_vm10 = vcmp.lt.s32.totalorder %v6189_v31, 127 }
  0x98   :  { %vm9465_vm11 = vmmov %vm9464_vm7  ;;  %v421_v20 = vrot.slane %v279_v28, %v6071_v5  ;;  %v425_v24 = vrot.slane %v280_v3, %v6071_v5  ;;  %vm341_vm13 = vcmp.lt.s32.totalorder %v6189_v31, 113 }
  0xa1   :  { %v6191_v32 = vpop.permute.xlu1 %411  ;;  %v6193_v33 = vpop.permute.xlu0 %387 }
  0xa2   :  { %v431_v3 = vmul.f32 %v421_v20, %v6191_v32 }
  0xa5   :  { %v6196_v35 = vpop.permute.xlu1 %282  ;;  %v6198_v36 = vpop.permute.xlu0 %284 }
  0xa6   :  { %v293_v9 = vsel %vm9463_vm9, %v6196_v35, %v6198_v36  ;;  %vm187_vm9 = vmand %vm107_vm6, %vm6284_vm14 }
  0xa7   :  { %vm6629_vm6 = vmand %vm109_vm3, %vm6272_vm12 }
  0xa8   :  { %vm190_vm14 = vmand %vm110_vm5, %vm6300_vm2  ;;  %vm375_vm2 = vcmp.lt.s32.totalorder %v6189_v31, 111 }
  0xa9   :  { %v6203_v41 = vpop.permute.xlu1 %286  ;;  %v6205_v42 = vpop.permute.xlu0 %288 }
  0xaa   :  { %v292_v11 = vsel %vm9460_vm0, %v6198_v36, %v6203_v41  ;;  %v291_v29 = vsel %vm9461_vm4, %v6203_v41, %v6205_v42  ;;  %v294_v30 = vsel %vm9462_vm15, %v6205_v42, %v6196_v35  ;;  %v405_v42 = vrot.slane %v264_v12, %v6071_v5  ;;  %vm9466_vm0 = vmmov %vm9464_vm7 }
  0xab   :  { %v417_v35 = vrot.slane %v278_v13, %v6071_v5  ;;  %v297_v36 = vmul.f32 %v6391_v14, %v292_v11  ;;  %v295_v2 = vmul.f32 %v6396_v38, %v294_v30  ;;  %v298_v62 = vmul.f32 %v6399_v18, %v291_v29  ;;  %vm9467_vm4 = vmmov %vm9466_vm0 }
  0xac   :  { %v296_v12 = vmul.f32 %v6376_v0, %v293_v9  ;;  %v401_v13 = vrot.slane %v263_v61, %v6071_v5  ;;  %v432_v30 = vmul.f32 %v425_v24, %v6191_v32  ;;  %vm358_vm15 = vcmp.lt.s32.totalorder %v6189_v31, 112  ;;  %vm9487_vm12 = vmmov %vm9466_vm0 }
  0xad   :  { %v6212_v50 = vpop.permute.xlu1 %439  ;;  %v6214_v51 = vpop.permute.xlu0 %299  ;;  %v430_v11 = vmul.f32 %v417_v35, %v6191_v32  ;;  %v445_v9 = vrot.slane %v295_v2, %v6071_v5  ;;  %v409_v22 = vmul.f32 %v405_v42, %v6193_v33  ;;  %vm9489_vm3 = vmmov %vm9466_vm0 }
  0xae   :  { %v449_v2 = vrot.slane %v296_v12, %v6071_v5  ;;  %vm9490_vm5 = vmmov %vm9466_vm0 }
  0xaf   :  { %v458_v63 = vmul.f32 %v445_v9, %v6212_v50 }
  0xb0   :  { %v459_v35 = vmul.f32 %v449_v2, %v6212_v50 }
  0xb1   :  { %v6234_v58 = vpop.permute.xlu1 %301  ;;  %v6236_v59 = vpop.permute.xlu0 %303 }
  0xb2   :  { %v310_v46 = vsel %vm9464_vm7, %v6214_v51, %v6234_v58  ;;  %v309_v26 = vsel %vm9465_vm11, %v6234_v58, %v6236_v59  ;;  %v429_v58 = vrot.slane %v281_v25, %v6071_v5  ;;  %v453_v25 = vrot.slane %v297_v36, %v6071_v5  ;;  %vm188_vm7 = vmand %vm108_vm8, %vm9443_vm1 }
  0xb3   :  { %v313_v23 = vmul.f32 %v6404_v17, %v310_v46  ;;  %v314_v29 = vmul.f32 %v6418_v44, %v309_v26  ;;  %v406_v46 = vmul.f32 %v393_v43, %v6193_v33  ;;  %v457_v26 = vrot.slane %v298_v62, %v6071_v5  ;;  %vm9488_vm8 = vmmov %vm9466_vm0 }
  0xb4   :  { %v408_v43 = vmul.f32 %v401_v13, %v6193_v33  ;;  %v460_v42 = vmul.f32 %v453_v25, %v6212_v50  ;;  %vm9491_vm1 = vcmp.lt.s32.totalorder %v6189_v31, 15 }
  0xb5   :  { %v6288_v34 = vpop.permute.xlu1 %305  ;;  %v6290_v37 = vpop.permute.xlu0 %467  ;;  %v477_v62 = vrot.slane %v313_v23, %v6071_v5  ;;  %v481_v45 = vrot.slane %v314_v29, %v6071_v5  ;;  %v461_v12 = vmul.f32 %v457_v26, %v6212_v50  ;;  %v6637_v23 = vsel %vm188_vm7, 1.0, %v9448_v54  ;;  %vm9492_vm11 = vmmov %vm9491_vm1 }
  0xb6   :  { %v311_v61 = vsel %vm9466_vm0, %v6288_v34, %v6214_v51  ;;  %v308_v20 = vsel %vm9467_vm4, %v6236_v59, %v6288_v34  ;;  %v407_v51 = vmul.f32 %v397_v19, %v6193_v33  ;;  %v433_v59 = vmul.f32 %v429_v58, %v6191_v32  ;;  %9472 = vst [vmem:[#allocation26_spill] sm:$0xff] %v6637_v23  ;;  %vm9493_vm0 = vmmov %vm9491_vm1 }
  0xb7   :  { %v312_v34 = vmul.f32 %v6423_v16, %v311_v61  ;;  %v315_v36 = vmul.f32 %v6428_v57, %v308_v20  ;;  %v6623_v32 = vsel %vm187_vm9, 1.0, %v9448_v54  ;;  %v434_v4 = vadd.f32 %v430_v11, %v406_v46  ;;  %vm9494_vm4 = vmmov %vm9493_vm0 }
  0xb8   :  { %9469 = vst [vmem:[#allocation25_spill] sm:$0xff] %v6623_v32  ;;  %v435_v53 = vadd.f32 %v431_v3, %v407_v51  ;;  %v436_v13 = vadd.f32 %v432_v30, %v408_v43  ;;  %v487_v58 = vmul.f32 %v477_v62, %v6290_v37  ;;  %v437_v29 = vadd.f32 %v433_v59, %v409_v22 }
  0xb9   :  { %v6347_v52 = vpop.permute.xlu1 %495  ;;  %v6349_v60 = vpop.permute.xlu0 %318  ;;  %v473_v61 = vrot.slane %v312_v34, %v6071_v5  ;;  %v488_v25 = vmul.f32 %v481_v45, %v6290_v37  ;;  %v485_v48 = vrot.slane %v315_v36, %v6071_v5  ;;  %v6654_v11 = vsel %vm6629_vm6, 1.0, %v9448_v54 }
  0xba   :  { %v463_v39 = vadd.f32 %v459_v35, %v435_v53  ;;  %9473 = vst [vmem:[#allocation27_spill] sm:$0xff] %v6654_v11  ;;  %v6657_v3 = vsel %vm190_vm14, 1.0, %v9448_v54  ;;  %v462_v30 = vadd.f32 %v458_v63, %v434_v4  ;;  %v464_v46 = vadd.f32 %v460_v42, %v436_v13  ;;  %v9475_v42 = vld [vmem:[#allocation5_spill] sm:$0xff]  ;;  %v9477_v53 = vld [vmem:[#allocation19_spill] sm:$0xff] }
  0xbb   :  { %9474 = vst [vmem:[#allocation28_spill] sm:$0xff] %v6657_v3  ;;  %v465_v26 = vadd.f32 %v461_v12, %v437_v29  ;;  %v486_v22 = vmul.f32 %v473_v61, %v6290_v37  ;;  %v498_v34 = vmul.f32 %v6347_v52, %v6081_v10  ;;  %v489_v36 = vmul.f32 %v485_v48, %v6290_v37  ;;  %v9478_v13 = vld [vmem:[#allocation3_spill] sm:$0xff]  ;;  %v9479_v29 = vld [vmem:[#allocation4_spill] sm:$0xff]  ;;  %v9481_v48 = vld [vmem:[#allocation22_spill] sm:$0xff] }
  0xbc   :  { %v491_v51 = vadd.f32 %v487_v58, %v463_v39  ;;  %v492_v45 = vadd.f32 %v488_v25, %v464_v46  ;;  %v499_v12 = vmul.f32 %v6347_v52, %v9475_v42  ;;  %v500_v58 = vmul.f32 %v6347_v52, %v9478_v13  ;;  %v9480_v25 = vld [vmem:[#allocation17_spill] sm:$0xff] }
  0xbd   :  { %v6430_v15 = vpop.permute.xlu1 %316  ;;  %v6446_v7 = vpop.permute.xlu0 %322  ;;  %v501_v61 = vmul.f32 %v6347_v52, %v9479_v29  ;;  %vm9495_vm9 = vcmp.lt.s32.totalorder %v6189_v31, 16 }
  0xbe   :  { %v327_v20 = vsel %vm324_vm10, %v6430_v15, %v6349_v60  ;;  %v328_v10 = vsel %vm324_vm10, %v6446_v7, %v6430_v15  ;;  %vm9496_vm7 = vmmov %vm9495_vm9 }
  0xbf   :  { %v329_v33 = vmul.f32 %v6439_v6, %v327_v20  ;;  %vm9497_vm6 = vmmov %vm9496_vm7 }
  0xc0   :  { %vm9498_vm14 = vmmov %vm9497_vm6 }
  0xc1   :  { %v6503_v56 = vpop.permute.xlu1 %320  ;;  %v6520_v27 = vpop.permute.xlu0 %333  ;;  %v513_v52 = vrot.slane %v329_v33, %v6071_v5 }
  0xc2   :  { %v326_v50 = vsel %vm324_vm10, %v6349_v60, %v6503_v56  ;;  %v325_v60 = vsel %vm324_vm10, %v6503_v56, %v6446_v7  ;;  %v9476_v56 = vld [vmem:[#allocation18_spill] sm:$0xff] }
  0xc3   :  { %v330_v43 = vmul.f32 %v6451_v8, %v326_v50  ;;  %v331_v50 = vmul.f32 %v9480_v25, %v325_v60  ;;  %v9482_v60 = vld [vmem:[#allocation16_spill] sm:$0xff] }
  0xc4   :  { %v332_v42 = vmul.f32 %v9482_v60, %v328_v10 }
  0xc5   :  { %v6557_v41 = vpop.permute.xlu1 %507  ;;  %v6575_v49 = vpop.permute.xlu0 %337  ;;  %v517_v39 = vrot.slane %v330_v43, %v6071_v5 }
  0xc6   :  { %v526_v33 = vmul.f32 %v513_v52, %v6557_v41  ;;  %v525_v54 = vrot.slane %v332_v42, %v6071_v5 }
  0xc9   :  { %v336_v28 = vpop.permute.xlu1 %335  ;;  %v6615_v24 = vpop.permute.xlu0 %535 }
  0xca   :  { %v343_v2 = vsel %vm341_vm13, %v336_v28, %v6575_v49  ;;  %v344_v62 = vsel %vm341_vm13, %v6520_v27, %v336_v28 }
  0xcb   :  { %v346_v4 = vmul.f32 %v9476_v56, %v344_v62  ;;  %v347_v37 = vmul.f32 %v9477_v53, %v343_v2  ;;  %v490_v62 = vadd.f32 %v486_v22, %v462_v30  ;;  %v9483_v30 = vld [vmem:[#allocation20_spill] sm:$0xff]  ;;  %v9484_v22 = vld [vmem:[#allocation21_spill] sm:$0xff] }
  0xcd   :  { %v340_v19 = vpop.permute.xlu1 %339  ;;  %v355_v59 = vpop.permute.xlu0 %354  ;;  %v541_v13 = vrot.slane %v346_v4, %v6071_v5 }
  0xce   :  { %v342_v7 = vsel %vm341_vm13, %v6575_v49, %v340_v19  ;;  %v345_v15 = vsel %vm341_vm13, %v340_v19, %v6520_v27  ;;  %v545_v49 = vrot.slane %v347_v37, %v6071_v5  ;;  %v503_v19 = vadd.f32 %v499_v12, %v491_v51 }
  0xcf   :  { %v502_v12 = vadd.f32 %v498_v34, %v490_v62 }
  0xd1   :  { %v351_v9 = vpop.permute.xlu1 %350  ;;  %v564_v43 = vpop.permute.xlu0 %563 }
  0xd5   :  { %v353_v35 = vpop.permute.xlu1 %352 }
  0xd6   :  { %v360_v28 = vsel %vm358_vm15, %v353_v35, %v355_v59  ;;  %v361_v63 = vsel %vm358_vm15, %v351_v9, %v353_v35  ;;  %v493_v35 = vadd.f32 %v489_v36, %v465_v26  ;;  %v348_v26 = vmul.f32 %v9483_v30, %v342_v7 }
  0xd7   :  { %v363_v46 = vmul.f32 %v9481_v48, %v361_v63  ;;  %v364_v20 = vmul.f32 %v6527_v40, %v360_v28  ;;  %v521_v28 = vrot.slane %v331_v50, %v6071_v5  ;;  %v349_v36 = vmul.f32 %v9484_v22, %v345_v15 }
  0xd8   :  { %v527_v63 = vmul.f32 %v517_v39, %v6557_v41  ;;  %v505_v50 = vadd.f32 %v501_v61, %v493_v35  ;;  %v554_v7 = vmul.f32 %v541_v13, %v6615_v24  ;;  %v555_v15 = vmul.f32 %v545_v49, %v6615_v24 }
  0xd9   :  { %v357_v2 = vpop.permute.xlu1 %356  ;;  %v569_v10 = vrot.slane %v363_v46, %v6071_v5  ;;  %v573_v4 = vrot.slane %v364_v20, %v6071_v5  ;;  %v528_v39 = vmul.f32 %v521_v28, %v6557_v41  ;;  %v529_v46 = vmul.f32 %v525_v54, %v6557_v41 }
  0xda   :  { %v359_v29 = vsel %vm358_vm15, %v355_v59, %v357_v2  ;;  %v362_v27 = vsel %vm358_vm15, %v357_v2, %v351_v9  ;;  %v504_v59 = vadd.f32 %v500_v58, %v492_v45  ;;  %v549_v20 = vrot.slane %v348_v26, %v6071_v5  ;;  %v372_v58 = vpop.permute.xlu0 %371 }
  0xdb   :  { %v365_v9 = vmul.f32 %v6532_v1, %v359_v29  ;;  %v366_v51 = vmul.f32 %v6620_v55, %v362_v27  ;;  %v553_v45 = vrot.slane %v349_v36, %v6071_v5  ;;  %v530_v2 = vadd.f32 %v526_v33, %v502_v12 }
  0xdc   :  { %v531_v52 = vadd.f32 %v527_v63, %v503_v19  ;;  %v582_v42 = vmul.f32 %v569_v10, %v564_v43  ;;  %v583_v29 = vmul.f32 %v573_v4, %v564_v43  ;;  %v532_v19 = vadd.f32 %v528_v39, %v504_v59 }
  0xdd   :  { %v368_v37 = vpop.permute.xlu1 %367  ;;  %v577_v34 = vrot.slane %v365_v9, %v6071_v5  ;;  %v581_v61 = vrot.slane %v366_v51, %v6071_v5  ;;  %v558_v41 = vadd.f32 %v554_v7, %v530_v2  ;;  %v533_v28 = vadd.f32 %v529_v46, %v505_v50 }
  0xde   :  { %v559_v35 = vadd.f32 %v555_v15, %v531_v52  ;;  %v556_v26 = vmul.f32 %v549_v20, %v6615_v24  ;;  %v557_v36 = vmul.f32 %v553_v45, %v6615_v24  ;;  %v592_v33 = vpop.permute.xlu0 %591 }
  0xdf   :  { %v586_v63 = vadd.f32 %v582_v42, %v558_v41  ;;  %v584_v12 = vmul.f32 %v577_v34, %v564_v43  ;;  %v585_v7 = vmul.f32 %v581_v61, %v564_v43 }
  0xe0   :  { %v587_v10 = vadd.f32 %v583_v29, %v559_v35  ;;  %v560_v20 = vadd.f32 %v556_v26, %v532_v19  ;;  %v561_v45 = vadd.f32 %v557_v36, %v533_v28  ;;  %v761_v36 = vld [vmem:[%s9485_s28] sm:$0xff] }
  0xe1   :  { %v370_v27 = vpop.permute.xlu1 %369 }
  0xe2   :  { %v377_v62 = vsel %vm375_vm2, %v370_v27, %v372_v58  ;;  %v378_v54 = vsel %vm375_vm2, %v368_v37, %v370_v27  ;;  %v588_v27 = vadd.f32 %v584_v12, %v560_v20 }
  0xe3   :  { %v380_v13 = vmul.f32 %v6623_v32, %v378_v54  ;;  %v381_v49 = vmul.f32 %v6637_v23, %v377_v62 }
  0xe5   :  { %v597_v4 = vrot.slane %v380_v13, %v6071_v5  ;;  %v601_v9 = vrot.slane %v381_v49, %v6071_v5  ;;  %v374_v51 = vpop.permute.xlu1 %373 }
  0xe6   :  { %v376_v15 = vsel %vm375_vm2, %v372_v58, %v374_v51  ;;  %v379_v59 = vsel %vm375_vm2, %v374_v51, %v368_v37  ;;  %v589_v58 = vadd.f32 %v585_v7, %v561_v45 }
  0xe7   :  { %v382_v50 = vmul.f32 %v6654_v11, %v376_v15  ;;  %v383_v24 = vmul.f32 %v6657_v3, %v379_v59  ;;  %v610_v39 = vmul.f32 %v597_v4, %v592_v33  ;;  %v611_v46 = vmul.f32 %v601_v9, %v592_v33 }
  0xe9   :  { %v605_v2 = vrot.slane %v382_v50, %v6071_v5  ;;  %v609_v52 = vrot.slane %v383_v24, %v6071_v5  ;;  %v622_v42 = vpop.permute.xlu1 %621  ;;  %v614_v43 = vadd.f32 %v610_v39, %v586_v63  ;;  %v615_v29 = vadd.f32 %v611_v46, %v587_v10 }
  0xeb   :  { %v612_v34 = vmul.f32 %v605_v2, %v592_v33  ;;  %v613_v61 = vmul.f32 %v609_v52, %v592_v33  ;;  %v624_v37 = vadd.f32 %v622_v42, %v614_v43  ;;  %v625_v62 = vadd.f32 %v622_v42, %v615_v29 }
  0xec   :  { %v9486_v33 = vmov 1  }
  0xed   :  { %v616_v54 = vadd.f32 %v612_v34, %v588_v27  ;;  %v617_v41 = vadd.f32 %v613_v61, %v589_v58  ;;  %v6750_v35 = vmax.f32 %v624_v37, 0.0  ;;  %v6752_v13 = vmax.f32 %v625_v62, 0.0 }
  0xef   :  { %v626_v49 = vadd.f32 %v622_v42, %v616_v54  ;;  %v627_v19 = vadd.f32 %v622_v42, %v617_v41  ;;  %746 = vrot.lane.b32.xlu0 %v6752_v13, %s9332_s3  ;;  %744 = vrot.lane.b32.xlu1 %v6750_v35, %s9332_s3 }
  0xf1   :  { %v6758_v28 = vmax.f32 %v626_v49, 0.0  ;;  %v6760_v26 = vmax.f32 %v627_v19, 0.0 }
  0xf3   :  { %750 = vrot.lane.b32.xlu0 %v6760_v26, %s9332_s3  ;;  %748 = vrot.lane.b32.xlu1 %v6758_v28, %s9332_s3  ;;  %s9529_s3 = smov 111  }
  0xf7   :  { %730 = vrot.lane.b32.xlu0 %v6752_v13, %s5911_s10  ;;  %728 = vrot.lane.b32.xlu1 %v6750_v35, %s5911_s10 }
  0xfb   :  { %734 = vrot.lane.b32.xlu0 %v6760_v26, %s5911_s10  ;;  %732 = vrot.lane.b32.xlu1 %v6758_v28, %s5911_s10 }
  0xff   :  { %714 = vrot.lane.b32.xlu0 %v6752_v13, %s9334_s2  ;;  %712 = vrot.lane.b32.xlu1 %v6750_v35, %s9334_s2 }
 0x103   :  { %718 = vrot.lane.b32.xlu0 %v6760_v26, %s9334_s2  ;;  %716 = vrot.lane.b32.xlu1 %v6758_v28, %s9334_s2  ;;  %s9526_s2 = smov 113  }
 0x107   :  { %698 = vrot.lane.b32.xlu0 %v6752_v13, %s9338_s1  ;;  %696 = vrot.lane.b32.xlu1 %v6750_v35, %s9338_s1 }
 0x10b   :  { %702 = vrot.lane.b32.xlu0 %v6760_v26, %s9338_s1  ;;  %700 = vrot.lane.b32.xlu1 %v6758_v28, %s9338_s1 }
 0x10f   :  { %682 = vrot.lane.b32.xlu0 %v6752_v13, %s9336_s29  ;;  %680 = vrot.lane.b32.xlu1 %v6750_v35, %s9336_s29 }
 0x113   :  { %686 = vrot.lane.b32.xlu0 %v6760_v26, %s9336_s29  ;;  %684 = vrot.lane.b32.xlu1 %v6758_v28, %s9336_s29  ;;  %s9561_s29 = sld [smem:[#allocation39_spill]] }
 0x117   :  { %666 = vrot.lane.b32.xlu0 %v6752_v13, %s9344_s11  ;;  %664 = vrot.lane.b32.xlu1 %v6750_v35, %s9344_s11 }
 0x11b   :  { %670 = vrot.lane.b32.xlu0 %v6760_v26, %s9344_s11  ;;  %668 = vrot.lane.b32.xlu1 %v6758_v28, %s9344_s11 }
 0x11f   :  { %650 = vrot.lane.b32.xlu0 %v6752_v13, %s9342_s6  ;;  %648 = vrot.lane.b32.xlu1 %v6750_v35, %s9342_s6 }
 0x123   :  { %654 = vrot.lane.b32.xlu0 %v6760_v26, %s9342_s6  ;;  %652 = vrot.lane.b32.xlu1 %v6758_v28, %s9342_s6 }
 0x127   :  { %634 = vrot.lane.b32.xlu0 %v6752_v13, %s9340_s30  ;;  %632 = vrot.lane.b32.xlu1 %v6750_v35, %s9340_s30 }
 0x12b   :  { %638 = vrot.lane.b32.xlu0 %v6760_v26, %s9340_s30  ;;  %636 = vrot.lane.b32.xlu1 %v6758_v28, %s9340_s30 }
 0x12f   :  { %764 = vperm.xlu1 %5771, %v761_v36  }
 0x133   :  { %5793 = vset.pattern.permute.xlu1 %v9486_v33 }
 0x161   :  { %v747_v63 = vpop.permute.xlu0 %746  ;;  %v745_v10 = vpop.permute.xlu1 %744 }
 0x162   :  { %v754_v51 = vsel %vm375_vm2, %v745_v10, %v747_v63 }
 0x163   :  { %v756_v39 = vmul.f32 %v6623_v32, %v754_v51 }
 0x165   :  { %v751_v4 = vpop.permute.xlu0 %750  ;;  %v749_v9 = vpop.permute.xlu1 %748 }
 0x166   :  { %v753_v12 = vsel %vm375_vm2, %v747_v63, %v749_v9  ;;  %v755_v7 = vsel %vm375_vm2, %v751_v4, %v745_v10  ;;  %v752_v15 = vsel %vm375_vm2, %v749_v9, %v751_v4 }
 0x167   :  { %v757_v59 = vmul.f32 %v6637_v23, %v753_v12  ;;  %v759_v50 = vmul.f32 %v6657_v3, %v755_v7  ;;  %v758_v24 = vmul.f32 %v6654_v11, %v752_v15 }
 0x169   :  { %v731_v46 = vpop.permute.xlu0 %730  ;;  %785 = vmatprep.subr.mxu0 %v757_v59  ;;  %856 = vmatprep.subr.mxu1 %v759_v50  ;;  %v729_v20 = vpop.permute.xlu1 %728 }
 0x16a   :  { %786 = vmatpush1.msra.mxu0 %v756_v39  ;;  %857 = vmatpush1.msra.mxu1 %v758_v24  ;;  %v738_v45 = vsel %vm358_vm15, %v729_v20, %v731_v46 }
 0x16b   :  { %v740_v61 = vmul.f32 %v9481_v48, %v738_v45 }
 0x16d   :  { %v735_v2 = vpop.permute.xlu0 %734  ;;  %v733_v52 = vpop.permute.xlu1 %732 }
 0x16e   :  { %v739_v42 = vsel %vm358_vm15, %v735_v2, %v729_v20  ;;  %v736_v43 = vsel %vm358_vm15, %v733_v52, %v735_v2  ;;  %v737_v29 = vsel %vm358_vm15, %v731_v46, %v733_v52 }
 0x16f   :  { %v741_v27 = vmul.f32 %v6527_v40, %v737_v29  ;;  %v743_v58 = vmul.f32 %v6620_v55, %v739_v42  ;;  %v742_v34 = vmul.f32 %v6532_v1, %v736_v43 }
 0x171   :  { %v715_v37 = vpop.permute.xlu0 %714  ;;  %787 = vmatprep.subr.mxu0 %v741_v27  ;;  %858 = vmatprep.subr.mxu1 %v743_v58  ;;  %v713_v62 = vpop.permute.xlu1 %712 }
 0x172   :  { %788 = vmatpush1.msra.mxu0 %v740_v61  ;;  %859 = vmatpush1.msra.mxu1 %v742_v34  ;;  %v722_v54 = vsel %vm341_vm13, %v713_v62, %v715_v37 }
 0x173   :  { %v724_v9 = vmul.f32 %v9476_v56, %v722_v54 }
 0x175   :  { %v719_v41 = vpop.permute.xlu0 %718  ;;  %v717_v49 = vpop.permute.xlu1 %716 }
 0x176   :  { %v723_v19 = vsel %vm341_vm13, %v719_v41, %v713_v62  ;;  %v720_v36 = vsel %vm341_vm13, %v717_v49, %v719_v41  ;;  %v721_v33 = vsel %vm341_vm13, %v715_v37, %v717_v49 }
 0x177   :  { %v725_v63 = vmul.f32 %v9477_v53, %v721_v33  ;;  %v727_v10 = vmul.f32 %v9484_v22, %v723_v19  ;;  %v726_v4 = vmul.f32 %v9483_v30, %v720_v36 }
 0x179   :  { %v699_v51 = vpop.permute.xlu0 %698  ;;  %789 = vmatprep.subr.mxu0 %v725_v63  ;;  %860 = vmatprep.subr.mxu1 %v727_v10  ;;  %v697_v12 = vpop.permute.xlu1 %696 }
 0x17a   :  { %790 = vmatpush1.msra.mxu0 %v724_v9  ;;  %861 = vmatpush1.msra.mxu1 %v726_v4  ;;  %v706_v7 = vsel %vm324_vm10, %v697_v12, %v699_v51 }
 0x17b   :  { %v708_v2 = vmul.f32 %v6439_v6, %v706_v7 }
 0x17d   :  { %v703_v15 = vpop.permute.xlu0 %702  ;;  %v701_v59 = vpop.permute.xlu1 %700 }
 0x17e   :  { %v707_v50 = vsel %vm324_vm10, %v703_v15, %v697_v12  ;;  %v704_v24 = vsel %vm324_vm10, %v701_v59, %v703_v15  ;;  %v705_v39 = vsel %vm324_vm10, %v699_v51, %v701_v59 }
 0x17f   :  { %v709_v46 = vmul.f32 %v6451_v8, %v705_v39  ;;  %v711_v20 = vmul.f32 %v9482_v60, %v707_v50  ;;  %v710_v45 = vmul.f32 %v9480_v25, %v704_v24 }
 0x181   :  { %v683_v52 = vpop.permute.xlu0 %682  ;;  %791 = vmatprep.subr.mxu0 %v709_v46  ;;  %862 = vmatprep.subr.mxu1 %v711_v20  ;;  %v681_v42 = vpop.permute.xlu1 %680 }
 0x182   :  { %v690_v43 = vsel %vm9487_vm12, %v681_v42, %v683_v52  ;;  %792 = vmatpush1.msra.mxu0 %v708_v2  ;;  %863 = vmatpush1.msra.mxu1 %v710_v45  ;;  %v9499_v45 = vld [vmem:[#allocation9_spill] sm:$0xff]  ;;  %vm9501_vm12 = vcmp.lt.s32.totalorder %v6189_v31, 17 }
 0x183   :  { %793 = vmatprep.subr.mxu0 %v6752_v13  ;;  %864 = vmatprep.subr.mxu1 %v6760_v26  ;;  %v693_v29 = vmul.f32 %v6404_v17, %v690_v43 }
 0x184   :  { %794 = vmatpush1.msra.mxu0 %v6750_v35  ;;  %865 = vmatpush1.msra.mxu1 %v6758_v28 }
 0x185   :  { %v687_v27 = vpop.permute.xlu0 %686  ;;  %795 = vmatprep.subr.mxu0 %v693_v29  ;;  %v685_v58 = vpop.permute.xlu1 %684 }
 0x186   :  { %v691_v34 = vsel %vm9488_vm8, %v687_v27, %v681_v42  ;;  %v688_v61 = vsel %vm9489_vm3, %v685_v58, %v687_v27  ;;  %v689_v13 = vsel %vm9490_vm5, %v683_v52, %v685_v58  ;;  %v9500_v52 = vld [vmem:[#allocation12_spill] sm:$0xff]  ;;  %v9502_v58 = vld [vmem:[#allocation10_spill] sm:$0xff]  ;;  %vm9503_vm8 = vmmov %vm9501_vm12 }
 0x187   :  { %v692_v26 = vmul.f32 %v6423_v16, %v691_v34  ;;  %v695_v37 = vmul.f32 %v6428_v57, %v688_v61  ;;  %v694_v35 = vmul.f32 %v6418_v44, %v689_v13  ;;  %vm9504_vm3 = vmmov %vm9503_vm8 }
 0x188   :  { %vm9505_vm5 = vmmov %vm9504_vm3 }
 0x189   :  { %v667_v62 = vpop.permute.xlu0 %666  ;;  %796 = vmatpush1.msra.mxu0 %v692_v26  ;;  %866 = vmatprep.subr.mxu1 %v695_v37  ;;  %v665_v28 = vpop.permute.xlu1 %664 }
 0x18a   :  { %v674_v54 = vsel %vm9491_vm1, %v665_v28, %v667_v62  ;;  %867 = vmatpush1.msra.mxu1 %v694_v35  ;;  %vm767_vm1 = vcmask 588800  }
 0x18b   :  { %v677_v41 = vmul.f32 %v6376_v0, %v674_v54  ;;  %v9507_v54 = vld [vmem:[#allocation7_spill] sm:$0xff] }
 0x18d   :  { %v671_v49 = vpop.permute.xlu0 %670  ;;  %797 = vmatprep.subr.mxu0 %v677_v41  ;;  %v669_v19 = vpop.permute.xlu1 %668 }
 0x18e   :  { %v675_v36 = vsel %vm9492_vm11, %v671_v49, %v665_v28  ;;  %v672_v33 = vsel %vm9493_vm0, %v669_v19, %v671_v49  ;;  %v673_v63 = vsel %vm9494_vm4, %v667_v62, %v669_v19  ;;  %v9506_v62 = vld [vmem:[#allocation6_spill] sm:$0xff]  ;;  %v9509_v19 = vld [vmem:[#allocation13_spill] sm:$0xff]  ;;  %vm9533_vm11 = vmmov %vm9504_vm3 }
 0x18f   :  { %v676_v10 = vmul.f32 %v6396_v38, %v675_v36  ;;  %v679_v4 = vmul.f32 %v6399_v18, %v672_v33  ;;  %v678_v9 = vmul.f32 %v6391_v14, %v673_v63  ;;  %v760_v49 = vld [vmem:[%s9508_s8] sm:$0xff]  ;;  %s9523_s8 = smov 127   ;;  %vm9534_vm0 = vmmov %vm9497_vm6 }
 0x190   :  { %vm9535_vm4 = vmmov %vm9504_vm3 }
 0x191   :  { %v651_v51 = vpop.permute.xlu0 %650  ;;  %798 = vmatpush1.msra.mxu0 %v676_v10  ;;  %868 = vmatprep.subr.mxu1 %v679_v4  ;;  %v649_v12 = vpop.permute.xlu1 %648 }
 0x192   :  { %v658_v7 = vsel %vm9495_vm9, %v649_v12, %v651_v51  ;;  %869 = vmatpush1.msra.mxu1 %v678_v9  ;;  %vm9536_vm9 = vmmov %vm9504_vm3 }
 0x193   :  { %v661_v15 = vmul.f32 %v6360_v21, %v658_v7 }
 0x195   :  { %v655_v59 = vpop.permute.xlu0 %654  ;;  %799 = vmatprep.subr.mxu0 %v661_v15  ;;  %v653_v50 = vpop.permute.xlu1 %652 }
 0x196   :  { %v659_v24 = vsel %vm9496_vm7, %v655_v59, %v649_v12  ;;  %v656_v39 = vsel %vm9497_vm6, %v653_v50, %v655_v59  ;;  %v657_v46 = vsel %vm9498_vm14, %v651_v51, %v653_v50  ;;  %vm9537_vm7 = vmmov %vm9534_vm0 }
 0x197   :  { %v660_v20 = vmul.f32 %v6336_v47, %v659_v24  ;;  %v663_v2 = vmul.f32 %v9499_v45, %v656_v39  ;;  %v662_v42 = vmul.f32 %v9500_v52, %v657_v46  ;;  %vm9538_vm6 = vmmov %vm9534_vm0 }
 0x198   :  { %vm9539_vm14 = vmmov %vm9504_vm3 }
 0x199   :  { %v635_v43 = vpop.permute.xlu0 %634  ;;  %800 = vmatpush1.msra.mxu0 %v660_v20  ;;  %870 = vmatprep.subr.mxu1 %v663_v2  ;;  %v633_v29 = vpop.permute.xlu1 %632  ;;  %v980_v2 = vld [vmem:[%s9510_s25 + $0xf8] sm:$0xff] }
 0x19a   :  { %v642_v27 = vsel %vm9501_vm12, %v633_v29, %v635_v43  ;;  %871 = vmatpush1.msra.mxu1 %v662_v42  ;;  %v1012_v42 = vld [vmem:[%s9510_s25 + $0x1f8] sm:$0xff]  ;;  %vm9540_vm12 = vmmov %vm9534_vm0 }
 0x19b   :  { %v645_v34 = vmul.f32 %v9502_v58, %v642_v27  ;;  %v979_v27 = vld [vmem:[%s9510_s25 + $0xf0] sm:$0xff] }
 0x19d   :  { %v639_v61 = vpop.permute.xlu0 %638  ;;  %801 = vmatprep.subr.mxu0 %v645_v34  ;;  %v637_v13 = vpop.permute.xlu1 %636  ;;  %v1011_v34 = vld [vmem:[%s9510_s25 + $0x1f0] sm:$0xff] }
 0x19e   :  { %v643_v26 = vsel %vm9503_vm8, %v639_v61, %v633_v29  ;;  %v640_v37 = vsel %vm9504_vm3, %v637_v13, %v639_v61  ;;  %v641_v35 = vsel %vm9505_vm5, %v635_v43, %v637_v13  ;;  %v964_v43 = vld [vmem:[%s9510_s25 + $0x78] sm:$0xff]  ;;  %v963_v61 = vld [vmem:[%s9510_s25 + $0x70] sm:$0xff]  ;;  %vm9541_vm8 = vcmp.lt.s32.totalorder %v6189_v31, 15 }
 0x19f   :  { %v644_v28 = vmul.f32 %v9506_v62, %v643_v26  ;;  %v647_v41 = vmul.f32 %v9507_v54, %v640_v37  ;;  %v646_v36 = vmul.f32 %v9509_v19, %v641_v35  ;;  %v996_v29 = vld [vmem:[%s9510_s25 + $0x178] sm:$0xff]  ;;  %v995_v13 = vld [vmem:[%s9510_s25 + $0x170] sm:$0xff]  ;;  %v978_v26 = vld [vmem:[%s9510_s25 + $0xe8] sm:$0xff] }
 0x1a0   :  { %v1010_v37 = vld [vmem:[%s9510_s25 + $0x1e8] sm:$0xff]  ;;  %vm9542_vm3 = vmmov %vm9541_vm8 }
 0x1a1   :  { %802 = vmatpush1.msra.mxu0 %v644_v28  ;;  %872 = vmatprep.subr.mxu1 %v647_v41  ;;  %v962_v35 = vld [vmem:[%s9510_s25 + $0x68] sm:$0xff]  ;;  %v977_v41 = vld [vmem:[%s9510_s25 + $0xe0] sm:$0xff]  ;;  %vm9543_vm5 = vmmov %vm9542_vm3 }
 0x1a2   :  { %4712 = vmatmul.mubr.msk.f32.vlgmr.msra.gmra.mxu0 %vm767_vm1, %v760_v49  ;;  %873 = vmatpush1.msra.mxu1 %v646_v36  ;;  %v994_v28 = vld [vmem:[%s9510_s25 + $0x168] sm:$0xff]  ;;  %v961_v36 = vld [vmem:[%s9510_s25 + $0x60] sm:$0xff] }
 0x1a3   :  { %4713 = vmatmul.mubr.msk.f32.vlgmr.msra.gmra.mxu1 %vm767_vm1, %v760_v49  ;;  %4740 = vmatprep.subr.mxu0 %v980_v2  ;;  %v1009_v49 = vld [vmem:[%s9510_s25 + $0x1e0] sm:$0xff]  ;;  %v959_v2 = vld [vmem:[%s9510_s25 + $0x50] sm:$0xff] }
 0x1a4   :  { %4775 = vmatprep.subr.mxu1 %v1012_v42  ;;  %4741 = vmatpush3.msra.mxu0 %v964_v43  ;;  %v991_v42 = vld [vmem:[%s9510_s25 + $0x150] sm:$0xff]  ;;  %v974_v43 = vld [vmem:[%s9510_s25 + $0xc8] sm:$0xff] }
 0x1a5   :  { %4776 = vmatpush3.msra.mxu1 %v996_v29  ;;  %4742 = vmatprep.subr.mxu0 %v979_v27  ;;  %v1006_v29 = vld [vmem:[%s9510_s25 + $0x1c8] sm:$0xff] }
 0x1a6   :  { %4777 = vmatprep.subr.mxu1 %v1011_v34  ;;  %4743 = vmatpush3.msra.mxu0 %v963_v61  ;;  %v958_v27 = vld [vmem:[%s9510_s25 + $0x48] sm:$0xff]  ;;  %v973_v61 = vld [vmem:[%s9510_s25 + $0xc0] sm:$0xff] }
 0x1a7   :  { %4778 = vmatpush3.msra.mxu1 %v995_v13  ;;  %4744 = vmatprep.subr.mxu0 %v978_v26  ;;  %v990_v34 = vld [vmem:[%s9510_s25 + $0x148] sm:$0xff]  ;;  %v1005_v13 = vld [vmem:[%s9510_s25 + $0x1c0] sm:$0xff] }
 0x1a8   :  { %4779 = vmatprep.subr.mxu1 %v1010_v37  ;;  %4745 = vmatpush3.msra.mxu0 %v962_v35  ;;  %v957_v26 = vld [vmem:[%s9510_s25 + $0x40] sm:$0xff]  ;;  %v972_v35 = vld [vmem:[%s9510_s25 + $0xb8] sm:$0xff] }
 0x1a9   :  { %4780 = vmatpush3.msra.mxu1 %v994_v28  ;;  %4746 = vmatprep.subr.mxu0 %v977_v41  ;;  %v989_v37 = vld [vmem:[%s9510_s25 + $0x140] sm:$0xff]  ;;  %v1004_v28 = vld [vmem:[%s9510_s25 + $0x1b8] sm:$0xff] }
 0x1aa   :  { %v765_v33 = vpop.permute.xlu1 %764  ;;  %4781 = vmatprep.subr.mxu1 %v1009_v49  ;;  %4747 = vmatpush3.msra.mxu0 %v961_v36  ;;  %v956_v41 = vld [vmem:[%s9510_s25 + $0x38] sm:$0xff]  ;;  %v971_v36 = vld [vmem:[%s9510_s25 + $0xb0] sm:$0xff] }
 0x1ab   :  { %v988_v49 = vld [vmem:[%s9510_s25 + $0x138] sm:$0xff] }
 0x262   :  { %v837_v63 = vpop.f32.mrf.mxu0 }
 0x263   :  { %v6931_v10 = vadd.f32 %v837_v63, %v765_v33  ;;  %v908_v4 = vpop.f32.mrf.mxu1  ;;  %v976_v63 = vld [vmem:[%s9510_s25 + $0xd8] sm:$0xff] }
 0x264   :  { %v6933_v9 = vadd.f32 %v908_v4, %v765_v33  ;;  %v839_v51 = vpop.f32.mrf.mxu0  ;;  %v1008_v4 = vld [vmem:[%s9510_s25 + $0x1d8] sm:$0xff]  ;;  %4748 = vmatprep.subr.mxu0 %v976_v63  ;;  %v955_v63 = vld [vmem:[%s9510_s25 + $0x30] sm:$0xff] }
 0x265   :  { %v6935_v12 = vadd.f32 %v839_v51, %v765_v33  ;;  %v910_v7 = vpop.f32.mrf.mxu1  ;;  %v913_v59 = vmax.f32 %v6931_v10, 0.0  ;;  %v960_v51 = vld [vmem:[%s9510_s25 + $0x58] sm:$0xff] }
 0x266   :  { %v6937_v15 = vadd.f32 %v910_v7, %v765_v33  ;;  %v915_v24 = vmax.f32 %v6933_v9, 0.0  ;;  %v993_v33 = vld [vmem:[%s9510_s25 + $0x160] sm:$0xff]  ;;  %v992_v7 = vld [vmem:[%s9510_s25 + $0x158] sm:$0xff]  ;;  %4749 = vmatpush3.msra.mxu0 %v960_v51  ;;  %v970_v51 = vld [vmem:[%s9510_s25 + $0xa8] sm:$0xff] }
 0x267   :  { %v914_v50 = vmax.f32 %v6935_v12, 0.0  ;;  %4782 = vmatpush3.msra.mxu1 %v993_v33  ;;  %v1003_v33 = vld [vmem:[%s9510_s25 + $0x1b0] sm:$0xff] }
 0x268   :  { %v916_v39 = vmax.f32 %v6937_v15, 0.0  ;;  %4783 = vmatprep.subr.mxu1 %v1008_v4  ;;  %v987_v4 = vld [vmem:[%s9510_s25 + $0x130] sm:$0xff]  ;;  %v9513_v15 = vld [vmem:[#allocation2_spill] sm:$0xff] }
 0x269   :  { %v5772_v46 = vpack.i.bf16 %v914_v50, %v913_v59  ;;  %4784 = vmatpush3.msra.mxu1 %v992_v7  ;;  %v1002_v7 = vld [vmem:[%s9510_s25 + $0x1a8] sm:$0xff] }
 0x26a   :  { %v5777_v20 = vpack.i.bf16 %v916_v39, %v915_v24 }
 0x26b   :  { %5773 = vrot.lane.b32.xlu0 %v5772_v46, %s9338_s1  ;;  %v975_v46 = vld [vmem:[%s9510_s25 + $0xd0] sm:$0xff] }
 0x26c   :  { %5778 = vrot.lane.b32.xlu1 %v5777_v20, %s9338_s1  ;;  %v1007_v20 = vld [vmem:[%s9510_s25 + $0x1d0] sm:$0xff]  ;;  %4750 = vmatprep.subr.mxu0 %v975_v46  ;;  %v954_v46 = vld [vmem:[%s9510_s25 + $0x28] sm:$0xff] }
 0x26d   :  { %4785 = vmatprep.subr.mxu1 %v1007_v20  ;;  %4751 = vmatpush3.msra.mxu0 %v959_v2  ;;  %v986_v20 = vld [vmem:[%s9510_s25 + $0x128] sm:$0xff]  ;;  %v969_v2 = vld [vmem:[%s9510_s25 + $0xa0] sm:$0xff] }
 0x26e   :  { %4786 = vmatpush3.msra.mxu1 %v991_v42  ;;  %4752 = vmatprep.subr.mxu0 %v974_v43  ;;  %v1001_v42 = vld [vmem:[%s9510_s25 + $0x1a0] sm:$0xff] }
 0x26f   :  { %4787 = vmatprep.subr.mxu1 %v1006_v29  ;;  %4753 = vmatpush3.msra.mxu0 %v958_v27  ;;  %v953_v43 = vld [vmem:[%s9510_s25 + $0x20] sm:$0xff]  ;;  %v968_v27 = vld [vmem:[%s9510_s25 + $0x98] sm:$0xff] }
 0x270   :  { %4788 = vmatpush3.msra.mxu1 %v990_v34  ;;  %4754 = vmatprep.subr.mxu0 %v973_v61  ;;  %v985_v29 = vld [vmem:[%s9510_s25 + $0x120] sm:$0xff]  ;;  %v1000_v34 = vld [vmem:[%s9510_s25 + $0x198] sm:$0xff] }
 0x271   :  { %4789 = vmatprep.subr.mxu1 %v1005_v13  ;;  %4755 = vmatpush3.msra.mxu0 %v957_v26  ;;  %v952_v61 = vld [vmem:[%s9510_s25 + $0x18] sm:$0xff]  ;;  %v967_v26 = vld [vmem:[%s9510_s25 + $0x90] sm:$0xff] }
 0x272   :  { %4790 = vmatpush3.msra.mxu1 %v989_v37  ;;  %4756 = vmatprep.subr.mxu0 %v972_v35  ;;  %v984_v13 = vld [vmem:[%s9510_s25 + $0x118] sm:$0xff]  ;;  %v999_v37 = vld [vmem:[%s9510_s25 + $0x190] sm:$0xff] }
 0x273   :  { %4791 = vmatprep.subr.mxu1 %v1004_v28  ;;  %4757 = vmatpush3.msra.mxu0 %v956_v41  ;;  %v951_v35 = vld [vmem:[%s9510_s25 + $0x10] sm:$0xff]  ;;  %v966_v41 = vld [vmem:[%s9510_s25 + $0x88] sm:$0xff] }
 0x274   :  { %4792 = vmatpush3.msra.mxu1 %v988_v49  ;;  %4758 = vmatprep.subr.mxu0 %v971_v36  ;;  %v983_v28 = vld [vmem:[%s9510_s25 + $0x110] sm:$0xff]  ;;  %v998_v49 = vld [vmem:[%s9510_s25 + $0x188] sm:$0xff] }
 0x275   :  { %4793 = vmatprep.subr.mxu1 %v1003_v33  ;;  %4759 = vmatpush3.msra.mxu0 %v955_v63  ;;  %v950_v36 = vld [vmem:[%s9510_s25 + $0x8] sm:$0xff]  ;;  %v965_v63 = vld [vmem:[%s9510_s25 + $0x80] sm:$0xff] }
 0x276   :  { %4794 = vmatpush3.msra.mxu1 %v987_v4  ;;  %4760 = vmatprep.subr.mxu0 %v970_v51  ;;  %v982_v33 = vld [vmem:[%s9510_s25 + $0x108] sm:$0xff]  ;;  %v997_v4 = vld [vmem:[%s9510_s25 + $0x180] sm:$0xff] }
 0x277   :  { %4795 = vmatprep.subr.mxu1 %v1002_v7  ;;  %4761 = vmatpush3.msra.mxu0 %v954_v46  ;;  %v949_v7 = vld [vmem:[%s9510_s25] sm:$0xff] }
 0x278   :  { %4796 = vmatpush3.msra.mxu1 %v986_v20  ;;  %4762 = vmatprep.subr.mxu0 %v969_v2 }
 0x279   :  { %4797 = vmatprep.subr.mxu1 %v1001_v42  ;;  %4763 = vmatpush3.msra.mxu0 %v953_v43  ;;  %v981_v42 = vld [vmem:[%s9510_s25 + $0x100] sm:$0xff] }
 0x27a   :  { %4798 = vmatpush3.msra.mxu1 %v985_v29  ;;  %4764 = vmatprep.subr.mxu0 %v968_v27 }
 0x27b   :  { %4799 = vmatprep.subr.mxu1 %v1000_v34  ;;  %4765 = vmatpush3.msra.mxu0 %v952_v61  ;;  %v9511_v34 = vmov 0.0  }
 0x27c   :  { %4800 = vmatpush3.msra.mxu1 %v984_v13  ;;  %4766 = vmatprep.subr.mxu0 %v967_v26 }
 0x27d   :  { %4801 = vmatprep.subr.mxu1 %v999_v37  ;;  %4767 = vmatpush3.msra.mxu0 %v951_v35 }
 0x27e   :  { %4802 = vmatpush3.msra.mxu1 %v983_v28  ;;  %4768 = vmatprep.subr.mxu0 %v966_v41 }
 0x27f   :  { %4803 = vmatprep.subr.mxu1 %v998_v49  ;;  %4769 = vmatpush3.msra.mxu0 %v950_v36  ;;  %v1864_v49 = vld [vmem:[%s9512_s4] sm:$0xf]  ;;  %v9517_v36 = vsub.s32 2, %v9513_v15  ;;  %s9531_s4 = sld [smem:[#allocation37_spill]] }
 0x280   :  { %4804 = vmatpush3.msra.mxu1 %v982_v33  ;;  %4770 = vmatprep.subr.mxu0 %v965_v63  ;;  %v7185_v12 = vrot.slane %v1864_v49, %v6071_v5  ;;  %v2014_v63 = vld [vmem:[%s9518_s0] sm:$0xff]  ;;  %s9532_s0 = sld [smem:[#allocation38_spill]] }
 0x281   :  { %4805 = vmatprep.subr.mxu1 %v997_v4  ;;  %4771 = vmatpush3.msra.mxu0 %v949_v7  ;;  %v7197_v33 = vrot.slane %v1864_v49, %v9517_v36  ;;  %v9519_v4 = vmov 2   ;;  %v9522_v7 = vmov 4  }
 0x282   :  { %4806 = vmatpush3.msra.mxu1 %v981_v42  ;;  %5157 = vmatprep.subr.mxu0 %v9511_v34  ;;  %v9528_v42 = vmov 7  }
 0x283   :  { %5192 = vmatprep.subr.mxu1 %v9511_v34 }
 0x286   :  { %v1181_v3 = vld [vmem:[%s9532_s0 + $0xe0] sm:$0xff]  ;;  %v1179_v1 = vld [vmem:[%s9532_s0 + $0xd0] sm:$0xff] }
 0x2dd   :  { %v5774_v51 = vpop.permute.xlu0 %5773 }
 0x2de   :  { %v5776_v46 = vunpack.i.h.bf16 %v5774_v51  ;;  %v5775_v20 = vunpack.i.l.bf16 %v5774_v51  ;;  %v5779_v2 = vpop.permute.xlu1 %5778  ;;  %v9520_v51 = vmov 3  }
 0x2df   :  { %v5781_v43 = vunpack.i.h.bf16 %v5779_v2  ;;  %v5780_v29 = vunpack.i.l.bf16 %v5779_v2  ;;  %v9527_v2 = vmov 0  }
 0x2e0   :  { %v927_v27 = vsel %vm324_vm10, %v5775_v20, %v5776_v46 }
 0x2e1   :  { %v925_v61 = vsel %vm324_vm10, %v5780_v29, %v5781_v43  ;;  %v928_v13 = vsel %vm324_vm10, %v5781_v43, %v5775_v20  ;;  %v926_v26 = vsel %vm324_vm10, %v5776_v46, %v5780_v29  ;;  %v7157_v37 = vmax.f32 %v913_v59, %v927_v27  ;;  %v2248_v29 = vld [vmem:[%s9531_s4] sm:$0xff]  ;;  %s9585_s4 = sld [smem:[#allocation40_spill]] }
 0x2e2   :  { %v7161_v35 = vmax.f32 %v915_v24, %v925_v61  ;;  %v7165_v28 = vmax.f32 %v916_v39, %v928_v13  ;;  %v7169_v41 = vmax.f32 %v914_v50, %v926_v26  ;;  %v9514_v59 = vsub.s32 1, %v9513_v15 }
 0x2e3   :  { %v9515_v50 = vsub.s32 3, %v9513_v15  ;;  %v9524_v46 = vmov 6   ;;  %v9525_v20 = vmov 5   ;;  %v9530_v43 = vmov 8  }
 0x2e4   :  { %v5787_v10 = vpack.i.bf16 %v7165_v28, %v7161_v35  ;;  %v5782_v9 = vpack.i.bf16 %v7169_v41, %v7157_v37  ;;  %v7182_v24 = vrot.slane %v1864_v49, %v9514_v59 }
 0x2e5   :  { %v7193_v39 = vrot.slane %v1864_v49, %v9515_v50 }
 0x2e6   :  { %5788 = vrot.lane.b32.xlu1 %v5787_v10, %s5911_s10  ;;  %5783 = vrot.lane.b32.xlu0 %v5782_v9, %s5911_s10 }
 0x2e7   :  { %9516 = vst [vmem:[#allocation5_spill] sm:$0xff] %v7193_v39 }
 0x2ea   :  { %1888 = vrot.lane.b32.xlu1 %v7182_v24, %s9340_s30  ;;  %1886 = vrot.lane.b32.xlu0 %v7185_v12, %s9340_s30 }
 0x2ee   :  { %1892 = vrot.lane.b32.xlu1 %v7193_v39, %s9340_s30  ;;  %1890 = vrot.lane.b32.xlu0 %v7197_v33, %s9340_s30 }
 0x2f2   :  { %1904 = vrot.lane.b32.xlu1 %v7182_v24, %s9342_s6  ;;  %1902 = vrot.lane.b32.xlu0 %v7185_v12, %s9342_s6 }
 0x2f6   :  { %1908 = vrot.lane.b32.xlu1 %v7193_v39, %s9342_s6  ;;  %1906 = vrot.lane.b32.xlu0 %v7197_v33, %s9342_s6 }
 0x2fa   :  { %2041 = vperm.xlu1 %5793, %v2014_v63   ;;  %2017 = vperm.xlu0 %5792, %v2014_v63  }
 0x2fe   :  { %1918 = vrot.lane.b32.xlu1 %v7185_v12, %s9344_s11  ;;  %1920 = vrot.lane.b32.xlu0 %v7182_v24, %s9344_s11 }
 0x2ff   :  { %5794 = vset.pattern.permute.xlu1 %v9519_v4  ;;  %5795 = vset.pattern.permute.xlu0 %v9520_v51 }
 0x302   :  { %1922 = vrot.lane.b32.xlu1 %v7197_v33, %s9344_s11  ;;  %1924 = vrot.lane.b32.xlu0 %v7193_v39, %s9344_s11  ;;  %s5918_s11 = smov 121  }
 0x306   :  { %2069 = vperm.xlu1 %5794, %v2014_v63   ;;  %1934 = vrot.lane.b32.xlu0 %v7185_v12, %s9521_s5 }
 0x30a   :  { %1936 = vrot.lane.b32.xlu1 %v7182_v24, %s9521_s5  ;;  %1938 = vrot.lane.b32.xlu0 %v7197_v33, %s9521_s5 }
 0x30b   :  { %5796 = vset.pattern.permute.xlu1 %v9522_v7 }
 0x30e   :  { %1940 = vrot.lane.b32.xlu1 %v7193_v39, %s9521_s5  ;;  %2097 = vperm.xlu0 %5795, %v2014_v63  }
 0x312   :  { %2125 = vperm.xlu1 %5796, %v2014_v63   ;;  %1952 = vrot.lane.b32.xlu0 %v7182_v24, %s9523_s8 }
 0x313   :  { %5798 = vset.pattern.permute.xlu0 %v9524_v46 }
 0x316   :  { %1950 = vrot.lane.b32.xlu1 %v7185_v12, %s9523_s8  ;;  %1956 = vrot.lane.b32.xlu0 %v7193_v39, %s9523_s8 }
 0x317   :  { %5797 = vset.pattern.permute.xlu1 %v9525_v20 }
 0x31a   :  { %1954 = vrot.lane.b32.xlu1 %v7197_v33, %s9523_s8  ;;  %1966 = vrot.lane.b32.xlu0 %v7185_v12, %s9526_s2 }
 0x31e   :  { %2137 = vperm.xlu1 %5797, %v2014_v63   ;;  %1970 = vrot.lane.b32.xlu0 %v7197_v33, %s9526_s2 }
 0x322   :  { %1968 = vrot.lane.b32.xlu1 %v7182_v24, %s9526_s2  ;;  %2165 = vperm.xlu0 %5798, %v2014_v63  }
 0x323   :  { %5801 = vset.pattern.permute.xlu1 %v9527_v2 }
 0x326   :  { %1972 = vrot.lane.b32.xlu1 %v7193_v39, %s9526_s2  ;;  %1986 = vrot.lane.b32.xlu0 %v7197_v33, %s5911_s10 }
 0x327   :  { %5799 = vset.pattern.permute.xlu0 %v9528_v42 }
 0x32a   :  { %1982 = vrot.lane.b32.xlu1 %v7185_v12, %s5911_s10  ;;  %2193 = vperm.xlu0 %5799, %v2014_v63  }
 0x32e   :  { %1984 = vrot.lane.b32.xlu1 %v7182_v24, %s5911_s10  ;;  %2002 = vrot.lane.b32.xlu0 %v7197_v33, %s9529_s3 }
 0x32f   :  { %5800 = vset.pattern.permute.xlu0 %v9530_v43 }
 0x332   :  { %1988 = vrot.lane.b32.xlu1 %v7193_v39, %s5911_s10  ;;  %2221 = vperm.xlu0 %5800, %v2014_v63  }
 0x336   :  { %1998 = vrot.lane.b32.xlu1 %v7185_v12, %s9529_s3  ;;  %5822 = vset.pattern.permute.xlu0 %v9527_v2 }
 0x33a   :  { %2000 = vrot.lane.b32.xlu1 %v7182_v24, %s9529_s3 }
 0x33e   :  { %2004 = vrot.lane.b32.xlu1 %v7193_v39, %s9529_s3 }
 0x342   :  { %2251 = vperm.xlu1 %5801, %v2248_v29  }
 0x358   :  { %v5789_v27 = vpop.permute.xlu1 %5788  ;;  %v5784_v61 = vpop.permute.xlu0 %5783 }
 0x359   :  { %v5791_v13 = vunpack.i.h.bf16 %v5789_v27  ;;  %v5790_v26 = vunpack.i.l.bf16 %v5789_v27  ;;  %v5786_v49 = vunpack.i.h.bf16 %v5784_v61  ;;  %v5785_v10 = vunpack.i.l.bf16 %v5784_v61 }
 0x35b   :  { %v941_v9 = vsel %vm358_vm15, %v5790_v26, %v5791_v13  ;;  %v943_v15 = vsel %vm358_vm15, %v5785_v10, %v5786_v49  ;;  %v942_v59 = vsel %vm358_vm15, %v5786_v49, %v5790_v26  ;;  %v944_v50 = vsel %vm358_vm15, %v5791_v13, %v5785_v10  ;;  %v1168_v10 = vld [vmem:[%s9532_s0 + $0x78] sm:$0xff] }
 0x35c   :  { %v946_v36 = vmax.f32 %v7169_v41, %v942_v59  ;;  %v948_v63 = vmax.f32 %v7165_v28, %v944_v50  ;;  %v945_v4 = vmax.f32 %v7157_v37, %v943_v15  ;;  %v947_v51 = vmax.f32 %v7161_v35, %v941_v9  ;;  %v1889_v7 = vpop.permute.xlu1 %1888  ;;  %v1887_v46 = vpop.permute.xlu0 %1886  ;;  %v1184_v9 = vld [vmem:[%s9532_s0 + $0xf8] sm:$0xff]  ;;  %v1167_v15 = vld [vmem:[%s9532_s0 + $0x70] sm:$0xff] }
 0x35e   :  { %1077 = vmatprep.mubr.f32.mxu0 %v946_v36  ;;  %1147 = vmatprep.mubr.f32.mxu1 %v948_v63  ;;  %v1183_v36 = vld [vmem:[%s9532_s0 + $0xf0] sm:$0xff]  ;;  %v1166_v63 = vld [vmem:[%s9532_s0 + $0x68] sm:$0xff] }
 0x35f   :  { %1078 = vmatmul.mubr.f32.vlgmr.msra.gmra.mxu0 %v945_v4  ;;  %1148 = vmatmul.mubr.f32.vlgmr.msra.gmra.mxu1 %v947_v51  ;;  %v1182_v4 = vld [vmem:[%s9532_s0 + $0xe8] sm:$0xff]  ;;  %v1165_v51 = vld [vmem:[%s9532_s0 + $0x60] sm:$0xff] }
 0x360   :  { %v1893_v20 = vpop.permute.xlu1 %1892  ;;  %v1891_v2 = vpop.permute.xlu0 %1890  ;;  %5193 = vmatpush3.msra.mxu1 %v1168_v10  ;;  %5158 = vmatpush3.msra.mxu0 %v1184_v9 }
 0x361   :  { %5194 = vmatprep.subr.mxu1 %v9511_v34  ;;  %5159 = vmatprep.subr.mxu0 %v9511_v34  ;;  %v1897_v32 = vsel %vm9535_vm4, %v1893_v20, %v1887_v46 }
 0x362   :  { %5195 = vmatpush3.msra.mxu1 %v1167_v15  ;;  %5160 = vmatpush3.msra.mxu0 %v1183_v36  ;;  %v1164_v15 = vld [vmem:[%s9532_s0 + $0x58] sm:$0xff]  ;;  %v1896_v36 = vsel %vm9533_vm11, %v1887_v46, %v1889_v7  ;;  %v1894_v46 = vsel %vm9539_vm14, %v1891_v2, %v1893_v20  ;;  %v1178_v20 = vld [vmem:[%s9532_s0 + $0xc8] sm:$0xff]  ;;  %vm9544_vm11 = vmmov %vm9542_vm3 }
 0x363   :  { %5196 = vmatprep.subr.mxu1 %v9511_v34  ;;  %5161 = vmatprep.subr.mxu0 %v9511_v34 }
 0x364   :  { %v1905_v42 = vpop.permute.xlu1 %1904  ;;  %v1903_v43 = vpop.permute.xlu0 %1902  ;;  %5197 = vmatpush3.msra.mxu1 %v1166_v63  ;;  %5162 = vmatpush3.msra.mxu0 %v1182_v4  ;;  %v1180_v63 = vld [vmem:[%s9532_s0 + $0xd8] sm:$0xff] }
 0x365   :  { %5198 = vmatprep.subr.mxu1 %v9511_v34  ;;  %5163 = vmatprep.subr.mxu0 %v9511_v34  ;;  %v1912_v55 = vsel %vm9537_vm7, %v1903_v43, %v1905_v42 }
 0x366   :  { %5199 = vmatpush3.msra.mxu1 %v1165_v51  ;;  %5164 = vmatpush3.msra.mxu0 %v1181_v3  ;;  %v1163_v51 = vld [vmem:[%s9532_s0 + $0x50] sm:$0xff]  ;;  %v1895_v3 = vsel %vm9536_vm9, %v1889_v7, %v1891_v2  ;;  %v1162_v7 = vld [vmem:[%s9532_s0 + $0x48] sm:$0xff] }
 0x367   :  { %5200 = vmatprep.subr.mxu1 %v9511_v34  ;;  %5165 = vmatprep.subr.mxu0 %v9511_v34 }
 0x368   :  { %v1909_v29 = vpop.permute.xlu1 %1908  ;;  %v1907_v27 = vpop.permute.xlu0 %1906  ;;  %5201 = vmatpush3.msra.mxu1 %v1164_v15  ;;  %v7369_v15 = vmul.f32 %v9502_v58, %v1896_v36  ;;  %5166 = vmatpush3.msra.mxu0 %v1180_v63  ;;  %v7387_v36 = vmul.f32 %v9509_v19, %v1895_v3  ;;  %v1915_v63 = vmul.f32 %v6360_v21, %v1912_v55  ;;  %v1774_v21 = vld [vmem:[%s9532_s0 + $0x388] sm:$0xff] }
 0x369   :  { %v1913_v4 = vsel %vm9534_vm0, %v1909_v29, %v1903_v43  ;;  %v1911_v22 = vsel %vm9538_vm6, %v1905_v42, %v1907_v27  ;;  %5202 = vmatprep.subr.mxu1 %v9511_v34  ;;  %v1910_v30 = vsel %vm9540_vm12, %v1907_v27, %v1909_v29  ;;  %5167 = vmatprep.subr.mxu0 %v9511_v34  ;;  %v1160_v29 = vld [vmem:[%s9532_s0 + $0x38] sm:$0xff]  ;;  %vm9545_vm0 = vcmp.lt.s32.totalorder %v6189_v31, 1 }
 0x36a   :  { %v1914_v43 = vmul.f32 %v6336_v47, %v1913_v4  ;;  %5203 = vmatpush3.msra.mxu1 %v1163_v51  ;;  %v7384_v42 = vmul.f32 %v9506_v62, %v1897_v32  ;;  %5168 = vmatpush3.msra.mxu0 %v1179_v1  ;;  %v1161_v32 = vld [vmem:[%s9532_s0 + $0x40] sm:$0xff]  ;;  %v1916_v2 = vmul.f32 %v9500_v52, %v1911_v22  ;;  %vm9546_vm4 = vmmov %vm9545_vm0  ;;  %vm5915_vm6 = vmmov 0  }
 0x36b   :  { %5204 = vmatprep.subr.mxu1 %v9511_v34  ;;  %5169 = vmatprep.subr.mxu0 %v9511_v34  ;;  %v1917_v55 = vmul.f32 %v9499_v45, %v1910_v30  ;;  %v1177_v1 = vld [vmem:[%s9532_s0 + $0xc0] sm:$0xff]  ;;  %v2027_v27 = vrot.slane %v7369_v15, %v6071_v5  ;;  %v7414_v22 = vmul.f32 %v9507_v54, %v1894_v46  ;;  %v1176_v15 = vld [vmem:[%s9532_s0 + $0xb8] sm:$0xff]  ;;  %v1159_v46 = vld [vmem:[%s9532_s0 + $0x30] sm:$0xff] }
 0x36c   :  { %5205 = vmatpush3.msra.mxu1 %v1162_v7  ;;  %v2047_v4 = vrot.slane %v1914_v43, %v6071_v5  ;;  %5170 = vmatpush3.msra.mxu0 %v1178_v20  ;;  %v2023_v30 = vrot.slane %v7384_v42, %v6071_v5  ;;  %v2031_v51 = vrot.slane %v7387_v36, %v6071_v5  ;;  %vm9547_vm9 = vmmov %vm9545_vm0 }
 0x36d   :  { %5206 = vmatprep.subr.mxu1 %v9511_v34  ;;  %v2051_v3 = vrot.slane %v1915_v63, %v6071_v5  ;;  %5171 = vmatprep.subr.mxu0 %v9511_v34  ;;  %v2055_v43 = vrot.slane %v1916_v2, %v6071_v5  ;;  %v2059_v63 = vrot.slane %v1917_v55, %v6071_v5  ;;  %v1158_v55 = vld [vmem:[%s9532_s0 + $0x28] sm:$0xff]  ;;  %vm9548_vm7 = vmmov %vm9545_vm0 }
 0x36e   :  { %5207 = vmatpush3.msra.mxu1 %v1161_v32  ;;  %5172 = vmatpush3.msra.mxu0 %v1177_v1  ;;  %vm9564_vm14 = vmmov %vm9545_vm0 }
 0x36f   :  { %5208 = vmatprep.subr.mxu1 %v9511_v34  ;;  %5173 = vmatprep.subr.mxu0 %v9511_v34  ;;  %vm9565_vm12 = vmmov %vm9545_vm0 }
 0x370   :  { %5209 = vmatpush3.msra.mxu1 %v1160_v29  ;;  %5174 = vmatpush3.msra.mxu0 %v1176_v15 }
 0x371   :  { %5210 = vmatprep.subr.mxu1 %v9511_v34  ;;  %5175 = vmatprep.subr.mxu0 %v9511_v34 }
 0x372   :  { %5211 = vmatpush3.msra.mxu1 %v1159_v46  ;;  %5224 = vmatprep.mubr.msk.f32.mxu1 %vm5915_vm6, %v9511_v34 }
 0x373   :  { %5212 = vmatprep.subr.mxu1 %v9511_v34  ;;  %5189 = vmatprep.mubr.msk.f32.mxu0 %vm5915_vm6, %v9511_v34 }
 0x374   :  { %5213 = vmatpush3.msra.mxu1 %v1158_v55 }
 0x375   :  { %v7286_v61 = vpop.permute.xlu1 %2041  ;;  %v7288_v41 = vpop.permute.xlu0 %2017  ;;  %5214 = vmatprep.subr.mxu1 %v9511_v34 }
 0x376   :  { %v2060_v1 = vmul.f32 %v2047_v4, %v7286_v61  ;;  %v1157_v4 = vld [vmem:[%s9532_s0 + $0x20] sm:$0xff] }
 0x377   :  { %5215 = vmatpush3.msra.mxu1 %v1157_v4 }
 0x378   :  { %5216 = vmatprep.subr.mxu1 %v9511_v34 }
 0x379   :  { %v7290_v28 = vpop.permute.xlu1 %1918  ;;  %v7292_v37 = vpop.permute.xlu0 %1920 }
 0x37a   :  { %v1928_v42 = vsel %vm9541_vm8, %v7290_v28, %v7292_v37  ;;  %vm9566_vm8 = vmmov %vm9542_vm3 }
 0x37b   :  { %v1931_v29 = vmul.f32 %v6376_v0, %v1928_v42  ;;  %v2062_v42 = vmul.f32 %v2055_v43, %v7286_v61  ;;  %v2037_v43 = vmul.f32 %v2027_v27, %v7288_v41 }
 0x37d   :  { %v7294_v35 = vpop.permute.xlu1 %1922  ;;  %v7296_v13 = vpop.permute.xlu0 %1924 }
 0x37e   :  { %v1929_v36 = vsel %vm9542_vm3, %v7296_v13, %v7290_v28  ;;  %v1927_v20 = vsel %vm9543_vm5, %v7292_v37, %v7294_v35  ;;  %v1926_v32 = vsel %vm9544_vm11, %v7294_v35, %v7296_v13  ;;  %v1175_v28 = vld [vmem:[%s9532_s0 + $0xb0] sm:$0xff]  ;;  %v2035_v37 = vrot.slane %v7414_v22, %v6071_v5  ;;  %v1174_v22 = vld [vmem:[%s9532_s0 + $0xa8] sm:$0xff]  ;;  %vm9567_vm5 = vmmov %vm9542_vm3 }
 0x37f   :  { %v2061_v13 = vmul.f32 %v2051_v3, %v7286_v61  ;;  %v1930_v62 = vmul.f32 %v6396_v38, %v1929_v36  ;;  %v1932_v3 = vmul.f32 %v6391_v14, %v1927_v20  ;;  %v1933_v15 = vmul.f32 %v6399_v18, %v1926_v32  ;;  %5176 = vmatpush3.msra.mxu0 %v1175_v28  ;;  %v1173_v20 = vld [vmem:[%s9532_s0 + $0xa0] sm:$0xff]  ;;  %vm9568_vm11 = vmmov %vm9542_vm3 }
 0x380   :  { %v2063_v36 = vmul.f32 %v2059_v63, %v7286_v61  ;;  %5177 = vmatprep.subr.mxu0 %v9511_v34  ;;  %v2036_v32 = vmul.f32 %v2023_v30, %v7288_v41  ;;  %v2038_v61 = vmul.f32 %v2031_v51, %v7288_v41  ;;  %v2079_v63 = vrot.slane %v1931_v29, %v6071_v5 }
 0x381   :  { %v7298_v26 = vpop.permute.xlu1 %2069  ;;  %v7300_v49 = vpop.permute.xlu0 %1934  ;;  %5178 = vmatpush3.msra.mxu0 %v1174_v22  ;;  %v2075_v28 = vrot.slane %v1930_v62, %v6071_v5  ;;  %v2039_v27 = vmul.f32 %v2035_v37, %v7288_v41  ;;  %v2083_v30 = vrot.slane %v1932_v3, %v6071_v5  ;;  %v2087_v51 = vrot.slane %v1933_v15, %v6071_v5  ;;  %v1172_v41 = vld [vmem:[%s9532_s0 + $0x98] sm:$0xff] }
 0x382   :  { %5179 = vmatprep.subr.mxu0 %v9511_v34  ;;  %v2064_v37 = vadd.f32 %v2060_v1, %v2036_v32  ;;  %v2065_v4 = vadd.f32 %v2061_v13, %v2037_v43  ;;  %v2066_v15 = vadd.f32 %v2062_v42, %v2038_v61 }
 0x383   :  { %5180 = vmatpush3.msra.mxu0 %v1173_v20  ;;  %v1171_v20 = vld [vmem:[%s9532_s0 + $0x90] sm:$0xff]  ;;  %v2067_v32 = vadd.f32 %v2063_v36, %v2039_v27  ;;  %v2091_v43 = vmul.f32 %v2087_v51, %v7298_v26 }
 0x384   :  { %5181 = vmatprep.subr.mxu0 %v9511_v34 }
 0x385   :  { %v7311_v59 = vpop.permute.xlu1 %1936  ;;  %v7313_v50 = vpop.permute.xlu0 %1938  ;;  %5182 = vmatpush3.msra.mxu0 %v1172_v41 }
 0x386   :  { %v1944_v35 = vsel %vm9545_vm0, %v7300_v49, %v7311_v59  ;;  %v1943_v46 = vsel %vm9546_vm4, %v7311_v59, %v7313_v50  ;;  %v1156_v59 = vld [vmem:[%s9532_s0 + $0x18] sm:$0xff]  ;;  %5183 = vmatprep.subr.mxu0 %v9511_v34 }
 0x387   :  { %v1947_v54 = vmul.f32 %v6404_v17, %v1944_v35  ;;  %v1948_v55 = vmul.f32 %v6418_v44, %v1943_v46  ;;  %5217 = vmatpush3.msra.mxu1 %v1156_v59  ;;  %v2090_v46 = vmul.f32 %v2083_v30, %v7298_v26  ;;  %v1154_v59 = vld [vmem:[%s9532_s0 + $0x8] sm:$0xff]  ;;  %5184 = vmatpush3.msra.mxu0 %v1171_v20 }
 0x388   :  { %5218 = vmatprep.subr.mxu1 %v9511_v34  ;;  %5185 = vmatprep.subr.mxu0 %v9511_v34 }
 0x389   :  { %v7331_v10 = vpop.permute.xlu1 %1940  ;;  %v7333_v9 = vpop.permute.xlu0 %2097  ;;  %v2107_v62 = vrot.slane %v1947_v54, %v6071_v5  ;;  %v1155_v54 = vld [vmem:[%s9532_s0 + $0x10] sm:$0xff]  ;;  %v2094_v41 = vadd.f32 %v2090_v46, %v2066_v15 }
 0x38a   :  { %v1942_v29 = vsel %vm9547_vm9, %v7313_v50, %v7331_v10  ;;  %v1945_v22 = vsel %vm9548_vm7, %v7331_v10, %v7300_v49  ;;  %5219 = vmatpush3.msra.mxu1 %v1155_v54  ;;  %v2088_v50 = vmul.f32 %v2075_v28, %v7298_v26  ;;  %v2089_v49 = vmul.f32 %v2079_v63, %v7298_v26  ;;  %v1170_v28 = vld [vmem:[%s9532_s0 + $0x88] sm:$0xff]  ;;  %v1153_v26 = vld [vmem:[%s9532_s0] sm:$0xff] }
 0x38b   :  { %v2111_v10 = vrot.slane %v1948_v55, %v6071_v5  ;;  %5220 = vmatprep.subr.mxu1 %v9511_v34  ;;  %v1946_v1 = vmul.f32 %v6423_v16, %v1945_v22  ;;  %v1949_v13 = vmul.f32 %v6428_v57, %v1942_v29  ;;  %v2117_v63 = vmul.f32 %v2107_v62, %v7333_v9  ;;  %v1169_v62 = vld [vmem:[%s9532_s0 + $0x80] sm:$0xff] }
 0x38c   :  { %5221 = vmatpush3.msra.mxu1 %v1154_v59  ;;  %v2092_v36 = vadd.f32 %v2088_v50, %v2064_v37  ;;  %v2093_v55 = vadd.f32 %v2089_v49, %v2065_v4  ;;  %5186 = vmatpush3.msra.mxu0 %v1170_v28  ;;  %v2095_v54 = vadd.f32 %v2091_v43, %v2067_v32 }
 0x38d   :  { %v7351_v11 = vpop.permute.xlu1 %2125  ;;  %v7353_v23 = vpop.permute.xlu0 %1952  ;;  %v2118_v27 = vmul.f32 %v2111_v10, %v7333_v9  ;;  %5222 = vmatprep.subr.mxu1 %v9511_v34  ;;  %v2103_v29 = vrot.slane %v1946_v1, %v6071_v5  ;;  %v2115_v22 = vrot.slane %v1949_v13, %v6071_v5  ;;  %5187 = vmatprep.subr.mxu0 %v9511_v34 }
 0x38e   :  { %5223 = vmatpush3.msra.mxu1 %v1153_v26  ;;  %v2121_v37 = vadd.f32 %v2117_v63, %v2093_v55  ;;  %5188 = vmatpush3.msra.mxu0 %v1169_v62  ;;  %v2128_v32 = vmul.f32 %v7351_v11, %v7185_v12 }
 0x38f   :  { %5262 = vmatprep.subr.mxu1 %v9511_v34  ;;  %v2122_v15 = vadd.f32 %v2118_v27, %v2094_v41  ;;  %5227 = vmatprep.subr.mxu0 %v9511_v34  ;;  %v2119_v20 = vmul.f32 %v2115_v22, %v7333_v9  ;;  %v9549_v22 = vld [vmem:[#allocation5_spill] sm:$0xff] }
 0x390   :  { %v2131_v41 = vmul.f32 %v7351_v11, %v9549_v22 }
 0x391   :  { %v7390_v58 = vpop.permute.xlu1 %1950  ;;  %v7392_v39 = vpop.permute.xlu0 %1956  ;;  %v2123_v62 = vadd.f32 %v2119_v20, %v2095_v54 }
 0x392   :  { %v1960_v61 = vsel %vm324_vm10, %v7390_v58, %v7353_v23  ;;  %v1961_v46 = vsel %vm324_vm10, %v7392_v39, %v7390_v58 }
 0x393   :  { %v1962_v4 = vmul.f32 %v6439_v6, %v1960_v61 }
 0x395   :  { %v7422_v7 = vpop.permute.xlu1 %1954  ;;  %v7450_v2 = vpop.permute.xlu0 %1966  ;;  %v2143_v63 = vrot.slane %v1962_v4, %v6071_v5 }
 0x396   :  { %v1959_v30 = vsel %vm324_vm10, %v7353_v23, %v7422_v7  ;;  %v1958_v1 = vsel %vm324_vm10, %v7422_v7, %v7392_v39  ;;  %v2129_v39 = vmul.f32 %v7351_v11, %v7182_v24 }
 0x397   :  { %v1963_v23 = vmul.f32 %v6451_v8, %v1959_v30  ;;  %v1964_v61 = vmul.f32 %v9480_v25, %v1958_v1 }
 0x398   :  { %v2133_v20 = vadd.f32 %v2129_v39, %v2121_v37 }
 0x399   :  { %v7470_v19 = vpop.permute.xlu1 %2137  ;;  %v7505_v47 = vpop.permute.xlu0 %1970  ;;  %v2147_v28 = vrot.slane %v1963_v23, %v6071_v5  ;;  %v2151_v54 = vrot.slane %v1964_v61, %v6071_v5 }
 0x39b   :  { %v2157_v1 = vmul.f32 %v2147_v28, %v7470_v19  ;;  %v2158_v28 = vmul.f32 %v2151_v54, %v7470_v19 }
 0x39d   :  { %v7503_v35 = vpop.permute.xlu1 %1968  ;;  %v7547_v42 = vpop.permute.xlu0 %2165  ;;  %v2161_v39 = vadd.f32 %v2157_v1, %v2133_v20 }
 0x39e   :  { %v1976_v49 = vsel %vm341_vm13, %v7450_v2, %v7503_v35  ;;  %v1975_v10 = vsel %vm341_vm13, %v7503_v35, %v7505_v47  ;;  %v2116_v35 = vmul.f32 %v2103_v29, %v7333_v9  ;;  %v1965_v9 = vmul.f32 %v9482_v60, %v1961_v46 }
 0x39f   :  { %v1978_v7 = vmul.f32 %v9476_v56, %v1976_v49  ;;  %v1979_v43 = vmul.f32 %v9477_v53, %v1975_v10  ;;  %v2130_v29 = vmul.f32 %v7351_v11, %v7197_v33  ;;  %v9550_v49 = vld [vmem:[#allocation20_spill] sm:$0xff]  ;;  %v9551_v10 = vld [vmem:[#allocation21_spill] sm:$0xff]  ;;  %v2156_v11 = vmul.f32 %v2143_v63, %v7470_v19 }
 0x3a0   :  { %v2120_v30 = vadd.f32 %v2116_v35, %v2092_v36  ;;  %v2155_v36 = vrot.slane %v1965_v9, %v6071_v5 }
 0x3a1   :  { %v7532_v3 = vpop.permute.xlu1 %1972  ;;  %v1987_v50 = vpop.permute.xlu0 %1986  ;;  %v2175_v23 = vrot.slane %v1979_v43, %v6071_v5 }
 0x3a2   :  { %v1974_v12 = vsel %vm341_vm13, %v7505_v47, %v7532_v3  ;;  %v1977_v24 = vsel %vm341_vm13, %v7532_v3, %v7450_v2  ;;  %v2171_v47 = vrot.slane %v1978_v7, %v6071_v5  ;;  %v9553_v7 = vld [vmem:[#allocation24_spill] sm:$0xff]  ;;  %v2132_v61 = vadd.f32 %v2128_v32, %v2120_v30 }
 0x3a3   :  { %v1980_v33 = vmul.f32 %v9550_v49, %v1974_v12  ;;  %v1981_v46 = vmul.f32 %v9551_v10, %v1977_v24  ;;  %v2135_v12 = vadd.f32 %v2131_v41, %v2123_v62  ;;  %v2185_v63 = vmul.f32 %v2175_v23, %v7547_v42  ;;  %v9554_v23 = vld [vmem:[#allocation25_spill] sm:$0xff] }
 0x3a4   :  { %v2184_v24 = vmul.f32 %v2171_v47, %v7547_v42 }
 0x3a5   :  { %v1983_v51 = vpop.permute.xlu1 %1982  ;;  %v2194_v4 = vpop.permute.xlu0 %2193  ;;  %v2183_v37 = vrot.slane %v1981_v46, %v6071_v5  ;;  %v2189_v47 = vadd.f32 %v2185_v63, %v2161_v39 }
 0x3a9   :  { %v1985_v13 = vpop.permute.xlu1 %1984  ;;  %v2003_v9 = vpop.permute.xlu0 %2002 }
 0x3aa   :  { %v1992_v59 = vsel %vm358_vm15, %v1983_v51, %v1985_v13  ;;  %v1991_v58 = vsel %vm358_vm15, %v1985_v13, %v1987_v50 }
 0x3ab   :  { %v1994_v26 = vmul.f32 %v9481_v48, %v1992_v59  ;;  %v1995_v55 = vmul.f32 %v6527_v40, %v1991_v58  ;;  %v2134_v59 = vadd.f32 %v2130_v29, %v2122_v15  ;;  %v2160_v15 = vadd.f32 %v2156_v11, %v2132_v61 }
 0x3ac   :  { %v2187_v11 = vmul.f32 %v2183_v37, %v7547_v42 }
 0x3ad   :  { %v1989_v27 = vpop.permute.xlu1 %1988  ;;  %v2199_v13 = vrot.slane %v1994_v26, %v6071_v5  ;;  %v2203_v35 = vrot.slane %v1995_v55, %v6071_v5  ;;  %v2159_v26 = vmul.f32 %v2155_v36, %v7470_v19  ;;  %v2179_v55 = vrot.slane %v1980_v33, %v6071_v5  ;;  %v2222_v1 = vpop.permute.xlu0 %2221 }
 0x3ae   :  { %v1990_v2 = vsel %vm358_vm15, %v1987_v50, %v1989_v27  ;;  %v1993_v3 = vsel %vm358_vm15, %v1989_v27, %v1983_v51  ;;  %v9552_v51 = vld [vmem:[#allocation23_spill] sm:$0xff]  ;;  %v2188_v19 = vadd.f32 %v2184_v24, %v2160_v15  ;;  %v2162_v54 = vadd.f32 %v2158_v28, %v2134_v59 }
 0x3af   :  { %v1996_v58 = vmul.f32 %v9552_v51, %v1990_v2  ;;  %v1997_v43 = vmul.f32 %v9553_v7, %v1993_v3  ;;  %v2212_v27 = vmul.f32 %v2199_v13, %v2194_v4  ;;  %v2213_v29 = vmul.f32 %v2203_v35, %v2194_v4  ;;  %v9555_v3 = vld [vmem:[#allocation26_spill] sm:$0xff] }
 0x3b0   :  { %v2163_v33 = vadd.f32 %v2159_v26, %v2135_v12  ;;  %v2186_v46 = vmul.f32 %v2179_v55, %v7547_v42  ;;  %v9556_v12 = vld [vmem:[#allocation27_spill] sm:$0xff]  ;;  %v9557_v26 = vld [vmem:[#allocation28_spill] sm:$0xff] }
 0x3b1   :  { %v1999_v50 = vpop.permute.xlu1 %1998  ;;  %v2207_v32 = vrot.slane %v1996_v58, %v6071_v5  ;;  %v2211_v30 = vrot.slane %v1997_v43, %v6071_v5  ;;  %v2216_v13 = vadd.f32 %v2212_v27, %v2188_v19  ;;  %v2217_v35 = vadd.f32 %v2213_v29, %v2189_v47 }
 0x3b2   :  { %v2190_v15 = vadd.f32 %v2186_v46, %v2162_v54  ;;  %v2191_v39 = vadd.f32 %v2187_v11, %v2163_v33  ;;  %v2391_v11 = vld [vmem:[%s9561_s29] sm:$0xff] }
 0x3b3   :  { %v2214_v61 = vmul.f32 %v2207_v32, %v2194_v4  ;;  %v2215_v24 = vmul.f32 %v2211_v30, %v2194_v4 }
 0x3b5   :  { %v2001_v22 = vpop.permute.xlu1 %2000  ;;  %v2218_v30 = vadd.f32 %v2214_v61, %v2190_v15  ;;  %v1341_v15 = vld [vmem:[%s9532_s0 + $0x168] sm:$0xff] }
 0x3b6   :  { %v2008_v62 = vsel %vm375_vm2, %v1999_v50, %v2001_v22  ;;  %v2007_v41 = vsel %vm375_vm2, %v2001_v22, %v2003_v9 }
 0x3b7   :  { %v2010_v2 = vmul.f32 %v9554_v23, %v2008_v62  ;;  %v2011_v36 = vmul.f32 %v9555_v3, %v2007_v41 }
 0x3b9   :  { %v2227_v20 = vrot.slane %v2010_v2, %v6071_v5  ;;  %v2231_v58 = vrot.slane %v2011_v36, %v6071_v5  ;;  %v2005_v43 = vpop.permute.xlu1 %2004 }
 0x3ba   :  { %v2006_v63 = vsel %vm375_vm2, %v2003_v9, %v2005_v43  ;;  %v2009_v59 = vsel %vm375_vm2, %v2005_v43, %v1999_v50  ;;  %v2219_v9 = vadd.f32 %v2215_v24, %v2191_v39  ;;  %v1429_v39 = vld [vmem:[%s9532_s0 + $0x1e0] sm:$0xff] }
 0x3bb   :  { %v2012_v28 = vmul.f32 %v9556_v12, %v2006_v63  ;;  %v2013_v42 = vmul.f32 %v9557_v26, %v2009_v59  ;;  %v2240_v55 = vmul.f32 %v2227_v20, %v2222_v1  ;;  %v2241_v37 = vmul.f32 %v2231_v58, %v2222_v1  ;;  %v1432_v63 = vld [vmem:[%s9532_s0 + $0x1f8] sm:$0xff] }
 0x3bd   :  { %v2235_v27 = vrot.slane %v2012_v28, %v6071_v5  ;;  %v2239_v29 = vrot.slane %v2013_v42, %v6071_v5  ;;  %v2252_v22 = vpop.permute.xlu1 %2251  ;;  %v2244_v4 = vadd.f32 %v2240_v55, %v2216_v13  ;;  %v2245_v32 = vadd.f32 %v2241_v37, %v2217_v35  ;;  %v1343_v28 = vld [vmem:[%s9532_s0 + $0x178] sm:$0xff]  ;;  %v1431_v42 = vld [vmem:[%s9532_s0 + $0x1f0] sm:$0xff]  ;;  %v1430_v37 = vld [vmem:[%s9532_s0 + $0x1e8] sm:$0xff] }
 0x3be   :  { %v1342_v55 = vld [vmem:[%s9532_s0 + $0x170] sm:$0xff] }
 0x3bf   :  { %v2242_v62 = vmul.f32 %v2235_v27, %v2222_v1  ;;  %v2243_v41 = vmul.f32 %v2239_v29, %v2222_v1  ;;  %v2254_v50 = vadd.f32 %v2252_v22, %v2244_v4  ;;  %v2255_v19 = vadd.f32 %v2252_v22, %v2245_v32  ;;  %v1340_v27 = vld [vmem:[%s9532_s0 + $0x160] sm:$0xff]  ;;  %v1428_v29 = vld [vmem:[%s9532_s0 + $0x1d8] sm:$0xff]  ;;  %v1427_v4 = vld [vmem:[%s9532_s0 + $0x1d0] sm:$0xff] }
 0x3c0   :  { %v1338_v32 = vld [vmem:[%s9532_s0 + $0x150] sm:$0xff] }
 0x3c1   :  { %v2246_v47 = vadd.f32 %v2242_v62, %v2218_v30  ;;  %v2247_v2 = vadd.f32 %v2243_v41, %v2219_v9  ;;  %v7668_v36 = vmax.f32 %v2254_v50, 0.0  ;;  %v7670_v20 = vmax.f32 %v2255_v19, 0.0  ;;  %v1426_v30 = vld [vmem:[%s9532_s0 + $0x1c8] sm:$0xff]  ;;  %v1425_v62 = vld [vmem:[%s9532_s0 + $0x1c0] sm:$0xff]  ;;  %v1424_v50 = vld [vmem:[%s9532_s0 + $0x1b8] sm:$0xff] }
 0x3c2   :  { %v1337_v9 = vld [vmem:[%s9532_s0 + $0x148] sm:$0xff]  ;;  %v1336_v41 = vld [vmem:[%s9532_s0 + $0x140] sm:$0xff]  ;;  %v1335_v19 = vld [vmem:[%s9532_s0 + $0x138] sm:$0xff] }
 0x3c3   :  { %v2256_v54 = vadd.f32 %v2252_v22, %v2246_v47  ;;  %v2257_v33 = vadd.f32 %v2252_v22, %v2247_v2  ;;  %2376 = vrot.lane.b32.xlu0 %v7670_v20, %s9529_s3  ;;  %2374 = vrot.lane.b32.xlu1 %v7668_v36, %s9529_s3  ;;  %v1339_v22 = vld [vmem:[%s9532_s0 + $0x158] sm:$0xff]  ;;  %v1423_v47 = vld [vmem:[%s9532_s0 + $0x1b0] sm:$0xff] }
 0x3c4   :  { %v1334_v2 = vld [vmem:[%s9532_s0 + $0x130] sm:$0xff] }
 0x3c5   :  { %v7676_v5 = vmax.f32 %v2256_v54, 0.0  ;;  %v7678_v46 = vmax.f32 %v2257_v33, 0.0  ;;  %v1422_v54 = vld [vmem:[%s9532_s0 + $0x1a8] sm:$0xff] }
 0x3c7   :  { %2380 = vrot.lane.b32.xlu0 %v7678_v46, %s9529_s3  ;;  %2378 = vrot.lane.b32.xlu1 %v7676_v5, %s9529_s3  ;;  %s9559_s3 = smov 16  }
 0x3cb   :  { %2360 = vrot.lane.b32.xlu0 %v7670_v20, %s5911_s10  ;;  %2358 = vrot.lane.b32.xlu1 %v7668_v36, %s5911_s10 }
 0x3cf   :  { %2364 = vrot.lane.b32.xlu0 %v7678_v46, %s5911_s10  ;;  %2362 = vrot.lane.b32.xlu1 %v7676_v5, %s5911_s10 }
 0x3d3   :  { %2344 = vrot.lane.b32.xlu0 %v7670_v20, %s9526_s2  ;;  %2342 = vrot.lane.b32.xlu1 %v7668_v36, %s9526_s2 }
 0x3d7   :  { %2348 = vrot.lane.b32.xlu0 %v7678_v46, %s9526_s2  ;;  %2346 = vrot.lane.b32.xlu1 %v7676_v5, %s9526_s2  ;;  %s9558_s2 = smov 15  }
 0x3db   :  { %2328 = vrot.lane.b32.xlu0 %v7670_v20, %s9523_s8  ;;  %2326 = vrot.lane.b32.xlu1 %v7668_v36, %s9523_s8 }
 0x3df   :  { %2332 = vrot.lane.b32.xlu0 %v7678_v46, %s9523_s8  ;;  %2330 = vrot.lane.b32.xlu1 %v7676_v5, %s9523_s8 }
 0x3e3   :  { %2312 = vrot.lane.b32.xlu0 %v7670_v20, %s9521_s5  ;;  %2310 = vrot.lane.b32.xlu1 %v7668_v36, %s9521_s5 }
 0x3e7   :  { %2316 = vrot.lane.b32.xlu0 %v7678_v46, %s9521_s5  ;;  %2314 = vrot.lane.b32.xlu1 %v7676_v5, %s9521_s5 }
 0x3eb   :  { %2296 = vrot.lane.b32.xlu0 %v7670_v20, %s9558_s2  ;;  %2294 = vrot.lane.b32.xlu1 %v7668_v36, %s9558_s2 }
 0x3ef   :  { %2300 = vrot.lane.b32.xlu0 %v7678_v46, %s9558_s2  ;;  %2298 = vrot.lane.b32.xlu1 %v7676_v5, %s9558_s2  ;;  %s5920_s2 = smov 9  }
 0x3f3   :  { %2280 = vrot.lane.b32.xlu0 %v7670_v20, %s9559_s3  ;;  %2278 = vrot.lane.b32.xlu1 %v7668_v36, %s9559_s3 }
 0x3f7   :  { %2284 = vrot.lane.b32.xlu0 %v7678_v46, %s9559_s3  ;;  %2282 = vrot.lane.b32.xlu1 %v7676_v5, %s9559_s3  ;;  %s5921_s3 = smov 8  }
 0x3fb   :  { %2264 = vrot.lane.b32.xlu0 %v7670_v20, %s9560_s9  ;;  %2262 = vrot.lane.b32.xlu1 %v7668_v36, %s9560_s9 }
 0x3ff   :  { %2268 = vrot.lane.b32.xlu0 %v7678_v46, %s9560_s9  ;;  %2266 = vrot.lane.b32.xlu1 %v7676_v5, %s9560_s9 }
 0x403   :  { %2394 = vperm.xlu1 %5801, %v2391_v11  }
 0x41f   :  { %v4772_v1 = vpop.f32.mrf.mxu0  ;;  %v4807_v13 = vpop.f32.mrf.mxu1 }
 0x421   :  { %v4773_v35 = vpop.f32.mrf.mxu0  ;;  %v4808_v58 = vpop.f32.mrf.mxu1 }
 0x422   :  { %v4774_v43 = vadd.f32 %v4773_v35, %v4772_v1  ;;  %v4809_v61 = vadd.f32 %v4808_v58, %v4807_v13  ;;  %v1333_v1 = vld [vmem:[%s9532_s0 + $0x128] sm:$0xff]  ;;  %v1421_v13 = vld [vmem:[%s9532_s0 + $0x1a0] sm:$0xff]  ;;  %v1420_v58 = vld [vmem:[%s9532_s0 + $0x198] sm:$0xff] }
 0x423   :  { %v1332_v35 = vld [vmem:[%s9532_s0 + $0x120] sm:$0xff] }
 0x424   :  { %v7743_v24 = vadd.f32 %v4809_v61, %v4774_v43  ;;  %v1331_v43 = vld [vmem:[%s9532_s0 + $0x118] sm:$0xff]  ;;  %v1419_v61 = vld [vmem:[%s9532_s0 + $0x190] sm:$0xff] }
 0x426   :  { %5225 = vmatmul.mubr.f32.vlgmr.msra.gmra.mxu1 %v7743_v24  ;;  %v1186_v59 = vrot.slane %v7743_v24, 1 }
 0x427   :  { %5263 = vmatpush3.msra.mxu1 %v1432_v63  ;;  %5294 = vmatprep.mubr.msk.f32.mxu1 %vm5915_vm6, %v9511_v34 }
 0x428   :  { %5264 = vmatprep.subr.mxu1 %v9511_v34  ;;  %5190 = vmatmul.mubr.f32.vlgmr.msra.gmra.mxu0 %v1186_v59 }
 0x429   :  { %5228 = vmatpush3.msra.mxu0 %v1343_v28  ;;  %5265 = vmatpush3.msra.mxu1 %v1431_v42  ;;  %v1330_v28 = vld [vmem:[%s9532_s0 + $0x110] sm:$0xff]  ;;  %v1418_v42 = vld [vmem:[%s9532_s0 + $0x188] sm:$0xff] }
 0x42a   :  { %5229 = vmatprep.subr.mxu0 %v9511_v34  ;;  %5266 = vmatprep.subr.mxu1 %v9511_v34 }
 0x42b   :  { %5230 = vmatpush3.msra.mxu0 %v1342_v55  ;;  %5267 = vmatpush3.msra.mxu1 %v1430_v37  ;;  %v1329_v55 = vld [vmem:[%s9532_s0 + $0x108] sm:$0xff]  ;;  %v1417_v37 = vld [vmem:[%s9532_s0 + $0x180] sm:$0xff] }
 0x42c   :  { %5231 = vmatprep.subr.mxu0 %v9511_v34  ;;  %5268 = vmatprep.subr.mxu1 %v9511_v34 }
 0x42d   :  { %5232 = vmatpush3.msra.mxu0 %v1341_v15  ;;  %5269 = vmatpush3.msra.mxu1 %v1429_v39  ;;  %v1433_v15 = vrot.slane %v7743_v24, 3  ;;  %v1328_v39 = vld [vmem:[%s9532_s0 + $0x100] sm:$0xff] }
 0x42e   :  { %5233 = vmatprep.subr.mxu0 %v9511_v34  ;;  %5270 = vmatprep.subr.mxu1 %v9511_v34 }
 0x42f   :  { %5234 = vmatpush3.msra.mxu0 %v1340_v27  ;;  %5271 = vmatpush3.msra.mxu1 %v1428_v29  ;;  %v1610_v27 = vld [vmem:[%s9532_s0 + $0x2f8] sm:$0xff] }
 0x430   :  { %5235 = vmatprep.subr.mxu0 %v9511_v34  ;;  %5272 = vmatprep.subr.mxu1 %v9511_v34 }
 0x431   :  { %5236 = vmatpush3.msra.mxu0 %v1339_v22  ;;  %5273 = vmatpush3.msra.mxu1 %v1427_v4  ;;  %v1344_v4 = vrot.slane %v7743_v24, 2 }
 0x432   :  { %5237 = vmatprep.subr.mxu0 %v9511_v34  ;;  %5274 = vmatprep.subr.mxu1 %v9511_v34 }
 0x433   :  { %5238 = vmatpush3.msra.mxu0 %v1338_v32  ;;  %5275 = vmatpush3.msra.mxu1 %v1426_v30  ;;  %v1521_v32 = vld [vmem:[%s9532_s0 + $0x278] sm:$0xff]  ;;  %v1609_v30 = vld [vmem:[%s9532_s0 + $0x2f0] sm:$0xff] }
 0x434   :  { %5239 = vmatprep.subr.mxu0 %v9511_v34  ;;  %5276 = vmatprep.subr.mxu1 %v9511_v34 }
 0x435   :  { %5240 = vmatpush3.msra.mxu0 %v1337_v9  ;;  %5277 = vmatpush3.msra.mxu1 %v1425_v62  ;;  %v7829_v33 = vpop.permute.xlu0 %2376  ;;  %v7831_v11 = vpop.permute.xlu1 %2374  ;;  %v1520_v9 = vld [vmem:[%s9532_s0 + $0x270] sm:$0xff]  ;;  %v1608_v62 = vld [vmem:[%s9532_s0 + $0x2e8] sm:$0xff] }
 0x436   :  { %5241 = vmatprep.subr.mxu0 %v9511_v34  ;;  %5278 = vmatprep.subr.mxu1 %v9511_v34 }
 0x437   :  { %5242 = vmatpush3.msra.mxu0 %v1336_v41  ;;  %5279 = vmatpush3.msra.mxu1 %v1424_v50  ;;  %v1519_v41 = vld [vmem:[%s9532_s0 + $0x268] sm:$0xff] }
 0x438   :  { %5243 = vmatprep.subr.mxu0 %v9511_v34  ;;  %5280 = vmatprep.subr.mxu1 %v9511_v34 }
 0x439   :  { %5244 = vmatpush3.msra.mxu0 %v1335_v19  ;;  %5281 = vmatpush3.msra.mxu1 %v1423_v47  ;;  %v7857_v63 = vpop.permute.xlu0 %2380  ;;  %v7859_v59 = vpop.permute.xlu1 %2378  ;;  %v1607_v47 = vld [vmem:[%s9532_s0 + $0x2e0] sm:$0xff] }
 0x43a   :  { %5245 = vmatprep.subr.mxu0 %v9511_v34  ;;  %5282 = vmatprep.subr.mxu1 %v9511_v34  ;;  %v2382_v45 = vsel %vm375_vm2, %v7859_v59, %v7857_v63  ;;  %v2383_v38 = vsel %vm375_vm2, %v7829_v33, %v7859_v59 }
 0x43b   :  { %5246 = vmatpush3.msra.mxu0 %v1334_v2  ;;  %5283 = vmatpush3.msra.mxu1 %v1422_v54  ;;  %v1518_v2 = vld [vmem:[%s9532_s0 + $0x260] sm:$0xff]  ;;  %v1606_v54 = vld [vmem:[%s9532_s0 + $0x2d8] sm:$0xff] }
 0x43c   :  { %5247 = vmatprep.subr.mxu0 %v9511_v34  ;;  %5284 = vmatprep.subr.mxu1 %v9511_v34 }
 0x43d   :  { %5248 = vmatpush3.msra.mxu0 %v1333_v1  ;;  %5285 = vmatpush3.msra.mxu1 %v1421_v13  ;;  %v7886_v29 = vpop.permute.xlu0 %2360  ;;  %v7888_v22 = vpop.permute.xlu1 %2358  ;;  %v1517_v1 = vld [vmem:[%s9532_s0 + $0x258] sm:$0xff]  ;;  %v1605_v13 = vld [vmem:[%s9532_s0 + $0x2d0] sm:$0xff] }
 0x43e   :  { %5249 = vmatprep.subr.mxu0 %v9511_v34  ;;  %5286 = vmatprep.subr.mxu1 %v9511_v34 }
 0x43f   :  { %5250 = vmatpush3.msra.mxu0 %v1332_v35  ;;  %5287 = vmatpush3.msra.mxu1 %v1420_v58  ;;  %v1516_v35 = vld [vmem:[%s9532_s0 + $0x250] sm:$0xff] }
 0x440   :  { %5251 = vmatprep.subr.mxu0 %v9511_v34  ;;  %5288 = vmatprep.subr.mxu1 %v9511_v34 }
 0x441   :  { %5252 = vmatpush3.msra.mxu0 %v1331_v43  ;;  %5289 = vmatpush3.msra.mxu1 %v1419_v61  ;;  %v7913_v50 = vpop.permute.xlu0 %2364  ;;  %v7915_v19 = vpop.permute.xlu1 %2362  ;;  %v1604_v61 = vld [vmem:[%s9532_s0 + $0x2c8] sm:$0xff] }
 0x442   :  { %5253 = vmatprep.subr.mxu0 %v9511_v34  ;;  %5290 = vmatprep.subr.mxu1 %v9511_v34 }
 0x443   :  { %5254 = vmatpush3.msra.mxu0 %v1330_v28  ;;  %5291 = vmatpush3.msra.mxu1 %v1418_v42  ;;  %v1515_v28 = vld [vmem:[%s9532_s0 + $0x248] sm:$0xff]  ;;  %v1603_v42 = vld [vmem:[%s9532_s0 + $0x2c0] sm:$0xff] }
 0x444   :  { %5255 = vmatprep.subr.mxu0 %v9511_v34  ;;  %5292 = vmatprep.subr.mxu1 %v9511_v34 }
 0x445   :  { %5256 = vmatpush3.msra.mxu0 %v1329_v55  ;;  %5293 = vmatpush3.msra.mxu1 %v1417_v37  ;;  %v7941_v58 = vpop.permute.xlu0 %2344  ;;  %v7943_v43 = vpop.permute.xlu1 %2342  ;;  %v1514_v55 = vld [vmem:[%s9532_s0 + $0x240] sm:$0xff]  ;;  %v1602_v37 = vld [vmem:[%s9532_s0 + $0x2b8] sm:$0xff] }
 0x446   :  { %5257 = vmatprep.subr.mxu0 %v9511_v34  ;;  %5295 = vmatmul.mubr.f32.vlgmr.msra.gmra.mxu1 %v1433_v15  ;;  %v1513_v15 = vld [vmem:[%s9532_s0 + $0x238] sm:$0xff] }
 0x447   :  { %5332 = vmatprep.subr.mxu1 %v9511_v34  ;;  %5258 = vmatpush3.msra.mxu0 %v1328_v39 }
 0x448   :  { %5259 = vmatprep.mubr.msk.f32.mxu0 %vm5915_vm6, %v9511_v34  ;;  %5333 = vmatpush3.msra.mxu1 %v1610_v27 }
 0x449   :  { %5260 = vmatmul.mubr.f32.vlgmr.msra.gmra.mxu0 %v1344_v4  ;;  %5297 = vmatprep.subr.mxu0 %v9511_v34  ;;  %v7969_v39 = vpop.permute.xlu0 %2348  ;;  %v7971_v27 = vpop.permute.xlu1 %2346  ;;  %v1601_v4 = vld [vmem:[%s9532_s0 + $0x2b0] sm:$0xff] }
 0x44a   :  { %5334 = vmatprep.subr.mxu1 %v9511_v34  ;;  %5298 = vmatpush3.msra.mxu0 %v1521_v32  ;;  %v1512_v32 = vld [vmem:[%s9532_s0 + $0x230] sm:$0xff] }
 0x44b   :  { %5335 = vmatpush3.msra.mxu1 %v1609_v30  ;;  %5299 = vmatprep.subr.mxu0 %v9511_v34  ;;  %v1600_v30 = vld [vmem:[%s9532_s0 + $0x2a8] sm:$0xff] }
 0x44c   :  { %5336 = vmatprep.subr.mxu1 %v9511_v34  ;;  %5300 = vmatpush3.msra.mxu0 %v1520_v9  ;;  %v1511_v9 = vld [vmem:[%s9532_s0 + $0x228] sm:$0xff] }
 0x44d   :  { %5337 = vmatpush3.msra.mxu1 %v1608_v62  ;;  %5301 = vmatprep.subr.mxu0 %v9511_v34  ;;  %v1599_v62 = vld [vmem:[%s9532_s0 + $0x2a0] sm:$0xff] }
 0x44e   :  { %5338 = vmatprep.subr.mxu1 %v9511_v34  ;;  %5302 = vmatpush3.msra.mxu0 %v1519_v41  ;;  %v1510_v41 = vld [vmem:[%s9532_s0 + $0x220] sm:$0xff] }
 0x44f   :  { %5339 = vmatpush3.msra.mxu1 %v1607_v47  ;;  %5303 = vmatprep.subr.mxu0 %v9511_v34  ;;  %v7997_v47 = vpop.permute.xlu0 %2328 }
 0x450   :  { %5340 = vmatprep.subr.mxu1 %v9511_v34  ;;  %5304 = vmatpush3.msra.mxu0 %v1518_v2  ;;  %v7999_v2 = vpop.permute.xlu1 %2326 }
 0x451   :  { %5341 = vmatpush3.msra.mxu1 %v1606_v54  ;;  %5305 = vmatprep.subr.mxu0 %v9511_v34  ;;  %v1598_v54 = vld [vmem:[%s9532_s0 + $0x298] sm:$0xff] }
 0x452   :  { %5342 = vmatprep.subr.mxu1 %v9511_v34  ;;  %5306 = vmatpush3.msra.mxu0 %v1517_v1  ;;  %v1509_v1 = vld [vmem:[%s9532_s0 + $0x218] sm:$0xff] }
 0x453   :  { %5343 = vmatpush3.msra.mxu1 %v1605_v13  ;;  %5307 = vmatprep.subr.mxu0 %v9511_v34  ;;  %v1597_v13 = vld [vmem:[%s9532_s0 + $0x290] sm:$0xff] }
 0x454   :  { %5344 = vmatprep.subr.mxu1 %v9511_v34  ;;  %5308 = vmatpush3.msra.mxu0 %v1516_v35  ;;  %v1508_v35 = vld [vmem:[%s9532_s0 + $0x210] sm:$0xff] }
 0x455   :  { %5345 = vmatpush3.msra.mxu1 %v1604_v61  ;;  %5309 = vmatprep.subr.mxu0 %v9511_v34  ;;  %v1596_v61 = vld [vmem:[%s9532_s0 + $0x288] sm:$0xff] }
 0x456   :  { %5346 = vmatprep.subr.mxu1 %v9511_v34  ;;  %5310 = vmatpush3.msra.mxu0 %v1515_v28  ;;  %v1507_v28 = vld [vmem:[%s9532_s0 + $0x208] sm:$0xff] }
 0x457   :  { %5347 = vmatpush3.msra.mxu1 %v1603_v42  ;;  %5311 = vmatprep.subr.mxu0 %v9511_v34  ;;  %v8025_v42 = vpop.permute.xlu0 %2332 }
 0x458   :  { %5348 = vmatprep.subr.mxu1 %v9511_v34  ;;  %5312 = vmatpush3.msra.mxu0 %v1514_v55  ;;  %v8027_v55 = vpop.permute.xlu1 %2330 }
 0x459   :  { %5349 = vmatpush3.msra.mxu1 %v1602_v37  ;;  %5313 = vmatprep.subr.mxu0 %v9511_v34  ;;  %v1595_v37 = vld [vmem:[%s9532_s0 + $0x280] sm:$0xff] }
 0x45a   :  { %5350 = vmatprep.subr.mxu1 %v9511_v34  ;;  %5314 = vmatpush3.msra.mxu0 %v1513_v15  ;;  %v1611_v15 = vrot.slane %v7743_v24, 5 }
 0x45b   :  { %5351 = vmatpush3.msra.mxu1 %v1601_v4  ;;  %5315 = vmatprep.subr.mxu0 %v9511_v34  ;;  %v1506_v4 = vld [vmem:[%s9532_s0 + $0x200] sm:$0xff] }
 0x45c   :  { %5352 = vmatprep.subr.mxu1 %v9511_v34  ;;  %5316 = vmatpush3.msra.mxu0 %v1512_v32  ;;  %v1788_v32 = vld [vmem:[%s9532_s0 + $0x3f8] sm:$0xff] }
 0x45d   :  { %5353 = vmatpush3.msra.mxu1 %v1600_v30  ;;  %5317 = vmatprep.subr.mxu0 %v9511_v34  ;;  %v1522_v30 = vrot.slane %v7743_v24, 4 }
 0x45e   :  { %5354 = vmatprep.subr.mxu1 %v9511_v34  ;;  %5318 = vmatpush3.msra.mxu0 %v1511_v9  ;;  %v1699_v9 = vld [vmem:[%s9532_s0 + $0x378] sm:$0xff] }
 0x45f   :  { %5355 = vmatpush3.msra.mxu1 %v1599_v62  ;;  %5319 = vmatprep.subr.mxu0 %v9511_v34  ;;  %v8050_v62 = vpop.permute.xlu0 %2312 }
 0x460   :  { %5356 = vmatprep.subr.mxu1 %v9511_v34  ;;  %5320 = vmatpush3.msra.mxu0 %v1510_v41  ;;  %v8052_v41 = vpop.permute.xlu1 %2310 }
 0x461   :  { %5357 = vmatpush3.msra.mxu1 %v1598_v54  ;;  %5321 = vmatprep.subr.mxu0 %v9511_v34  ;;  %v1787_v54 = vld [vmem:[%s9532_s0 + $0x3f0] sm:$0xff] }
 0x462   :  { %5358 = vmatprep.subr.mxu1 %v9511_v34  ;;  %5322 = vmatpush3.msra.mxu0 %v1509_v1  ;;  %v1698_v1 = vld [vmem:[%s9532_s0 + $0x370] sm:$0xff] }
 0x463   :  { %5359 = vmatpush3.msra.mxu1 %v1597_v13  ;;  %5323 = vmatprep.subr.mxu0 %v9511_v34  ;;  %v1786_v13 = vld [vmem:[%s9532_s0 + $0x3e8] sm:$0xff] }
 0x464   :  { %5360 = vmatprep.subr.mxu1 %v9511_v34  ;;  %5324 = vmatpush3.msra.mxu0 %v1508_v35  ;;  %v1697_v35 = vld [vmem:[%s9532_s0 + $0x368] sm:$0xff] }
 0x465   :  { %5361 = vmatpush3.msra.mxu1 %v1596_v61  ;;  %5325 = vmatprep.subr.mxu0 %v9511_v34  ;;  %v1785_v61 = vld [vmem:[%s9532_s0 + $0x3e0] sm:$0xff] }
 0x466   :  { %5362 = vmatprep.subr.mxu1 %v9511_v34  ;;  %5326 = vmatpush3.msra.mxu0 %v1507_v28  ;;  %v1696_v28 = vld [vmem:[%s9532_s0 + $0x360] sm:$0xff] }
 0x467   :  { %5363 = vmatpush3.msra.mxu1 %v1595_v37  ;;  %5364 = vmatprep.mubr.msk.f32.mxu1 %vm5915_vm6, %v9511_v34  ;;  %v8079_v37 = vpop.permute.xlu0 %2316 }
 0x468   :  { %5327 = vmatprep.subr.mxu0 %v9511_v34  ;;  %5365 = vmatmul.mubr.f32.vlgmr.msra.gmra.mxu1 %v1611_v15  ;;  %v8081_v15 = vpop.permute.xlu1 %2314 }
 0x469   :  { %5402 = vmatprep.subr.mxu1 %v9511_v34  ;;  %5328 = vmatpush3.msra.mxu0 %v1506_v4  ;;  %v1784_v4 = vld [vmem:[%s9532_s0 + $0x3d8] sm:$0xff] }
 0x46a   :  { %5329 = vmatprep.mubr.msk.f32.mxu0 %vm5915_vm6, %v9511_v34  ;;  %5403 = vmatpush3.msra.mxu1 %v1788_v32  ;;  %v1695_v32 = vld [vmem:[%s9532_s0 + $0x358] sm:$0xff] }
 0x46b   :  { %5330 = vmatmul.mubr.f32.vlgmr.msra.gmra.mxu0 %v1522_v30  ;;  %5367 = vmatprep.subr.mxu0 %v9511_v34  ;;  %v1783_v30 = vld [vmem:[%s9532_s0 + $0x3d0] sm:$0xff] }
 0x46c   :  { %5404 = vmatprep.subr.mxu1 %v9511_v34  ;;  %5368 = vmatpush3.msra.mxu0 %v1699_v9  ;;  %v1694_v9 = vld [vmem:[%s9532_s0 + $0x350] sm:$0xff] }
 0x46d   :  { %5405 = vmatpush3.msra.mxu1 %v1787_v54  ;;  %5369 = vmatprep.subr.mxu0 %v9511_v34  ;;  %v1782_v54 = vld [vmem:[%s9532_s0 + $0x3c8] sm:$0xff] }
 0x46e   :  { %5406 = vmatprep.subr.mxu1 %v9511_v34  ;;  %5370 = vmatpush3.msra.mxu0 %v1698_v1  ;;  %v1693_v1 = vld [vmem:[%s9532_s0 + $0x348] sm:$0xff] }
 0x46f   :  { %5407 = vmatpush3.msra.mxu1 %v1786_v13  ;;  %5371 = vmatprep.subr.mxu0 %v9511_v34  ;;  %v8107_v13 = vpop.permute.xlu0 %2296 }
 0x470   :  { %5408 = vmatprep.subr.mxu1 %v9511_v34  ;;  %5372 = vmatpush3.msra.mxu0 %v1697_v35  ;;  %v8109_v35 = vpop.permute.xlu1 %2294 }
 0x471   :  { %5409 = vmatpush3.msra.mxu1 %v1785_v61  ;;  %5373 = vmatprep.subr.mxu0 %v9511_v34  ;;  %v1781_v61 = vld [vmem:[%s9532_s0 + $0x3c0] sm:$0xff] }
 0x472   :  { %5410 = vmatprep.subr.mxu1 %v9511_v34  ;;  %5374 = vmatpush3.msra.mxu0 %v1696_v28  ;;  %v1692_v28 = vld [vmem:[%s9532_s0 + $0x340] sm:$0xff] }
 0x473   :  { %5411 = vmatpush3.msra.mxu1 %v1784_v4  ;;  %5375 = vmatprep.subr.mxu0 %v9511_v34  ;;  %v1780_v4 = vld [vmem:[%s9532_s0 + $0x3b8] sm:$0xff] }
 0x474   :  { %5412 = vmatprep.subr.mxu1 %v9511_v34  ;;  %5376 = vmatpush3.msra.mxu0 %v1695_v32  ;;  %v1691_v32 = vld [vmem:[%s9532_s0 + $0x338] sm:$0xff] }
 0x475   :  { %5413 = vmatpush3.msra.mxu1 %v1783_v30  ;;  %5377 = vmatprep.subr.mxu0 %v9511_v34  ;;  %v1779_v30 = vld [vmem:[%s9532_s0 + $0x3b0] sm:$0xff] }
 0x476   :  { %5414 = vmatprep.subr.mxu1 %v9511_v34  ;;  %5378 = vmatpush3.msra.mxu0 %v1694_v9  ;;  %v1690_v9 = vld [vmem:[%s9532_s0 + $0x330] sm:$0xff] }
 0x477   :  { %5415 = vmatpush3.msra.mxu1 %v1782_v54  ;;  %5379 = vmatprep.subr.mxu0 %v9511_v34  ;;  %v8135_v54 = vpop.permute.xlu0 %2300 }
 0x478   :  { %5416 = vmatprep.subr.mxu1 %v9511_v34  ;;  %5380 = vmatpush3.msra.mxu0 %v1693_v1  ;;  %v8137_v1 = vpop.permute.xlu1 %2298 }
 0x479   :  { %5417 = vmatpush3.msra.mxu1 %v1781_v61  ;;  %5381 = vmatprep.subr.mxu0 %v9511_v34  ;;  %v1778_v61 = vld [vmem:[%s9532_s0 + $0x3a8] sm:$0xff] }
 0x47a   :  { %5418 = vmatprep.subr.mxu1 %v9511_v34  ;;  %5382 = vmatpush3.msra.mxu0 %v1692_v28  ;;  %v1689_v28 = vld [vmem:[%s9532_s0 + $0x328] sm:$0xff] }
 0x47b   :  { %5419 = vmatpush3.msra.mxu1 %v1780_v4  ;;  %5383 = vmatprep.subr.mxu0 %v9511_v34  ;;  %v1777_v4 = vld [vmem:[%s9532_s0 + $0x3a0] sm:$0xff] }
 0x47c   :  { %5420 = vmatprep.subr.mxu1 %v9511_v34  ;;  %5384 = vmatpush3.msra.mxu0 %v1691_v32  ;;  %v1688_v32 = vld [vmem:[%s9532_s0 + $0x320] sm:$0xff]  ;;  %v8165_v52 = vpop.permute.xlu1 %2278 }
 0x47d   :  { %5421 = vmatpush3.msra.mxu1 %v1779_v30  ;;  %5385 = vmatprep.subr.mxu0 %v9511_v34  ;;  %v1776_v30 = vld [vmem:[%s9532_s0 + $0x398] sm:$0xff] }
 0x47e   :  { %5422 = vmatprep.subr.mxu1 %v9511_v34  ;;  %5386 = vmatpush3.msra.mxu0 %v1690_v9  ;;  %v1687_v9 = vld [vmem:[%s9532_s0 + $0x318] sm:$0xff] }
 0x47f   :  { %5423 = vmatpush3.msra.mxu1 %v1778_v61  ;;  %5387 = vmatprep.subr.mxu0 %v9511_v34  ;;  %v8163_v61 = vpop.permute.xlu0 %2280 }
 0x480   :  { %5424 = vmatprep.subr.mxu1 %v9511_v34  ;;  %5388 = vmatpush3.msra.mxu0 %v1689_v28  ;;  %v1775_v28 = vld [vmem:[%s9532_s0 + $0x390] sm:$0xff] }
 0x481   :  { %5425 = vmatpush3.msra.mxu1 %v1777_v4  ;;  %5389 = vmatprep.subr.mxu0 %v9511_v34  ;;  %v1686_v4 = vld [vmem:[%s9532_s0 + $0x310] sm:$0xff] }
 0x482   :  { %5426 = vmatprep.subr.mxu1 %v9511_v34  ;;  %5390 = vmatpush3.msra.mxu0 %v1688_v32  ;;  %v2384_v32 = vsel %vm375_vm2, %v7831_v11, %v7829_v33  ;;  %v2369_v33 = vsel %vm358_vm15, %v7913_v50, %v7888_v22 }
 0x483   :  { %5427 = vmatpush3.msra.mxu1 %v1776_v30  ;;  %5391 = vmatprep.subr.mxu0 %v9511_v34  ;;  %v2385_v30 = vsel %vm375_vm2, %v7857_v63, %v7831_v11  ;;  %v1773_v11 = vld [vmem:[%s9532_s0 + $0x380] sm:$0xff]  ;;  %v2386_v63 = vmul.f32 %v9554_v23, %v2384_v32  ;;  %v8214_v59 = vpop.permute.xlu0 %2284  ;;  %v2388_v32 = vmul.f32 %v9556_v12, %v2382_v45  ;;  %v1700_v12 = vrot.slane %v7743_v24, 6  ;;  %vm9563_vm2 = vmmov %vm9545_vm0 }
 0x484   :  { %5428 = vmatprep.subr.mxu1 %v9511_v34  ;;  %5392 = vmatpush3.msra.mxu0 %v1687_v9  ;;  %v1685_v9 = vld [vmem:[%s9532_s0 + $0x308] sm:$0xff]  ;;  %v2389_v14 = vmul.f32 %v9557_v26, %v2385_v30  ;;  %v1684_v23 = vld [vmem:[%s9532_s0 + $0x300] sm:$0xff]  ;;  %v2387_v26 = vmul.f32 %v9555_v3, %v2383_v38  ;;  %v2352_v38 = vsel %vm341_vm13, %v7943_v43, %v7941_v58 }
 0x485   :  { %5429 = vmatpush3.msra.mxu1 %v1775_v28  ;;  %5393 = vmatprep.subr.mxu0 %v9511_v34  ;;  %v2368_v28 = vsel %vm358_vm15, %v7888_v22, %v7886_v29  ;;  %v2367_v22 = vsel %vm358_vm15, %v7886_v29, %v7915_v19  ;;  %v2373_v45 = vmul.f32 %v9553_v7, %v2369_v33 }
 0x486   :  { %5430 = vmatprep.subr.mxu1 %v9511_v34  ;;  %5394 = vmatpush3.msra.mxu0 %v1686_v4  ;;  %v8216_v4 = vpop.permute.xlu1 %2282  ;;  %v2370_v30 = vmul.f32 %v9481_v48, %v2368_v28  ;;  %v2353_v48 = vsel %vm341_vm13, %v7969_v39, %v7943_v43  ;;  %v2351_v3 = vsel %vm341_vm13, %v7941_v58, %v7971_v27 }
 0x487   :  { %5431 = vmatpush3.msra.mxu1 %v1774_v21  ;;  %5395 = vmatprep.subr.mxu0 %v9511_v34  ;;  %v1789_v21 = vrot.slane %v7743_v24, 7  ;;  %v2371_v29 = vmul.f32 %v6527_v40, %v2367_v22  ;;  %v2350_v7 = vsel %vm341_vm13, %v7971_v27, %v7969_v39  ;;  %v2354_v24 = vmul.f32 %v9476_v56, %v2352_v38  ;;  %v2265_v39 = vpop.permute.xlu0 %2264  ;;  %vm9562_vm13 = vmmov %vm9545_vm0  ;;  %v2390_v38 = vld [vmem:[%s9585_s4] sm:$0xff]  ;;  %s5919_s4 = smov 7  }
 0x488   :  { %5432 = vmatprep.subr.mxu1 %v9511_v34  ;;  %5396 = vmatpush3.msra.mxu0 %v1685_v9  ;;  %v2366_v9 = vsel %vm358_vm15, %v7915_v19, %v7913_v50  ;;  %v2337_v50 = vsel %vm324_vm10, %v8025_v42, %v7999_v2  ;;  %v2335_v40 = vsel %vm324_vm10, %v7997_v47, %v8027_v55  ;;  %vm9569_vm0 = vcmp.lt.s32.totalorder %v6189_v31, 16 }
 0x489   :  { %5433 = vmatpush3.msra.mxu1 %v1773_v11  ;;  %5434 = vmatprep.mubr.msk.f32.mxu1 %vm5915_vm6, %v9511_v34  ;;  %v2357_v19 = vmul.f32 %v9551_v10, %v2353_v48  ;;  %v2355_v58 = vmul.f32 %v9477_v53, %v2351_v3  ;;  %v2334_v43 = vsel %vm324_vm10, %v8027_v55, %v8025_v42  ;;  %vm9570_vm4 = vmmov %vm9569_vm0  ;;  %v9587_v3 = vld [vmem:[#allocation6_spill] sm:$0xff] }
 0x48a   :  { %5397 = vmatprep.subr.mxu0 %v9511_v34  ;;  %5435 = vmatmul.mubr.f32.vlgmr.msra.gmra.mxu1 %v1789_v21  ;;  %v2356_v56 = vmul.f32 %v9550_v49, %v2350_v7  ;;  %v2336_v27 = vsel %vm324_vm10, %v7999_v2, %v7997_v47  ;;  %v2341_v10 = vmul.f32 %v9482_v60, %v2337_v50  ;;  %vm9571_vm9 = vmmov %vm9569_vm0  ;;  %v5834_v7 = vld [vmem:[%s9510_s25 + $0x1f8] sm:$0xff] }
 0x48b   :  { %2485 = vmatprep.subr.mxu1 %v2389_v14  ;;  %5398 = vmatpush3.msra.mxu0 %v1684_v23  ;;  %v2372_v14 = vmul.f32 %v9552_v51, %v2366_v9  ;;  %v2263_v51 = vpop.permute.xlu1 %2262  ;;  %v2339_v53 = vmul.f32 %v6451_v8, %v2335_v40  ;;  %v2320_v42 = vsel %vm9562_vm13, %v8052_v41, %v8050_v62  ;;  %v2269_v11 = vpop.permute.xlu0 %2268  ;;  %vm9573_vm7 = vmmov %vm9569_vm0  ;;  %vm9574_vm13 = vcmp.lt.s32.totalorder %v6189_v31, 17  ;;  %v5835_v50 = vld [vmem:[%s9510_s25 + $0x78] sm:$0xff]  ;;  %v5838_v40 = vld [vmem:[%s9510_s25 + $0x1f0] sm:$0xff] }
 0x48c   :  { %5399 = vmatprep.mubr.msk.f32.mxu0 %vm5915_vm6, %v9511_v34  ;;  %2486 = vmatpush1.msra.mxu1 %v2388_v32  ;;  %v2321_v49 = vsel %vm9563_vm2, %v8079_v37, %v8052_v41  ;;  %v2340_v47 = vmul.f32 %v9480_v25, %v2334_v43  ;;  %v2318_v60 = vsel %vm9564_vm14, %v8081_v15, %v8079_v37  ;;  %vm9577_vm2 = vmmov %vm9574_vm13  ;;  %v9583_v32 = vld [vmem:[#allocation7_spill] sm:$0xff] }
 0x48d   :  { %5400 = vmatmul.mubr.f32.vlgmr.msra.gmra.mxu0 %v1700_v12  ;;  %2414 = vmatprep.subr.mxu0 %v2387_v26  ;;  %v2319_v8 = vsel %vm9565_vm12, %v8050_v62, %v8081_v15  ;;  %v2338_v2 = vmul.f32 %v6439_v6, %v2336_v27  ;;  %v2304_v55 = vsel %vm9566_vm8, %v8109_v35, %v8107_v13  ;;  %vm9580_vm14 = vmmov %vm9577_vm2  ;;  %v5841_v43 = vld [vmem:[%s9510_s25 + $0xe8] sm:$0xff]  ;;  %v5845_v27 = vld [vmem:[%s9510_s25 + $0xe0] sm:$0xff] }
 0x48e   :  { %2487 = vmatprep.subr.mxu1 %v2373_v45  ;;  %2415 = vmatpush1.msra.mxu0 %v2386_v63  ;;  %v2323_v25 = vmul.f32 %v6404_v17, %v2320_v42  ;;  %v2322_v41 = vmul.f32 %v6423_v16, %v2321_v49  ;;  %v2302_v62 = vsel %vm9542_vm3, %v8137_v1, %v8135_v54  ;;  %vm9582_vm12 = vmmov %vm9577_vm2  ;;  %v9586_v45 = vld [vmem:[#allocation10_spill] sm:$0xff]  ;;  %v5849_v49 = vld [vmem:[%s9510_s25 + $0xd8] sm:$0xff] }
 0x48f   :  { %2488 = vmatpush1.msra.mxu1 %v2372_v14  ;;  %2416 = vmatprep.subr.mxu0 %v2371_v29  ;;  %v2324_v6 = vmul.f32 %v6418_v44, %v2319_v8  ;;  %v2325_v37 = vmul.f32 %v6428_v57, %v2318_v60  ;;  %v2303_v15 = vsel %vm9567_vm5, %v8107_v13, %v8137_v1  ;;  %v2267_v17 = vpop.permute.xlu1 %2266  ;;  %v9572_v13 = vld [vmem:[#allocation14_spill] sm:$0xff]  ;;  %v9576_v1 = vld [vmem:[#allocation9_spill] sm:$0xff] }
 0x490   :  { %2489 = vmatprep.subr.mxu1 %v2357_v19  ;;  %2417 = vmatpush1.msra.mxu0 %v2370_v30  ;;  %v2307_v16 = vmul.f32 %v6376_v0, %v2304_v55  ;;  %v2305_v28 = vsel %vm9568_vm11, %v8135_v54, %v8109_v35  ;;  %v2286_v44 = vsel %vm9569_vm0, %v8216_v4, %v8214_v59  ;;  %v9584_v30 = vld [vmem:[#allocation13_spill] sm:$0xff]  ;;  %v5839_v19 = vld [vmem:[%s9510_s25 + $0x70] sm:$0xff]  ;;  %v5848_v42 = vld [vmem:[%s9510_s25 + $0x160] sm:$0xff] }
 0x491   :  { %2490 = vmatpush1.msra.mxu1 %v2356_v56  ;;  %2418 = vmatprep.subr.mxu0 %v2355_v58  ;;  %v2309_v57 = vmul.f32 %v6399_v18, %v2302_v62  ;;  %v2288_v0 = vsel %vm9570_vm4, %v8165_v52, %v8163_v61  ;;  %v2308_v35 = vmul.f32 %v9572_v13, %v2303_v15  ;;  %v5833_v29 = vld [vmem:[%s9510_s25 + $0xf8] sm:$0xff]  ;;  %v5840_v58 = vld [vmem:[%s9510_s25 + $0x170] sm:$0xff]  ;;  %v5844_v56 = vld [vmem:[%s9510_s25 + $0x168] sm:$0xff] }
 0x492   :  { %2491 = vmatprep.subr.mxu1 %v2341_v10  ;;  %2419 = vmatpush1.msra.mxu0 %v2354_v24  ;;  %v2289_v18 = vsel %vm9573_vm7, %v8214_v59, %v8165_v52  ;;  %v2293_v63 = vmul.f32 %v9576_v1, %v2286_v44  ;;  %v2272_v52 = vsel %vm9580_vm14, %v2263_v51, %v2265_v39  ;;  %v9581_v59 = vld [vmem:[#allocation8_spill] sm:$0xff]  ;;  %v5836_v14 = vld [vmem:[%s9510_s25 + $0x178] sm:$0xff]  ;;  %v5846_v10 = vld [vmem:[%s9510_s25 + $0x1e0] sm:$0xff]  ;;  %vm4355_vm7 = vcmask 523264  }
 0x493   :  { %2492 = vmatpush1.msra.mxu1 %v2340_v47  ;;  %2420 = vmatprep.subr.mxu0 %v2339_v53  ;;  %v2290_v23 = vmul.f32 %v9581_v59, %v2289_v18  ;;  %v2273_v26 = vsel %vm9582_vm12, %v2269_v11, %v2263_v51  ;;  %v2275_v48 = vmul.f32 %v9586_v45, %v2272_v52  ;;  %v5837_v24 = vld [vmem:[%s9510_s25 + $0xf0] sm:$0xff]  ;;  %v5843_v51 = vld [vmem:[%s9510_s25 + $0x68] sm:$0xff]  ;;  %v5847_v53 = vld [vmem:[%s9510_s25 + $0x60] sm:$0xff] }
 0x494   :  { %2493 = vmatprep.subr.mxu1 %v7678_v46  ;;  %2421 = vmatpush1.msra.mxu0 %v2338_v2  ;;  %v2287_v46 = vsel %vm9571_vm9, %v8163_v61, %v8216_v4  ;;  %v2271_v61 = vsel %vm9577_vm2, %v2265_v39, %v2267_v17  ;;  %v9579_v4 = vld [vmem:[#allocation12_spill] sm:$0xff]  ;;  %v2274_v12 = vmul.f32 %v9587_v3, %v2273_v26  ;;  %v5842_v39 = vld [vmem:[%s9510_s25 + $0x1e8] sm:$0xff]  ;;  %v5850_v47 = vld [vmem:[%s9510_s25 + $0x1d8] sm:$0xff]  ;;  %vm3100_vm9 = vcmask 261120  }
 0x495   :  { %2494 = vmatpush1.msra.mxu1 %v7676_v5  ;;  %2422 = vmatprep.subr.mxu0 %v7670_v20  ;;  %v2270_v20 = vsel %vm9574_vm13, %v2267_v17, %v2269_v11  ;;  %v9575_v5 = vld [vmem:[#allocation15_spill] sm:$0xff]  ;;  %v2292_v21 = vmul.f32 %v9579_v4, %v2287_v46  ;;  %v2276_v9 = vmul.f32 %v9584_v30, %v2271_v61  ;;  %v5851_v60 = vld [vmem:[%s9510_s25 + $0x58] sm:$0xff]  ;;  %v5853_v2 = vld [vmem:[%s9510_s25 + $0xd0] sm:$0xff] }
 0x496   :  { %2495 = vmatprep.subr.mxu1 %v2325_v37  ;;  %2423 = vmatpush1.msra.mxu0 %v7668_v36  ;;  %v2306_v54 = vmul.f32 %v9575_v5, %v2305_v28  ;;  %v9578_v36 = vld [vmem:[#allocation11_spill] sm:$0xff]  ;;  %v2277_v22 = vmul.f32 %v9583_v32, %v2270_v20  ;;  %v5852_v8 = vld [vmem:[%s9510_s25 + $0x158] sm:$0xff]  ;;  %v5854_v55 = vld [vmem:[%s9510_s25 + $0x1d0] sm:$0xff] }
 0x497   :  { %2496 = vmatpush1.msra.mxu1 %v2324_v6  ;;  %2424 = vmatprep.subr.mxu0 %v2323_v25  ;;  %v2291_v33 = vmul.f32 %v9578_v36, %v2288_v0  ;;  %v5855_v25 = vld [vmem:[%s9510_s25 + $0x50] sm:$0xff]  ;;  %v5857_v62 = vld [vmem:[%s9510_s25 + $0xc8] sm:$0xff]  ;;  %v5861_v11 = vld [vmem:[%s9510_s25 + $0xc0] sm:$0xff] }
 0x498   :  { %2497 = vmatprep.subr.mxu1 %v2309_v57  ;;  %2425 = vmatpush1.msra.mxu0 %v2322_v41  ;;  %v5856_v41 = vld [vmem:[%s9510_s25 + $0x150] sm:$0xff]  ;;  %v5858_v6 = vld [vmem:[%s9510_s25 + $0x1c8] sm:$0xff]  ;;  %v5862_v17 = vld [vmem:[%s9510_s25 + $0x1c0] sm:$0xff] }
 0x499   :  { %2498 = vmatpush1.msra.mxu1 %v2308_v35  ;;  %2426 = vmatprep.subr.mxu0 %v2307_v16  ;;  %v5859_v37 = vld [vmem:[%s9510_s25 + $0x48] sm:$0xff]  ;;  %v5863_v16 = vld [vmem:[%s9510_s25 + $0x40] sm:$0xff]  ;;  %v5865_v44 = vld [vmem:[%s9510_s25 + $0xb8] sm:$0xff] }
 0x49a   :  { %2499 = vmatprep.subr.mxu1 %v2293_v63  ;;  %2427 = vmatpush1.msra.mxu0 %v2306_v54  ;;  %v5860_v15 = vld [vmem:[%s9510_s25 + $0x148] sm:$0xff]  ;;  %v5864_v28 = vld [vmem:[%s9510_s25 + $0x140] sm:$0xff]  ;;  %v5866_v57 = vld [vmem:[%s9510_s25 + $0x1b8] sm:$0xff] }
 0x49b   :  { %2500 = vmatpush1.msra.mxu1 %v2292_v21  ;;  %2428 = vmatprep.subr.mxu0 %v2291_v33  ;;  %v5867_v0 = vld [vmem:[%s9510_s25 + $0x38] sm:$0xff]  ;;  %v5869_v13 = vld [vmem:[%s9510_s25 + $0xb0] sm:$0xff]  ;;  %v5873_v5 = vld [vmem:[%s9510_s25 + $0xa8] sm:$0xff] }
 0x49c   :  { %2501 = vmatprep.subr.mxu1 %v2277_v22  ;;  %2429 = vmatpush1.msra.mxu0 %v2290_v23  ;;  %v5868_v46 = vld [vmem:[%s9510_s25 + $0x138] sm:$0xff]  ;;  %v5870_v35 = vld [vmem:[%s9510_s25 + $0x1b0] sm:$0xff]  ;;  %v5874_v54 = vld [vmem:[%s9510_s25 + $0x1a8] sm:$0xff] }
 0x49d   :  { %2502 = vmatpush1.msra.mxu1 %v2276_v9  ;;  %2535 = vmatprep.mubr.f32.mxu1 %v9511_v34  ;;  %v5871_v18 = vld [vmem:[%s9510_s25 + $0x30] sm:$0xff]  ;;  %v5875_v1 = vld [vmem:[%s9510_s25 + $0x28] sm:$0xff]  ;;  %v5877_v61 = vld [vmem:[%s9510_s25 + $0xa0] sm:$0xff] }
 0x49e   :  { %2430 = vmatprep.subr.mxu0 %v2275_v48  ;;  %4715 = vmatmul.mubr.msk.f32.vlgmr.msra.gmra.mxu1 %vm767_vm1, %v2390_v38  ;;  %v5872_v20 = vld [vmem:[%s9510_s25 + $0x130] sm:$0xff]  ;;  %v5876_v63 = vld [vmem:[%s9510_s25 + $0x128] sm:$0xff]  ;;  %v5878_v36 = vld [vmem:[%s9510_s25 + $0x1a0] sm:$0xff] }
 0x49f   :  { %2431 = vmatpush1.msra.mxu0 %v2274_v12  ;;  %2464 = vmatprep.mubr.f32.mxu0 %v9511_v34  ;;  %v5879_v33 = vld [vmem:[%s9510_s25 + $0x20] sm:$0xff]  ;;  %v5881_v21 = vld [vmem:[%s9510_s25 + $0x98] sm:$0xff]  ;;  %v5885_v26 = vld [vmem:[%s9510_s25 + $0x90] sm:$0xff] }
 0x4a0   :  { %4714 = vmatmul.mubr.msk.f32.vlgmr.msra.gmra.mxu0 %vm767_vm1, %v2390_v38  ;;  %4946 = vmatprep.subr.mxu0 %v5833_v29  ;;  %v5880_v4 = vld [vmem:[%s9510_s25 + $0x120] sm:$0xff]  ;;  %v5882_v52 = vld [vmem:[%s9510_s25 + $0x198] sm:$0xff]  ;;  %v5886_v32 = vld [vmem:[%s9510_s25 + $0x190] sm:$0xff] }
 0x4a1   :  { %4981 = vmatprep.subr.mxu1 %v5834_v7  ;;  %4947 = vmatpush3.msra.mxu0 %v5835_v50  ;;  %v5883_v59 = vld [vmem:[%s9510_s25 + $0x18] sm:$0xff]  ;;  %v5887_v22 = vld [vmem:[%s9510_s25 + $0x10] sm:$0xff]  ;;  %v5889_v9 = vld [vmem:[%s9510_s25 + $0x88] sm:$0xff] }
 0x4a2   :  { %4982 = vmatpush3.msra.mxu1 %v5836_v14  ;;  %4948 = vmatprep.subr.mxu0 %v5837_v24  ;;  %v5884_v23 = vld [vmem:[%s9510_s25 + $0x118] sm:$0xff]  ;;  %v5888_v30 = vld [vmem:[%s9510_s25 + $0x110] sm:$0xff]  ;;  %v5890_v38 = vld [vmem:[%s9510_s25 + $0x188] sm:$0xff] }
 0x4a3   :  { %4983 = vmatprep.subr.mxu1 %v5838_v40  ;;  %4949 = vmatpush3.msra.mxu0 %v5839_v19  ;;  %v5891_v45 = vld [vmem:[%s9510_s25 + $0x8] sm:$0xff]  ;;  %v5893_v3 = vld [vmem:[%s9510_s25 + $0x80] sm:$0xff] }
 0x4a4   :  { %4984 = vmatpush3.msra.mxu1 %v5840_v58  ;;  %4950 = vmatprep.subr.mxu0 %v5841_v43  ;;  %v5892_v48 = vld [vmem:[%s9510_s25 + $0x108] sm:$0xff]  ;;  %v5894_v12 = vld [vmem:[%s9510_s25 + $0x180] sm:$0xff] }
 0x4a5   :  { %4985 = vmatprep.subr.mxu1 %v5842_v39  ;;  %4951 = vmatpush3.msra.mxu0 %v5843_v51  ;;  %v5895_v29 = vld [vmem:[%s9510_s25] sm:$0xff] }
 0x4a6   :  { %4986 = vmatpush3.msra.mxu1 %v5844_v56  ;;  %4952 = vmatprep.subr.mxu0 %v5845_v27  ;;  %v5896_v7 = vld [vmem:[%s9510_s25 + $0x100] sm:$0xff]  ;;  %s5917_s25 = smov 119  }
 0x4a7   :  { %4987 = vmatprep.subr.mxu1 %v5846_v10  ;;  %4953 = vmatpush3.msra.mxu0 %v5847_v53 }
 0x4a8   :  { %4988 = vmatpush3.msra.mxu1 %v5848_v42  ;;  %4954 = vmatprep.subr.mxu0 %v5849_v49 }
 0x4a9   :  { %4989 = vmatprep.subr.mxu1 %v5850_v47  ;;  %4955 = vmatpush3.msra.mxu0 %v5851_v60 }
 0x4aa   :  { %4990 = vmatpush3.msra.mxu1 %v5852_v8  ;;  %4956 = vmatprep.subr.mxu0 %v5853_v2 }
 0x4ab   :  { %4991 = vmatprep.subr.mxu1 %v5854_v55  ;;  %4957 = vmatpush3.msra.mxu0 %v5855_v25 }
 0x4ac   :  { %4992 = vmatpush3.msra.mxu1 %v5856_v41  ;;  %4958 = vmatprep.subr.mxu0 %v5857_v62 }
 0x4ad   :  { %4993 = vmatprep.subr.mxu1 %v5858_v6  ;;  %4959 = vmatpush3.msra.mxu0 %v5859_v37  ;;  %v2395_v6 = vpop.permute.xlu1 %2394 }
 0x4ae   :  { %4994 = vmatpush3.msra.mxu1 %v5860_v15  ;;  %4960 = vmatprep.subr.mxu0 %v5861_v11 }
 0x4af   :  { %4995 = vmatprep.subr.mxu1 %v5862_v17  ;;  %4961 = vmatpush3.msra.mxu0 %v5863_v16 }
 0x4b0   :  { %4996 = vmatpush3.msra.mxu1 %v5864_v28  ;;  %4962 = vmatprep.subr.mxu0 %v5865_v44 }
 0x4b1   :  { %4997 = vmatprep.subr.mxu1 %v5866_v57  ;;  %4963 = vmatpush3.msra.mxu0 %v5867_v0 }
 0x4b2   :  { %4998 = vmatpush3.msra.mxu1 %v5868_v46  ;;  %4964 = vmatprep.subr.mxu0 %v5869_v13 }
 0x4b3   :  { %4999 = vmatprep.subr.mxu1 %v5870_v35  ;;  %4965 = vmatpush3.msra.mxu0 %v5871_v18 }
 0x4b4   :  { %5000 = vmatpush3.msra.mxu1 %v5872_v20  ;;  %4966 = vmatprep.subr.mxu0 %v5873_v5 }
 0x4b5   :  { %5001 = vmatprep.subr.mxu1 %v5874_v54  ;;  %4967 = vmatpush3.msra.mxu0 %v5875_v1 }
 0x4b6   :  { %5002 = vmatpush3.msra.mxu1 %v5876_v63  ;;  %4968 = vmatprep.subr.mxu0 %v5877_v61 }
 0x4b7   :  { %5003 = vmatprep.subr.mxu1 %v5878_v36  ;;  %4969 = vmatpush3.msra.mxu0 %v5879_v33 }
 0x4b8   :  { %5004 = vmatpush3.msra.mxu1 %v5880_v4  ;;  %4970 = vmatprep.subr.mxu0 %v5881_v21 }
 0x4b9   :  { %5005 = vmatprep.subr.mxu1 %v5882_v52  ;;  %4971 = vmatpush3.msra.mxu0 %v5883_v59 }
 0x4ba   :  { %5006 = vmatpush3.msra.mxu1 %v5884_v23  ;;  %4972 = vmatprep.subr.mxu0 %v5885_v26 }
 0x4bb   :  { %5007 = vmatprep.subr.mxu1 %v5886_v32  ;;  %4973 = vmatpush3.msra.mxu0 %v5887_v22 }
 0x4bc   :  { %5008 = vmatpush3.msra.mxu1 %v5888_v30  ;;  %4974 = vmatprep.subr.mxu0 %v5889_v9 }
 0x4bd   :  { %5009 = vmatprep.subr.mxu1 %v5890_v38  ;;  %4975 = vmatpush3.msra.mxu0 %v5891_v45 }
 0x4be   :  { %5010 = vmatpush3.msra.mxu1 %v5892_v48  ;;  %4976 = vmatprep.subr.mxu0 %v5893_v3 }
 0x4bf   :  { %5011 = vmatprep.subr.mxu1 %v5894_v12  ;;  %4977 = vmatpush3.msra.mxu0 %v5895_v29 }
 0x4c0   :  { %5012 = vmatpush3.msra.mxu1 %v5896_v7 }
 0x4c1   :  { %2910 = vmatprep.subr.mxu1 %v9511_v34 }
 0x4e6   :  { %v1324_v50 = vpop.f32.mrf.mxu1 }
 0x4e8   :  { %v1254_v14 = vpop.f32.mrf.mxu0  ;;  %v5226_v24 = vpop.f32.mrf.mxu1 }
 0x4e9   :  { %v1325_v40 = vadd.f32 %v1324_v50, %v1254_v14 }
 0x4ea   :  { %v5191_v19 = vpop.f32.mrf.mxu0 }
 0x506   :  { %v1501_v58 = vpop.f32.mrf.mxu1 }
 0x508   :  { %v5296_v43 = vpop.f32.mrf.mxu1 }
 0x509   :  { %v1412_v39 = vpop.f32.mrf.mxu0 }
 0x50a   :  { %v1416_v51 = vadd.f32 %v1412_v39, %v1325_v40 }
 0x50b   :  { %v5261_v56 = vpop.f32.mrf.mxu0 }
 0x50c   :  { %v1505_v27 = vadd.f32 %v1501_v58, %v1416_v51 }
 0x528   :  { %v1679_v10 = vpop.f32.mrf.mxu1 }
 0x52a   :  { %v5366_v53 = vpop.f32.mrf.mxu1 }
 0x52b   :  { %v1590_v42 = vpop.f32.mrf.mxu0 }
 0x52c   :  { %v1594_v49 = vadd.f32 %v1590_v42, %v1505_v27  ;;  %v2742_v42 = vld [vmem:[%s9264_s12] sm:$0xff] }
 0x52d   :  { %v5331_v47 = vpop.f32.mrf.mxu0 }
 0x52e   :  { %v1683_v60 = vadd.f32 %v1679_v10, %v1594_v49  ;;  %v2744_v49 = vld [vmem:[%s9265_s13] sm:$0xff]  ;;  %v2745_v47 = vld [vmem:[%s9265_s13 + $0x8] sm:$0xff] }
 0x54a   :  { %v1857_v8 = vpop.f32.mrf.mxu1 }
 0x54c   :  { %v5436_v2 = vpop.f32.mrf.mxu1 }
 0x54d   :  { %v1768_v55 = vpop.f32.mrf.mxu0  ;;  %v199_v2 = vand.u32 7, %v6189_v31 }
 0x54e   :  { %v1772_v25 = vadd.f32 %v1768_v55, %v1683_v60  ;;  %v200_v60 = vshra.s32 %v6189_v31, 3 }
 0x54f   :  { %v5401_v41 = vpop.f32.mrf.mxu0  ;;  %vm8607_vm3 = vcmp.ne.s32.totalorder %v199_v2, 0 }
 0x550   :  { %v8559_v62 = vadd.f32 %v1857_v8, %v1772_v25  ;;  %v201_v8 = vand.u32 7, %v200_v60 }
 0x552   :  { %vm202_vm11 = vcmp.ne.s32.totalorder %v201_v8, 0 }
 0x553   :  { %vm206_vm4 = vmand %vm202_vm11, %vm8607_vm3 }
 0x55e   :  { %v2537_v37 = vpop.f32.mrf.mxu1 }
 0x55f   :  { %v2538_v15 = vadd.f32 %v2537_v37, %v2395_v6 }
 0x560   :  { %v2466_v11 = vpop.f32.mrf.mxu0  ;;  %v2539_v17 = vpop.f32.mrf.mxu1 }
 0x561   :  { %v2467_v16 = vadd.f32 %v2466_v11, %v2395_v6  ;;  %v2540_v28 = vadd.f32 %v2539_v17, %v2395_v6  ;;  %v2544_v57 = vmax.f32 %v2538_v15, 0.0 }
 0x562   :  { %v2468_v44 = vpop.f32.mrf.mxu0 }
 0x563   :  { %v2545_v0 = vmax.f32 %v2540_v28, 0.0  ;;  %v2469_v46 = vadd.f32 %v2468_v44, %v2395_v6  ;;  %v2542_v13 = vmax.f32 %v2467_v16, 0.0 }
 0x565   :  { %v5807_v35 = vpack.i.bf16 %v2545_v0, %v2544_v57  ;;  %v2543_v18 = vmax.f32 %v2469_v46, 0.0 }
 0x567   :  { %v5802_v20 = vpack.i.bf16 %v2543_v18, %v2542_v13  ;;  %5808 = vrot.lane.b32.xlu1 %v5807_v35, %s9523_s8 }
 0x569   :  { %5803 = vrot.lane.b32.xlu0 %v5802_v20, %s9523_s8 }
 0x5d9   :  { %v5809_v5 = vpop.permute.xlu1 %5808 }
 0x5da   :  { %v5811_v54 = vunpack.i.h.bf16 %v5809_v5  ;;  %v5810_v1 = vunpack.i.l.bf16 %v5809_v5  ;;  %v8648_v5 = vsel %vm202_vm11, 1.0, %v9511_v34 }
 0x5db   :  { %v5804_v63 = vpop.permute.xlu0 %5803 }
 0x5dc   :  { %v2554_v61 = vsel %vm324_vm10, %v5810_v1, %v5811_v54  ;;  %v5806_v36 = vunpack.i.h.bf16 %v5804_v63  ;;  %v5805_v33 = vunpack.i.l.bf16 %v5804_v63  ;;  %v8652_v63 = vsel %vm206_vm4, 1.0, %v9511_v34 }
 0x5dd   :  { %v2560_v59 = vmax.f32 %v2544_v57, %v2554_v61 }
 0x5de   :  { %v2555_v4 = vsel %vm324_vm10, %v5806_v36, %v5810_v1  ;;  %v2556_v21 = vsel %vm324_vm10, %v5805_v33, %v5806_v36  ;;  %v2557_v52 = vsel %vm324_vm10, %v5811_v54, %v5805_v33  ;;  %vm203_vm10 = vcmp.ne.s32.totalorder %v201_v8, 7 }
 0x5df   :  { %v2559_v23 = vmax.f32 %v2543_v18, %v2555_v4  ;;  %v2558_v26 = vmax.f32 %v2542_v13, %v2556_v21  ;;  %v2561_v32 = vmax.f32 %v2545_v0, %v2557_v52  ;;  %vm218_vm5 = vmand %vm203_vm10, %vm8607_vm3  ;;  %v8617_v31 = vsel %vm203_vm10, 1.0, %v9511_v34  ;;  %v2743_v4 = vld [vmem:[%s9264_s12 + $0x8] sm:$0xff] }
 0x5e0   :  { %v8621_v11 = vsel %vm218_vm5, 1.0, %v9511_v34  ;;  %v8637_v13 = vsel %vm8607_vm3, 1.0, %v9511_v34 }
 0x5e1   :  { %v5817_v22 = vpack.i.bf16 %v2561_v32, %v2560_v59  ;;  %v5812_v30 = vpack.i.bf16 %v2559_v23, %v2558_v26 }
 0x5e3   :  { %5818 = vrot.lane.b32.xlu1 %v5817_v22, %s5911_s10  ;;  %5813 = vrot.lane.b32.xlu0 %v5812_v30, %s5911_s10  ;;  %s5916_s10 = smov 120  }
 0x655   :  { %v5819_v9 = vpop.permute.xlu1 %5818  ;;  %v5814_v38 = vpop.permute.xlu0 %5813 }
 0x656   :  { %v5821_v45 = vunpack.i.h.bf16 %v5819_v9  ;;  %v5820_v48 = vunpack.i.l.bf16 %v5819_v9  ;;  %v5816_v3 = vunpack.i.h.bf16 %v5814_v38  ;;  %v5815_v12 = vunpack.i.l.bf16 %v5814_v38  ;;  %v2888_v9 = vld [vmem:[%s9266_s14 + $0x8] sm:$0xff]  ;;  %v2891_v38 = vld [vmem:[%s9267_s15] sm:$0xff] }
 0x658   :  { %v2570_v29 = vsel %vm358_vm15, %v5820_v48, %v5821_v45  ;;  %v2572_v7 = vsel %vm358_vm15, %v5815_v12, %v5816_v3  ;;  %v2571_v50 = vsel %vm358_vm15, %v5816_v3, %v5820_v48  ;;  %v2573_v14 = vsel %vm358_vm15, %v5821_v45, %v5815_v12  ;;  %v2892_v45 = vld [vmem:[%s9267_s15 + $0x8] sm:$0xff] }
 0x659   :  { %v2576_v24 = vmax.f32 %v2560_v59, %v2570_v29  ;;  %v2574_v40 = vmax.f32 %v2558_v26, %v2572_v7  ;;  %v2575_v19 = vmax.f32 %v2559_v23, %v2571_v50  ;;  %v2577_v58 = vmax.f32 %v2561_v32, %v2573_v14 }
 0x65a   :  { %vm8601_vm15 = vcmp.ne.s32.totalorder %v199_v2, 7 }
 0x65b   :  { %2642 = vmatprep.mubr.f32.mxu0 %v2575_v19  ;;  %2712 = vmatprep.mubr.f32.mxu1 %v2577_v58  ;;  %vm223_vm8 = vmand %vm203_vm10, %vm8601_vm15  ;;  %v8627_v16 = vsel %vm8601_vm15, 1.0, %v9511_v34 }
 0x65c   :  { %2643 = vmatmul.mubr.f32.vlgmr.msra.gmra.mxu0 %v2574_v40  ;;  %2713 = vmatmul.mubr.f32.vlgmr.msra.gmra.mxu1 %v2576_v24  ;;  %v8612_v41 = vsel %vm223_vm8, 1.0, %v9511_v34  ;;  %vm211_vm0 = vmand %vm202_vm11, %vm8601_vm15 }
 0x65d   :  { %5455 = vmatprep.mubr.msk.f32.mxu0 %vm767_vm1, %v2742_v42  ;;  %v8640_v18 = vsel %vm211_vm0, 1.0, %v9511_v34 }
 0x71c   :  { %v4978_v43 = vpop.f32.mrf.mxu0  ;;  %v5013_v39 = vpop.f32.mrf.mxu1 }
 0x71e   :  { %v4979_v51 = vpop.f32.mrf.mxu0  ;;  %v5014_v56 = vpop.f32.mrf.mxu1 }
 0x71f   :  { %v4980_v27 = vadd.f32 %v4979_v51, %v4978_v43  ;;  %v5015_v10 = vadd.f32 %v5014_v56, %v5013_v39 }
 0x721   :  { %v2715_v53 = vadd.f32 %v5015_v10, %v4980_v27 }
 0x723   :  { %2736 = vrot.lane.b32.xlu1 %v2715_v53, %s5916_s10  ;;  %2739 = vrot.lane.b32.xlu0 %v2715_v53, %s5917_s25 }
 0x727   :  { %2730 = vrot.lane.b32.xlu1 %v2715_v53, %s9523_s8  ;;  %2733 = vrot.lane.b32.xlu0 %v2715_v53, %s5918_s11 }
 0x72b   :  { %2724 = vrot.lane.b32.xlu1 %v2715_v53, %s5919_s4  ;;  %2727 = vrot.lane.b32.xlu0 %v2715_v53, %s9521_s5 }
 0x72f   :  { %2718 = vrot.lane.b32.xlu1 %v2715_v53, %s5920_s2  ;;  %2721 = vrot.lane.b32.xlu0 %v2715_v53, %s5921_s3 }
 0x733   :  { %2748 = vperm.xlu1 %5801, %v2744_v49   ;;  %2753 = vperm.xlu0 %5822, %v2745_v47  }
 0x795   :  { %v2737_v6 = vpop.permute.xlu1 %2736  ;;  %v2740_v37 = vpop.permute.xlu0 %2739 }
 0x796   :  { %v2741_v15 = vmul.f32 %v8612_v41, %v2740_v37  ;;  %v2738_v17 = vmul.f32 %v8617_v31, %v2737_v6 }
 0x798   :  { %5437 = vmatprep.subr.mxu0 %v2741_v15 }
 0x799   :  { %v2731_v28 = vpop.permute.xlu1 %2730  ;;  %5438 = vmatpush3.msra.mxu0 %v2741_v15  ;;  %v2734_v44 = vpop.permute.xlu0 %2733 }
 0x79a   :  { %v2735_v57 = vmul.f32 %v8621_v11, %v2734_v44  ;;  %5439 = vmatprep.subr.mxu0 %v2738_v17  ;;  %v2732_v0 = vmul.f32 %v8627_v16, %v2731_v28  ;;  %v2890_v28 = vld [vmem:[%s9266_s14 + $0x18] sm:$0xff] }
 0x79b   :  { %5440 = vmatpush3.msra.mxu0 %v2738_v17 }
 0x79c   :  { %5441 = vmatprep.subr.mxu0 %v2735_v57 }
 0x79d   :  { %v2725_v46 = vpop.permute.xlu1 %2724  ;;  %5442 = vmatpush3.msra.mxu0 %v2735_v57  ;;  %v2728_v35 = vpop.permute.xlu0 %2727 }
 0x79e   :  { %5443 = vmatprep.subr.mxu0 %v2732_v0  ;;  %v2729_v20 = vmul.f32 %v8637_v13, %v2728_v35  ;;  %v2726_v1 = vmul.f32 %v8640_v18, %v2725_v46 }
 0x79f   :  { %5444 = vmatpush3.msra.mxu0 %v2732_v0 }
 0x7a0   :  { %5445 = vmatprep.subr.mxu0 %v2715_v53 }
 0x7a1   :  { %5446 = vmatpush3.msra.mxu0 %v2715_v53  ;;  %v2722_v54 = vpop.permute.xlu0 %2721  ;;  %v2719_v61 = vpop.permute.xlu1 %2718 }
 0x7a2   :  { %5447 = vmatprep.subr.mxu0 %v2729_v20  ;;  %v2723_v36 = vmul.f32 %v8648_v5, %v2722_v54  ;;  %v2720_v33 = vmul.f32 %v8652_v63, %v2719_v61  ;;  %v3012_v61 = vld [vmem:[%s9268_s26 + $0x68] sm:$0xff] }
 0x7a3   :  { %5448 = vmatpush3.msra.mxu0 %v2729_v20  ;;  %v3014_v20 = vld [vmem:[%s9268_s26 + $0x78] sm:$0xff] }
 0x7a4   :  { %5449 = vmatprep.subr.mxu0 %v2726_v1 }
 0x7a5   :  { %5450 = vmatpush3.msra.mxu0 %v2726_v1 }
 0x7a6   :  { %5451 = vmatprep.subr.mxu0 %v2723_v36 }
 0x7a7   :  { %5452 = vmatpush3.msra.mxu0 %v2723_v36 }
 0x7a8   :  { %5453 = vmatprep.subr.mxu0 %v2720_v33 }
 0x7a9   :  { %5454 = vmatpush3.msra.mxu0 %v2720_v33  ;;  %v3011_v33 = vld [vmem:[%s9268_s26 + $0x60] sm:$0xff] }
 0x7aa   :  { %5456 = vmatmul.mubr.msk.f32.vlgmr.msra.gmra.mxu0 %vm767_vm1, %v2743_v4  ;;  %vm2903_vm1 = vcmask 130048   ;;  %5458 = vmatprep.subr.mxu0 %v3014_v20  ;;  %v3010_v4 = vld [vmem:[%s9268_s26 + $0x58] sm:$0xff] }
 0x7ab   :  { %4718 = vmatprep.mubr.msk.f32.mxu1 %vm2903_vm1, %v2888_v9  ;;  %5459 = vmatpush3.msra.mxu0 %v3014_v20  ;;  %v3001_v9 = vld [vmem:[%s9268_s26 + $0x10] sm:$0xff]  ;;  %v3482_v20 = vld [vmem:[%s9269_s16 + $0xb8] sm:$0xff] }
 0x7ae   :  { %v2754_v21 = vpop.permute.xlu0 %2753  ;;  %v2749_v23 = vpop.permute.xlu1 %2748 }
 0x86a   :  { %v5457_v52 = vpop.f32.mrf.mxu0 }
 0x86b   :  { %v2834_v59 = vadd.f32 %v5457_v52, %v2754_v21  ;;  %v3009_v21 = vld [vmem:[%s9268_s26 + $0x50] sm:$0xff]  ;;  %v3008_v52 = vld [vmem:[%s9268_s26 + $0x48] sm:$0xff] }
 0x86c   :  { %v2828_v26 = vpop.f32.mrf.mxu0 }
 0x86d   :  { %v2838_v32 = vmax.f32 %v2834_v59, 0.0  ;;  %v2829_v22 = vadd.f32 %v2828_v26, %v2749_v23  ;;  %v3007_v59 = vld [vmem:[%s9268_s26 + $0x40] sm:$0xff]  ;;  %v3006_v23 = vld [vmem:[%s9268_s26 + $0x38] sm:$0xff]  ;;  %v3005_v26 = vld [vmem:[%s9268_s26 + $0x30] sm:$0xff] }
 0x86f   :  { %v2837_v30 = vmax.f32 %v2829_v22, 0.0  ;;  %2877 = vrot.lane.b32.xlu1 %v2838_v32, %s5916_s10  ;;  %v3003_v22 = vld [vmem:[%s9268_s26 + $0x20] sm:$0xff] }
 0x871   :  { %2875 = vrot.lane.b32.xlu0 %v2837_v30, %s5916_s10 }
 0x873   :  { %2871 = vrot.lane.b32.xlu1 %v2838_v32, %s5918_s11 }
 0x875   :  { %2869 = vrot.lane.b32.xlu0 %v2837_v30, %s5918_s11 }
 0x877   :  { %2865 = vrot.lane.b32.xlu1 %v2838_v32, %s9523_s8 }
 0x879   :  { %2863 = vrot.lane.b32.xlu0 %v2837_v30, %s9523_s8 }
 0x87b   :  { %2859 = vrot.lane.b32.xlu1 %v2838_v32, %s9521_s5 }
 0x87d   :  { %2857 = vrot.lane.b32.xlu0 %v2837_v30, %s9521_s5 }
 0x87f   :  { %2853 = vrot.lane.b32.xlu1 %v2838_v32, %s5919_s4 }
 0x881   :  { %2851 = vrot.lane.b32.xlu0 %v2837_v30, %s5919_s4 }
 0x883   :  { %2847 = vrot.lane.b32.xlu1 %v2838_v32, %s5921_s3 }
 0x885   :  { %2845 = vrot.lane.b32.xlu0 %v2837_v30, %s5921_s3 }
 0x887   :  { %2841 = vrot.lane.b32.xlu1 %v2838_v32, %s5920_s2 }
 0x889   :  { %2839 = vrot.lane.b32.xlu0 %v2837_v30, %s5920_s2 }
 0x88b   :  { %2883 = vrot.lane.b32.xlu1 %v2838_v32, %s5917_s25 }
 0x88d   :  { %2881 = vrot.lane.b32.xlu0 %v2837_v30, %s5917_s25 }
 0x88f   :  { %2895 = vperm.xlu1 %5801, %v2891_v38   ;;  %v3000_v38 = vld [vmem:[%s9268_s26 + $0x8] sm:$0xff] }
 0x891   :  { %2900 = vperm.xlu0 %5822, %v2892_v45   ;;  %v2999_v45 = vld [vmem:[%s9268_s26] sm:$0xff] }
 0x8e1   :  { %v2878_v48 = vpop.permute.xlu1 %2877 }
 0x8e2   :  { %v2880_v3 = vmul.f32 %v8617_v31, %v2878_v48 }
 0x8e3   :  { %v2876_v12 = vpop.permute.xlu0 %2875 }
 0x8e4   :  { %v2879_v29 = vmul.f32 %v8617_v31, %v2876_v12  ;;  %2911 = vmatpush1.msra.mxu1 %v2880_v3  ;;  %v3097_v3 = vld [vmem:[%s9269_s16 + $0x38] sm:$0xff] }
 0x8e5   :  { %2912 = vmatprep.subr.mxu1 %v9511_v34  ;;  %v2872_v7 = vpop.permute.xlu1 %2871 }
 0x8e6   :  { %v2874_v50 = vmul.f32 %v8621_v11, %v2872_v7  ;;  %2913 = vmatpush1.msra.mxu1 %v2879_v29  ;;  %v3096_v7 = vld [vmem:[%s9269_s16 + $0x30] sm:$0xff] }
 0x8e7   :  { %2914 = vmatprep.subr.mxu1 %v9511_v34  ;;  %v2870_v14 = vpop.permute.xlu0 %2869 }
 0x8e8   :  { %v2873_v24 = vmul.f32 %v8621_v11, %v2870_v14  ;;  %2915 = vmatpush1.msra.mxu1 %v2874_v50 }
 0x8e9   :  { %v2866_v40 = vpop.permute.xlu1 %2865  ;;  %2916 = vmatprep.subr.mxu1 %v9511_v34 }
 0x8ea   :  { %v2868_v19 = vmul.f32 %v8627_v16, %v2866_v40  ;;  %2917 = vmatpush1.msra.mxu1 %v2873_v24 }
 0x8eb   :  { %2918 = vmatprep.subr.mxu1 %v9511_v34  ;;  %v2864_v58 = vpop.permute.xlu0 %2863 }
 0x8ec   :  { %v2867_v43 = vmul.f32 %v8627_v16, %v2864_v58  ;;  %2919 = vmatpush1.msra.mxu1 %v2868_v19  ;;  %v2887_v16 = vld [vmem:[%s9266_s14] sm:$0xff] }
 0x8ed   :  { %v2860_v39 = vpop.permute.xlu1 %2859  ;;  %2920 = vmatprep.subr.mxu1 %v9511_v34 }
 0x8ee   :  { %2921 = vmatpush1.msra.mxu1 %v2867_v43  ;;  %v2862_v27 = vmul.f32 %v8637_v13, %v2860_v39 }
 0x8ef   :  { %2922 = vmatprep.subr.mxu1 %v9511_v34  ;;  %v2858_v51 = vpop.permute.xlu0 %2857 }
 0x8f0   :  { %2923 = vmatpush1.msra.mxu1 %v2838_v32  ;;  %v2861_v53 = vmul.f32 %v8637_v13, %v2858_v51  ;;  %v3004_v32 = vld [vmem:[%s9268_s26 + $0x28] sm:$0xff]  ;;  %v3248_v51 = vld [vmem:[%s9269_s16 + $0x58] sm:$0xff] }
 0x8f1   :  { %v2854_v56 = vpop.permute.xlu1 %2853  ;;  %2924 = vmatprep.subr.mxu1 %v9511_v34 }
 0x8f2   :  { %2925 = vmatpush1.msra.mxu1 %v2837_v30  ;;  %v2856_v49 = vmul.f32 %v8640_v18, %v2854_v56  ;;  %v3002_v30 = vld [vmem:[%s9268_s26 + $0x18] sm:$0xff]  ;;  %v3247_v56 = vld [vmem:[%s9269_s16 + $0x50] sm:$0xff] }
 0x8f3   :  { %2926 = vmatprep.subr.mxu1 %v9511_v34  ;;  %v2852_v10 = vpop.permute.xlu0 %2851 }
 0x8f4   :  { %2927 = vmatpush1.msra.mxu1 %v2862_v27  ;;  %v2855_v60 = vmul.f32 %v8640_v18, %v2852_v10  ;;  %v3095_v27 = vld [vmem:[%s9269_s16 + $0x28] sm:$0xff] }
 0x8f5   :  { %v2848_v42 = vpop.permute.xlu1 %2847  ;;  %2928 = vmatprep.subr.mxu1 %v9511_v34  ;;  %v3246_v10 = vld [vmem:[%s9269_s16 + $0x48] sm:$0xff] }
 0x8f6   :  { %2929 = vmatpush1.msra.mxu1 %v2861_v53  ;;  %v2850_v2 = vmul.f32 %v8648_v5, %v2848_v42  ;;  %v3094_v53 = vld [vmem:[%s9269_s16 + $0x20] sm:$0xff] }
 0x8f7   :  { %2930 = vmatprep.subr.mxu1 %v9511_v34  ;;  %v2846_v47 = vpop.permute.xlu0 %2845  ;;  %v3245_v42 = vld [vmem:[%s9269_s16 + $0x40] sm:$0xff] }
 0x8f8   :  { %2931 = vmatpush1.msra.mxu1 %v2856_v49  ;;  %v2849_v25 = vmul.f32 %v8648_v5, %v2846_v47  ;;  %v3013_v5 = vld [vmem:[%s9268_s26 + $0x70] sm:$0xff] }
 0x8f9   :  { %v2842_v8 = vpop.permute.xlu1 %2841  ;;  %2932 = vmatprep.subr.mxu1 %v9511_v34  ;;  %5460 = vmatprep.subr.mxu0 %v3013_v5 }
 0x8fa   :  { %2933 = vmatpush1.msra.mxu1 %v2855_v60  ;;  %v2844_v31 = vmul.f32 %v8652_v63, %v2842_v8  ;;  %5461 = vmatpush3.msra.mxu0 %v3013_v5  ;;  %v3093_v8 = vld [vmem:[%s9269_s16 + $0x18] sm:$0xff] }
 0x8fb   :  { %2934 = vmatprep.subr.mxu1 %v9511_v34  ;;  %v2840_v55 = vpop.permute.xlu0 %2839  ;;  %5462 = vmatprep.subr.mxu0 %v3012_v61  ;;  %v3716_v5 = vld [vmem:[%s9269_s16 + $0x118] sm:$0xff] }
 0x8fc   :  { %2935 = vmatpush1.msra.mxu1 %v2850_v2  ;;  %v2843_v37 = vmul.f32 %v8652_v63, %v2840_v55  ;;  %5463 = vmatpush3.msra.mxu0 %v3012_v61  ;;  %v3404_v55 = vld [vmem:[%s9269_s16 + $0x98] sm:$0xff]  ;;  %v3714_v61 = vld [vmem:[%s9269_s16 + $0x108] sm:$0xff] }
 0x8fd   :  { %2936 = vmatprep.subr.mxu1 %v9511_v34  ;;  %v2884_v6 = vpop.permute.xlu1 %2883  ;;  %5464 = vmatprep.subr.mxu0 %v3011_v33 }
 0x8fe   :  { %2937 = vmatpush1.msra.mxu1 %v2849_v25  ;;  %v2886_v11 = vmul.f32 %v8612_v41, %v2884_v6  ;;  %5465 = vmatpush3.msra.mxu0 %v3011_v33  ;;  %v3092_v25 = vld [vmem:[%s9269_s16 + $0x10] sm:$0xff]  ;;  %v3091_v6 = vld [vmem:[%s9269_s16 + $0x8] sm:$0xff]  ;;  %v3713_v33 = vld [vmem:[%s9269_s16 + $0x100] sm:$0xff] }
 0x8ff   :  { %2938 = vmatprep.subr.mxu1 %v9511_v34  ;;  %v2882_v15 = vpop.permute.xlu0 %2881  ;;  %5466 = vmatprep.subr.mxu0 %v3010_v4 }
 0x900   :  { %2939 = vmatpush1.msra.mxu1 %v2844_v31  ;;  %v2885_v17 = vmul.f32 %v8612_v41, %v2882_v15  ;;  %v2889_v41 = vld [vmem:[%s9266_s14 + $0x10] sm:$0xff]  ;;  %5467 = vmatpush3.msra.mxu0 %v3010_v4  ;;  %v3090_v15 = vld [vmem:[%s9269_s16] sm:$0xff] }
 0x901   :  { %2940 = vmatprep.subr.mxu1 %v9511_v34  ;;  %5468 = vmatprep.subr.mxu0 %v3009_v21  ;;  %v3403_v31 = vld [vmem:[%s9269_s16 + $0x90] sm:$0xff] }
 0x902   :  { %2941 = vmatpush1.msra.mxu1 %v2843_v37  ;;  %5469 = vmatpush3.msra.mxu0 %v3009_v21  ;;  %v3402_v37 = vld [vmem:[%s9269_s16 + $0x88] sm:$0xff]  ;;  %v3638_v21 = vld [vmem:[%s9269_s16 + $0xf8] sm:$0xff] }
 0x903   :  { %2970 = vmatprep.subr.mxu1 %v9511_v34  ;;  %5470 = vmatprep.subr.mxu0 %v3008_v52 }
 0x904   :  { %2971 = vmatpush2.msra.mxu1 %v2886_v11  ;;  %5471 = vmatpush3.msra.mxu0 %v3008_v52  ;;  %v3401_v11 = vld [vmem:[%s9269_s16 + $0x80] sm:$0xff]  ;;  %v3872_v52 = vld [vmem:[%s9269_s16 + $0x158] sm:$0xff] }
 0x905   :  { %2972 = vmatprep.subr.mxu1 %v9511_v34  ;;  %5472 = vmatprep.subr.mxu0 %v3007_v59 }
 0x906   :  { %2973 = vmatpush2.msra.mxu1 %v2885_v17  ;;  %5473 = vmatpush3.msra.mxu0 %v3007_v59  ;;  %v3637_v59 = vld [vmem:[%s9269_s16 + $0xf0] sm:$0xff] }
 0x907   :  { %2975 = vmatmul.mubr.f32.vlgmr.msra.gmra.mxu1 %v2887_v16  ;;  %5493 = vmatprep.subr.mxu1 %v9511_v34  ;;  %v3326_v16 = vld [vmem:[%s9269_s16 + $0x78] sm:$0xff] }
 0x908   :  { %4719 = vmatprep.mubr.msk.f32.mxu1 %vm2903_vm1, %v2890_v28  ;;  %5474 = vmatprep.subr.mxu0 %v3006_v23  ;;  %v3560_v28 = vld [vmem:[%s9269_s16 + $0xd8] sm:$0xff] }
 0x909   :  { %5475 = vmatpush3.msra.mxu0 %v3006_v23  ;;  %5494 = vmatpush3.msra.mxu1 %v3097_v3  ;;  %v3871_v23 = vld [vmem:[%s9269_s16 + $0x150] sm:$0xff] }
 0x90a   :  { %v2896_v57 = vpop.permute.xlu1 %2895  ;;  %5476 = vmatprep.subr.mxu0 %v3005_v26  ;;  %5495 = vmatprep.subr.mxu1 %v9511_v34  ;;  %v3793_v3 = vld [vmem:[%s9269_s16 + $0x130] sm:$0xff] }
 0x90b   :  { %2980 = vmatmul.mubr.f32.gmra.mxu1 %v2889_v41  ;;  %5477 = vmatpush3.msra.mxu0 %v3005_v26  ;;  %v3325_v41 = vld [vmem:[%s9269_s16 + $0x70] sm:$0xff]  ;;  %v3636_v26 = vld [vmem:[%s9269_s16 + $0xe8] sm:$0xff] }
 0x90c   :  { %5501 = vmatprep.mubr.msk.f32.mxu1 %vm5915_vm6, %v9511_v34  ;;  %v2901_v13 = vpop.permute.xlu0 %2900  ;;  %5478 = vmatprep.subr.mxu0 %v3004_v32 }
 0x90d   :  { %5479 = vmatpush3.msra.mxu0 %v3004_v32  ;;  %5496 = vmatpush3.msra.mxu1 %v3096_v7  ;;  %v3870_v32 = vld [vmem:[%s9269_s16 + $0x148] sm:$0xff] }
 0x90e   :  { %5480 = vmatprep.subr.mxu0 %v3003_v22  ;;  %5497 = vmatprep.subr.mxu1 %v9511_v34  ;;  %v4026_v7 = vld [vmem:[%s9269_s16 + $0x188] sm:$0xff] }
 0x90f   :  { %5481 = vmatpush3.msra.mxu0 %v3003_v22  ;;  %5498 = vmatpush3.msra.mxu1 %v3095_v27  ;;  %v3635_v22 = vld [vmem:[%s9269_s16 + $0xe0] sm:$0xff] }
 0x910   :  { %5482 = vmatprep.subr.mxu0 %v3002_v30  ;;  %5499 = vmatprep.subr.mxu1 %v9511_v34  ;;  %v3947_v27 = vld [vmem:[%s9269_s16 + $0x160] sm:$0xff] }
 0x911   :  { %5483 = vmatpush3.msra.mxu0 %v3002_v30  ;;  %5500 = vmatpush3.msra.mxu1 %v3094_v53  ;;  %v3869_v30 = vld [vmem:[%s9269_s16 + $0x140] sm:$0xff] }
 0x912   :  { %5484 = vmatprep.subr.mxu0 %v3001_v9  ;;  %5504 = vmatprep.subr.mxu1 %v9511_v34 }
 0x913   :  { %5485 = vmatpush3.msra.mxu0 %v3001_v9 }
 0x914   :  { %5486 = vmatprep.subr.mxu0 %v3000_v38 }
 0x915   :  { %5487 = vmatpush3.msra.mxu0 %v3000_v38 }
 0x916   :  { %5488 = vmatprep.subr.mxu0 %v2999_v45 }
 0x917   :  { %5489 = vmatpush3.msra.mxu0 %v2999_v45  ;;  %v3794_v45 = vld [vmem:[%s9269_s16 + $0x138] sm:$0xff] }
 0x918   :  { %5515 = vmatprep.subr.mxu0 %v9511_v34 }
 0x9c7   :  { %v2976_v44 = vpop.f32.mrf.mxu1 }
 0x9c8   :  { %v8732_v46 = vadd.f32 %v2976_v44, %v2896_v57  ;;  %v3559_v44 = vld [vmem:[%s9269_s16 + $0xd0] sm:$0xff]  ;;  %v3324_v57 = vld [vmem:[%s9269_s16 + $0x68] sm:$0xff] }
 0x9c9   :  { %v2978_v0 = vpop.f32.mrf.mxu1 }
 0x9ca   :  { %v2985_v1 = vmax.f32 %v8732_v46, 0.0  ;;  %v3558_v0 = vld [vmem:[%s9269_s16 + $0xc8] sm:$0xff]  ;;  %v3323_v46 = vld [vmem:[%s9269_s16 + $0x60] sm:$0xff] }
 0x9cb   :  { %v2981_v35 = vpop.f32.mrf.mxu1 }
 0x9cc   :  { %v8734_v18 = vadd.f32 %v2981_v35, %v2901_v13  ;;  %v3557_v13 = vld [vmem:[%s9269_s16 + $0xc0] sm:$0xff] }
 0x9cd   :  { %v2983_v54 = vpop.f32.mrf.mxu1 }
 0x9ce   :  { %v2986_v63 = vmax.f32 %v8734_v18, 0.0  ;;  %v3481_v54 = vld [vmem:[%s9269_s16 + $0xb0] sm:$0xff] }
 0x9d0   :  { %v5823_v36 = vpack.i.bf16 %v2986_v63, %v2985_v1 }
 0x9d2   :  { %5824 = vrot.lane.b32.xlu1 %v5823_v36, %s9523_s8  ;;  %v3479_v36 = vld [vmem:[%s9269_s16 + $0xa0] sm:$0xff] }
 0xa44   :  { %v5825_v48 = vpop.permute.xlu1 %5824 }
 0xa45   :  { %v5827_v12 = vunpack.i.h.bf16 %v5825_v48  ;;  %v5826_v29 = vunpack.i.l.bf16 %v5825_v48  ;;  %v4028_v48 = vld [vmem:[%s9269_s16 + $0x198] sm:$0xff] }
 0xa47   :  { %v2992_v50 = vmax.f32 %v2986_v63, %v5827_v12  ;;  %v2991_v14 = vmax.f32 %v2985_v1, %v5826_v29  ;;  %v3715_v1 = vld [vmem:[%s9269_s16 + $0x110] sm:$0xff]  ;;  %v3480_v63 = vld [vmem:[%s9269_s16 + $0xa8] sm:$0xff] }
 0xa48   :  { %v4027_v12 = vld [vmem:[%s9269_s16 + $0x190] sm:$0xff]  ;;  %v3792_v29 = vld [vmem:[%s9269_s16 + $0x128] sm:$0xff] }
 0xa49   :  { %v5828_v24 = vpack.i.bf16 %v2992_v50, %v2991_v14 }
 0xa4b   :  { %5829 = vrot.lane.b32.xlu0 %v5828_v24, %s5916_s10 }
 0xabd   :  { %v5830_v40 = vpop.permute.xlu0 %5829 }
 0xabe   :  { %v5832_v19 = vunpack.i.h.bf16 %v5830_v40  ;;  %v5831_v58 = vunpack.i.l.bf16 %v5830_v40 }
 0xac0   :  { %v2998_v43 = vmax.f32 %v2992_v50, %v5832_v19  ;;  %v2997_v39 = vmax.f32 %v2991_v14, %v5831_v58  ;;  %v3791_v50 = vld [vmem:[%s9269_s16 + $0x120] sm:$0xff]  ;;  %v3950_v19 = vld [vmem:[%s9269_s16 + $0x178] sm:$0xff] }
 0xac1   :  { %v4025_v14 = vld [vmem:[%s9269_s16 + $0x180] sm:$0xff]  ;;  %v4184_v58 = vld [vmem:[%s9269_s16 + $0x1d8] sm:$0xff] }
 0xac2   :  { %5490 = vmatprep.mubr.f32.mxu0 %v2997_v39  ;;  %v4183_v39 = vld [vmem:[%s9269_s16 + $0x1d0] sm:$0xff] }
 0xac3   :  { %5491 = vmatmul.mubr.f32.vlgmr.msra.gmra.mxu0 %v2998_v43  ;;  %v3949_v43 = vld [vmem:[%s9269_s16 + $0x170] sm:$0xff] }
 0xac4   :  { %5516 = vmatpush3.msra.mxu0 %v3248_v51  ;;  %5523 = vmatprep.mubr.msk.f32.mxu0 %vm5915_vm6, %v9511_v34  ;;  %v3948_v51 = vld [vmem:[%s9269_s16 + $0x168] sm:$0xff] }
 0xac5   :  { %5517 = vmatprep.subr.mxu0 %v9511_v34 }
 0xac6   :  { %5518 = vmatpush3.msra.mxu0 %v3247_v56  ;;  %v4182_v56 = vld [vmem:[%s9269_s16 + $0x1c8] sm:$0xff] }
 0xac7   :  { %5519 = vmatprep.subr.mxu0 %v9511_v34 }
 0xac8   :  { %5520 = vmatpush3.msra.mxu0 %v3246_v10  ;;  %v4181_v10 = vld [vmem:[%s9269_s16 + $0x1c0] sm:$0xff] }
 0xac9   :  { %5521 = vmatprep.subr.mxu0 %v9511_v34 }
 0xaca   :  { %5522 = vmatpush3.msra.mxu0 %v3245_v42  ;;  %v4106_v42 = vld [vmem:[%s9269_s16 + $0x1b8] sm:$0xff] }
 0xacb   :  { %5537 = vmatprep.subr.mxu0 %v9511_v34 }
 0xb83   :  { %v8823_v49 = vpop.f32.mrf.mxu0 }
 0xb84   :  { %v3873_v38 = vrot.slane %v8823_v49, 2  ;;  %v3795_v24 = vrot.slane %v8823_v49, 1  ;;  %v4029_v40 = vrot.slane %v8823_v49, 4  ;;  %v3951_v53 = vrot.slane %v8823_v49, 3 }
 0xb85   :  { %v8825_v47 = vpop.f32.mrf.mxu0 }
 0xb86   :  { %v3099_v60 = vrot.slane %v8825_v47, 1  ;;  %v3249_v2 = vrot.slane %v8825_v47, 2  ;;  %v3405_v17 = vrot.slane %v8825_v47, 4  ;;  %v3327_v35 = vrot.slane %v8825_v47, 3 }
 0xb87   :  { %v3561_v18 = vrot.slane %v8825_v47, 6  ;;  %v3483_v4 = vrot.slane %v8825_v47, 5  ;;  %v3639_v9 = vrot.slane %v8825_v47, 7 }
 0xb88   :  { %5502 = vmatmul.mubr.msk.f32.vlgmr.msra.gmra.mxu1 %vm3100_vm9, %v3099_v60  ;;  %5524 = vmatmul.mubr.msk.f32.vlgmr.msra.gmra.mxu0 %vm3100_vm9, %v3249_v2  ;;  %v4105_v60 = vld [vmem:[%s9269_s16 + $0x1b0] sm:$0xff]  ;;  %v4103_v2 = vld [vmem:[%s9269_s16 + $0x1a0] sm:$0xff] }
 0xb89   :  { %5505 = vmatpush3.msra.mxu1 %v3093_v8  ;;  %5538 = vmatpush3.msra.mxu0 %v3404_v55  ;;  %v4104_v8 = vld [vmem:[%s9269_s16 + $0x1a8] sm:$0xff]  ;;  %v4107_v55 = vrot.slane %v8823_v49, 5 }
 0xb8a   :  { %5506 = vmatprep.subr.mxu1 %v9511_v34  ;;  %5539 = vmatprep.subr.mxu0 %v9511_v34 }
 0xb8b   :  { %5507 = vmatpush3.msra.mxu1 %v3092_v25  ;;  %5540 = vmatpush3.msra.mxu0 %v3403_v31  ;;  %v4262_v25 = vld [vmem:[%s9269_s16 + $0x1f8] sm:$0xff]  ;;  %v4261_v31 = vld [vmem:[%s9269_s16 + $0x1f0] sm:$0xff] }
 0xb8c   :  { %5508 = vmatprep.subr.mxu1 %v9511_v34  ;;  %5541 = vmatprep.subr.mxu0 %v9511_v34 }
 0xb8d   :  { %5509 = vmatpush3.msra.mxu1 %v3091_v6  ;;  %5542 = vmatpush3.msra.mxu0 %v3402_v37  ;;  %v4260_v6 = vld [vmem:[%s9269_s16 + $0x1e8] sm:$0xff]  ;;  %v4259_v37 = vld [vmem:[%s9269_s16 + $0x1e0] sm:$0xff] }
 0xb8e   :  { %5510 = vmatprep.subr.mxu1 %v9511_v34  ;;  %5543 = vmatprep.subr.mxu0 %v9511_v34 }
 0xb8f   :  { %5511 = vmatpush3.msra.mxu1 %v3090_v15  ;;  %5512 = vmatprep.mubr.msk.f32.mxu1 %vm5915_vm6, %v9511_v34  ;;  %v4263_v15 = vrot.slane %v8823_v49, 7 }
 0xb90   :  { %5544 = vmatpush3.msra.mxu0 %v3401_v11  ;;  %5545 = vmatprep.mubr.msk.f32.mxu0 %vm5915_vm6, %v9511_v34  ;;  %v4346_v11 = vld [vmem:[%s9270_s18 + $0x38] sm:$0xff] }
 0xb91   :  { %5513 = vmatmul.mubr.msk.f32.vlgmr.msra.gmra.mxu1 %vm3100_vm9, %v8825_v47  ;;  %5526 = vmatprep.subr.mxu1 %v9511_v34  ;;  %v4185_v47 = vrot.slane %v8823_v49, 6 }
 0xb92   :  { %5546 = vmatmul.mubr.msk.f32.vlgmr.msra.gmra.mxu0 %vm3100_vm9, %v3405_v17  ;;  %5559 = vmatprep.subr.mxu0 %v9511_v34  ;;  %v4345_v17 = vld [vmem:[%s9270_s18 + $0x30] sm:$0xff] }
 0xb93   :  { %5527 = vmatpush3.msra.mxu1 %v3326_v16  ;;  %5560 = vmatpush3.msra.mxu0 %v3560_v28  ;;  %v4343_v16 = vld [vmem:[%s9270_s18 + $0x20] sm:$0xff]  ;;  %v4342_v28 = vld [vmem:[%s9270_s18 + $0x18] sm:$0xff] }
 0xb94   :  { %5528 = vmatprep.subr.mxu1 %v9511_v34  ;;  %5561 = vmatprep.subr.mxu0 %v9511_v34 }
 0xb95   :  { %5529 = vmatpush3.msra.mxu1 %v3325_v41  ;;  %5562 = vmatpush3.msra.mxu0 %v3559_v44  ;;  %v4341_v41 = vld [vmem:[%s9270_s18 + $0x10] sm:$0xff]  ;;  %v4340_v44 = vld [vmem:[%s9270_s18 + $0x8] sm:$0xff] }
 0xb96   :  { %5530 = vmatprep.subr.mxu1 %v9511_v34  ;;  %5563 = vmatprep.subr.mxu0 %v9511_v34 }
 0xb97   :  { %5531 = vmatpush3.msra.mxu1 %v3324_v57  ;;  %5564 = vmatpush3.msra.mxu0 %v3558_v0  ;;  %v1862_v57 = vld [vmem:[%s9271_s7] sm:$0x1] }
 0xb98   :  { %5532 = vmatprep.subr.mxu1 %v9511_v34  ;;  %5565 = vmatprep.subr.mxu0 %v9511_v34  ;;  %v4339_v0 = vld [vmem:[%s9270_s18] sm:$0xff] }
 0xb99   :  { %5533 = vmatpush3.msra.mxu1 %v3323_v46  ;;  %5534 = vmatprep.mubr.msk.f32.mxu1 %vm5915_vm6, %v9511_v34  ;;  %v1863_v46 = vadd.f32 %v1862_v57, %v8559_v62  ;;  %v4353_v62 = vld [vmem:[%s9272_s19 + $0x30] sm:$0xff]  ;;  %v4509_v57 = vld [vmem:[%s9274_s21 + $0x20] sm:$0xff] }
 0xb9a   :  { %5566 = vmatpush3.msra.mxu0 %v3557_v13  ;;  %5567 = vmatprep.mubr.msk.f32.mxu0 %vm5915_vm6, %v9511_v34  ;;  %v4354_v13 = vld [vmem:[%s9272_s19 + $0x38] sm:$0xff] }
 0xb9b   :  { %5535 = vmatmul.mubr.msk.f32.vlgmr.msra.gmra.mxu1 %vm3100_vm9, %v3327_v35  ;;  %5548 = vmatprep.subr.mxu1 %v9511_v34  ;;  %v4352_v35 = vld [vmem:[%s9272_s19 + $0x28] sm:$0xff] }
 0xb9c   :  { %5568 = vmatmul.mubr.msk.f32.vlgmr.msra.gmra.mxu0 %vm3100_vm9, %v3561_v18  ;;  %5581 = vmatprep.subr.mxu0 %v9511_v34  ;;  %v4351_v18 = vld [vmem:[%s9272_s19 + $0x20] sm:$0xff] }
 0xb9d   :  { %5549 = vmatpush3.msra.mxu1 %v3482_v20  ;;  %5582 = vmatpush3.msra.mxu0 %v3716_v5  ;;  %v4350_v20 = vld [vmem:[%s9272_s19 + $0x18] sm:$0xff]  ;;  %v4349_v5 = vld [vmem:[%s9272_s19 + $0x10] sm:$0xff] }
 0xb9e   :  { %5550 = vmatprep.subr.mxu1 %v9511_v34  ;;  %5583 = vmatprep.subr.mxu0 %v9511_v34 }
 0xb9f   :  { %5551 = vmatpush3.msra.mxu1 %v3481_v54  ;;  %5584 = vmatpush3.msra.mxu0 %v3715_v1  ;;  %v4348_v54 = vld [vmem:[%s9272_s19 + $0x8] sm:$0xff]  ;;  %v4347_v1 = vld [vmem:[%s9272_s19] sm:$0xff] }
 0xba0   :  { %5552 = vmatprep.subr.mxu1 %v9511_v34  ;;  %5585 = vmatprep.subr.mxu0 %v9511_v34 }
 0xba1   :  { %5553 = vmatpush3.msra.mxu1 %v3480_v63  ;;  %5586 = vmatpush3.msra.mxu0 %v3714_v61 }
 0xba2   :  { %5554 = vmatprep.subr.mxu1 %v9511_v34  ;;  %5587 = vmatprep.subr.mxu0 %v9511_v34 }
 0xba3   :  { %5555 = vmatpush3.msra.mxu1 %v3479_v36  ;;  %5556 = vmatprep.mubr.msk.f32.mxu1 %vm5915_vm6, %v9511_v34 }
 0xba4   :  { %5588 = vmatpush3.msra.mxu0 %v3713_v33  ;;  %5589 = vmatprep.mubr.msk.f32.mxu0 %vm5915_vm6, %v9511_v34 }
 0xba5   :  { %5557 = vmatmul.mubr.msk.f32.vlgmr.msra.gmra.mxu1 %vm3100_vm9, %v3483_v4  ;;  %5570 = vmatprep.subr.mxu1 %v9511_v34 }
 0xba6   :  { %5590 = vmatmul.mubr.msk.f32.vlgmr.msra.gmra.mxu0 %vm3100_vm9, %v8823_v49  ;;  %5603 = vmatprep.subr.mxu0 %v9511_v34  ;;  %v4344_v49 = vld [vmem:[%s9270_s18 + $0x28] sm:$0xff] }
 0xba7   :  { %5571 = vmatpush3.msra.mxu1 %v3638_v21  ;;  %5604 = vmatpush3.msra.mxu0 %v3872_v52 }
 0xba8   :  { %5572 = vmatprep.subr.mxu1 %v9511_v34  ;;  %5605 = vmatprep.subr.mxu0 %v9511_v34 }
 0xba9   :  { %5573 = vmatpush3.msra.mxu1 %v3637_v59  ;;  %5606 = vmatpush3.msra.mxu0 %v3871_v23 }
 0xbaa   :  { %5574 = vmatprep.subr.mxu1 %v9511_v34  ;;  %5607 = vmatprep.subr.mxu0 %v9511_v34 }
 0xbab   :  { %5575 = vmatpush3.msra.mxu1 %v3636_v26  ;;  %5608 = vmatpush3.msra.mxu0 %v3870_v32 }
 0xbac   :  { %5576 = vmatprep.subr.mxu1 %v9511_v34  ;;  %5609 = vmatprep.subr.mxu0 %v9511_v34 }
 0xbad   :  { %5577 = vmatpush3.msra.mxu1 %v3635_v22  ;;  %5578 = vmatprep.mubr.msk.f32.mxu1 %vm5915_vm6, %v9511_v34 }
 0xbae   :  { %5610 = vmatpush3.msra.mxu0 %v3869_v30  ;;  %5611 = vmatprep.mubr.msk.f32.mxu0 %vm5915_vm6, %v9511_v34 }
 0xbaf   :  { %5579 = vmatmul.mubr.msk.f32.vlgmr.msra.gmra.mxu1 %vm3100_vm9, %v3639_v9  ;;  %5592 = vmatprep.subr.mxu1 %v9511_v34 }
 0xbb0   :  { %5612 = vmatmul.mubr.msk.f32.vlgmr.msra.gmra.mxu0 %vm3100_vm9, %v3873_v38  ;;  %5625 = vmatprep.subr.mxu0 %v9511_v34 }
 0xbb1   :  { %5593 = vmatpush3.msra.mxu1 %v3794_v45  ;;  %5626 = vmatpush3.msra.mxu0 %v4028_v48 }
 0xbb2   :  { %5594 = vmatprep.subr.mxu1 %v9511_v34  ;;  %5627 = vmatprep.subr.mxu0 %v9511_v34 }
 0xbb3   :  { %5595 = vmatpush3.msra.mxu1 %v3793_v3  ;;  %5628 = vmatpush3.msra.mxu0 %v4027_v12 }
 0xbb4   :  { %5596 = vmatprep.subr.mxu1 %v9511_v34  ;;  %5629 = vmatprep.subr.mxu0 %v9511_v34 }
 0xbb5   :  { %5597 = vmatpush3.msra.mxu1 %v3792_v29  ;;  %5630 = vmatpush3.msra.mxu0 %v4026_v7 }
 0xbb6   :  { %5598 = vmatprep.subr.mxu1 %v9511_v34  ;;  %5631 = vmatprep.subr.mxu0 %v9511_v34 }
 0xbb7   :  { %5599 = vmatpush3.msra.mxu1 %v3791_v50  ;;  %5600 = vmatprep.mubr.msk.f32.mxu1 %vm5915_vm6, %v9511_v34 }
 0xbb8   :  { %5632 = vmatpush3.msra.mxu0 %v4025_v14  ;;  %5633 = vmatprep.mubr.msk.f32.mxu0 %vm5915_vm6, %v9511_v34 }
 0xbb9   :  { %5601 = vmatmul.mubr.msk.f32.vlgmr.msra.gmra.mxu1 %vm3100_vm9, %v3795_v24  ;;  %5614 = vmatprep.subr.mxu1 %v9511_v34 }
 0xbba   :  { %5634 = vmatmul.mubr.msk.f32.vlgmr.msra.gmra.mxu0 %vm3100_vm9, %v4029_v40  ;;  %5647 = vmatprep.subr.mxu0 %v9511_v34 }
 0xbbb   :  { %5615 = vmatpush3.msra.mxu1 %v3950_v19  ;;  %5648 = vmatpush3.msra.mxu0 %v4184_v58 }
 0xbbc   :  { %5616 = vmatprep.subr.mxu1 %v9511_v34  ;;  %5649 = vmatprep.subr.mxu0 %v9511_v34 }
 0xbbd   :  { %5617 = vmatpush3.msra.mxu1 %v3949_v43  ;;  %5650 = vmatpush3.msra.mxu0 %v4183_v39 }
 0xbbe   :  { %5618 = vmatprep.subr.mxu1 %v9511_v34  ;;  %5651 = vmatprep.subr.mxu0 %v9511_v34 }
 0xbbf   :  { %5619 = vmatpush3.msra.mxu1 %v3948_v51  ;;  %5652 = vmatpush3.msra.mxu0 %v4182_v56 }
 0xbc0   :  { %5620 = vmatprep.subr.mxu1 %v9511_v34  ;;  %5653 = vmatprep.subr.mxu0 %v9511_v34 }
 0xbc1   :  { %5621 = vmatpush3.msra.mxu1 %v3947_v27  ;;  %5622 = vmatprep.mubr.msk.f32.mxu1 %vm5915_vm6, %v9511_v34 }
 0xbc2   :  { %5654 = vmatpush3.msra.mxu0 %v4181_v10  ;;  %5655 = vmatprep.mubr.msk.f32.mxu0 %vm5915_vm6, %v9511_v34 }
 0xbc3   :  { %5623 = vmatmul.mubr.msk.f32.vlgmr.msra.gmra.mxu1 %vm3100_vm9, %v3951_v53  ;;  %5636 = vmatprep.subr.mxu1 %v9511_v34 }
 0xbc4   :  { %5656 = vmatmul.mubr.msk.f32.vlgmr.msra.gmra.mxu0 %vm3100_vm9, %v4185_v47  ;;  %5637 = vmatpush3.msra.mxu1 %v4106_v42 }
 0xbc5   :  { %5638 = vmatprep.subr.mxu1 %v9511_v34  ;;  %5644 = vmatprep.mubr.msk.f32.mxu1 %vm5915_vm6, %v9511_v34 }
 0xbc6   :  { %5639 = vmatpush3.msra.mxu1 %v4105_v60  ;;  %5669 = vmatprep.subr.mxu0 %v9511_v34 }
 0xbc7   :  { %5640 = vmatprep.subr.mxu1 %v9511_v34  ;;  %5685 = vmatprep.mubr.msk.f32.mxu0 %vm5915_vm6, %v9511_v34 }
 0xbc8   :  { %5641 = vmatpush3.msra.mxu1 %v4104_v8  ;;  %5670 = vmatpush3.msra.mxu0 %v4354_v13  ;;  %v4508_v13 = vld [vmem:[%s9274_s21 + $0x18] sm:$0xff] }
 0xbc9   :  { %5642 = vmatprep.subr.mxu1 %v9511_v34  ;;  %5671 = vmatprep.subr.mxu0 %v9511_v34 }
 0xbca   :  { %5643 = vmatpush3.msra.mxu1 %v4103_v2  ;;  %5672 = vmatpush3.msra.mxu0 %v4353_v62  ;;  %v4507_v62 = vld [vmem:[%s9274_s21 + $0x10] sm:$0xff] }
 0xbcb   :  { %5645 = vmatmul.mubr.msk.f32.vlgmr.msra.gmra.mxu1 %vm3100_vm9, %v4107_v55  ;;  %5658 = vmatprep.subr.mxu1 %v9511_v34 }
 0xbcc   :  { %5659 = vmatpush3.msra.mxu1 %v4262_v25  ;;  %5666 = vmatprep.mubr.msk.f32.mxu1 %vm5915_vm6, %v9511_v34 }
 0xbcd   :  { %5660 = vmatprep.subr.mxu1 %v9511_v34  ;;  %5673 = vmatprep.subr.mxu0 %v9511_v34 }
 0xbce   :  { %5661 = vmatpush3.msra.mxu1 %v4261_v31  ;;  %5674 = vmatpush3.msra.mxu0 %v4352_v35  ;;  %v4506_v35 = vld [vmem:[%s9274_s21 + $0x8] sm:$0xff] }
 0xbcf   :  { %5662 = vmatprep.subr.mxu1 %v9511_v34  ;;  %5675 = vmatprep.subr.mxu0 %v9511_v34 }
 0xbd0   :  { %5663 = vmatpush3.msra.mxu1 %v4260_v6  ;;  %5676 = vmatpush3.msra.mxu0 %v4351_v18  ;;  %v4505_v18 = vld [vmem:[%s9274_s21] sm:$0xff] }
 0xbd1   :  { %5664 = vmatprep.subr.mxu1 %v9511_v34  ;;  %5677 = vmatprep.subr.mxu0 %v9511_v34 }
 0xbd2   :  { %5665 = vmatpush3.msra.mxu1 %v4259_v37  ;;  %5678 = vmatpush3.msra.mxu0 %v4350_v20  ;;  %v4591_v20 = vld [vmem:[%s9275_s23 + $0x18] sm:$0xff] }
 0xbd3   :  { %5667 = vmatmul.mubr.msk.f32.vlgmr.msra.gmra.mxu1 %vm3100_vm9, %v4263_v15  ;;  %5688 = vmatprep.subr.mxu1 %v9511_v34 }
 0xbd4   :  { %5689 = vmatpush3.msra.mxu1 %v4346_v11  ;;  %5704 = vmatprep.mubr.msk.f32.mxu1 %vm5915_vm6, %v9511_v34  ;;  %v4337_v11 = vld [vmem:[%s9273_s17] sm:$0x1] }
 0xbd5   :  { %5690 = vmatprep.subr.mxu1 %v9511_v34  ;;  %5679 = vmatprep.subr.mxu0 %v9511_v34 }
 0xbd6   :  { %5691 = vmatpush3.msra.mxu1 %v4345_v17  ;;  %5680 = vmatpush3.msra.mxu0 %v4349_v5 }
 0xbd7   :  { %5692 = vmatprep.subr.mxu1 %v9511_v34  ;;  %5681 = vmatprep.subr.mxu0 %v9511_v34 }
 0xbd8   :  { %5693 = vmatpush3.msra.mxu1 %v4344_v49  ;;  %5682 = vmatpush3.msra.mxu0 %v4348_v54  ;;  %v4502_v54 = vld [vmem:[%s9276_s20] sm:$0x1] }
 0xbd9   :  { %5694 = vmatprep.subr.mxu1 %v9511_v34  ;;  %5683 = vmatprep.subr.mxu0 %v9511_v34 }
 0xbda   :  { %5695 = vmatpush3.msra.mxu1 %v4343_v16  ;;  %5684 = vmatpush3.msra.mxu0 %v4347_v1 }
 0xbdb   :  { %5696 = vmatprep.subr.mxu1 %v9511_v34  ;;  %5707 = vmatprep.subr.mxu0 %v9511_v34 }
 0xbdc   :  { %5697 = vmatpush3.msra.mxu1 %v4342_v28  ;;  %v4512_v28 = vld [vmem:[%s9274_s21 + $0x38] sm:$0xff] }
 0xbdd   :  { %5698 = vmatprep.subr.mxu1 %v9511_v34 }
 0xbde   :  { %5699 = vmatpush3.msra.mxu1 %v4341_v41  ;;  %v4511_v41 = vld [vmem:[%s9274_s21 + $0x30] sm:$0xff] }
 0xbdf   :  { %5700 = vmatprep.subr.mxu1 %v9511_v34 }
 0xbe0   :  { %5701 = vmatpush3.msra.mxu1 %v4340_v44  ;;  %v4510_v44 = vld [vmem:[%s9274_s21 + $0x28] sm:$0xff] }
 0xbe1   :  { %5702 = vmatprep.subr.mxu1 %v9511_v34 }
 0xbe2   :  { %5703 = vmatpush3.msra.mxu1 %v4339_v0 }
 0xbe3   :  { %5705 = vmatmul.mubr.msk.f32.vlgmr.msra.gmra.mxu1 %vm4355_vm7, %v1863_v46  ;;  %5726 = vmatprep.subr.mxu1 %v9511_v34 }
 0xbe4   :  { %5734 = vmatprep.mubr.msk.f32.mxu1 %vm5915_vm6, %v9511_v34  ;;  %5727 = vmatpush3.msra.mxu1 %v4591_v20 }
 0xbe5   :  { %5728 = vmatprep.subr.mxu1 %v9511_v34 }
 0xc48   :  { %v3169_v63 = vpop.f32.mrf.mxu1  ;;  %v3318_v61 = vpop.f32.mrf.mxu0 }
 0xc4a   :  { %v5503_v36 = vpop.f32.mrf.mxu1  ;;  %v5525_v33 = vpop.f32.mrf.mxu0 }
 0xc4b   :  { %v4590_v33 = vld [vmem:[%s9275_s23 + $0x10] sm:$0xff] }
 0xc4c   :  { %5729 = vmatpush3.msra.mxu1 %v4590_v33 }
 0xc4d   :  { %5730 = vmatprep.subr.mxu1 %v9511_v34 }
 0xc51   :  { %v3241_v4 = vpop.f32.mrf.mxu1 }
 0xc52   :  { %v3474_v21 = vpop.f32.mrf.mxu0  ;;  %v3242_v48 = vadd.f32 %v3241_v4, %v3169_v63  ;;  %v4589_v4 = vld [vmem:[%s9275_s23 + $0x8] sm:$0xff] }
 0xc53   :  { %v5514_v52 = vpop.f32.mrf.mxu1  ;;  %5731 = vmatpush3.msra.mxu1 %v4589_v4 }
 0xc54   :  { %v5547_v59 = vpop.f32.mrf.mxu0  ;;  %v3322_v3 = vadd.f32 %v3318_v61, %v3242_v48  ;;  %5732 = vmatprep.subr.mxu1 %v9511_v34  ;;  %v4513_v52 = vld [vmem:[%s9277_s22] sm:$0x1] }
 0xc5b   :  { %v3396_v23 = vpop.f32.mrf.mxu1 }
 0xc5c   :  { %v3630_v26 = vpop.f32.mrf.mxu0  ;;  %v3400_v29 = vadd.f32 %v3396_v23, %v3322_v3 }
 0xc5d   :  { %v5536_v32 = vpop.f32.mrf.mxu1 }
 0xc5e   :  { %v5569_v22 = vpop.f32.mrf.mxu0  ;;  %v3478_v24 = vadd.f32 %v3474_v21, %v3400_v29  ;;  %v4588_v21 = vld [vmem:[%s9275_s23] sm:$0xff] }
 0xc5f   :  { %5733 = vmatpush3.msra.mxu1 %v4588_v21  ;;  %v4592_v22 = vld [vmem:[%s9278_s24] sm:$0x1] }
 0xc65   :  { %v3552_v30 = vpop.f32.mrf.mxu1 }
 0xc66   :  { %v3786_v9 = vpop.f32.mrf.mxu0  ;;  %v3556_v40 = vadd.f32 %v3552_v30, %v3478_v24 }
 0xc67   :  { %v5558_v38 = vpop.f32.mrf.mxu1 }
 0xc68   :  { %v5591_v45 = vpop.f32.mrf.mxu0  ;;  %v3634_v58 = vadd.f32 %v3630_v26, %v3556_v40 }
 0xc6f   :  { %v3708_v12 = vpop.f32.mrf.mxu1 }
 0xc70   :  { %v3942_v7 = vpop.f32.mrf.mxu0  ;;  %v3712_v51 = vadd.f32 %v3708_v12, %v3634_v58 }
 0xc71   :  { %v5580_v50 = vpop.f32.mrf.mxu1 }
 0xc72   :  { %v5613_v14 = vpop.f32.mrf.mxu0  ;;  %v3790_v27 = vadd.f32 %v3786_v9, %v3712_v51 }
 0xc79   :  { %v3864_v19 = vpop.f32.mrf.mxu1 }
 0xc7a   :  { %v4098_v43 = vpop.f32.mrf.mxu0  ;;  %v3868_v10 = vadd.f32 %v3864_v19, %v3790_v27 }
 0xc7b   :  { %v5602_v39 = vpop.f32.mrf.mxu1 }
 0xc7c   :  { %v5635_v56 = vpop.f32.mrf.mxu0  ;;  %v3946_v60 = vadd.f32 %v3942_v7, %v3868_v10 }
 0xc83   :  { %v4020_v53 = vpop.f32.mrf.mxu1 }
 0xc84   :  { %v4254_v42 = vpop.f32.mrf.mxu0  ;;  %v4024_v2 = vadd.f32 %v4020_v53, %v3946_v60 }
 0xc85   :  { %v5624_v47 = vpop.f32.mrf.mxu1 }
 0xc86   :  { %v5657_v8 = vpop.f32.mrf.mxu0  ;;  %v4102_v25 = vadd.f32 %v4098_v43, %v4024_v2 }
 0xc8b   :  { %v4176_v55 = vpop.f32.mrf.mxu1 }
 0xc8c   :  { %v4180_v6 = vadd.f32 %v4176_v55, %v4102_v25 }
 0xc8d   :  { %v5646_v31 = vpop.f32.mrf.mxu1 }
 0xc8e   :  { %v4258_v37 = vadd.f32 %v4254_v42, %v4180_v6 }
 0xc93   :  { %v4332_v15 = vpop.f32.mrf.mxu1 }
 0xc94   :  { %v4336_v17 = vadd.f32 %v4332_v15, %v4258_v37 }
 0xc95   :  { %v5668_v49 = vpop.f32.mrf.mxu1 }
 0xc96   :  { %v4338_v16 = vadd.f32 %v4337_v11, %v4336_v17 }
 0xc98   :  { %5686 = vmatmul.mubr.msk.f32.vlgmr.msra.gmra.mxu0 %vm4355_vm7, %v4338_v16 }
 0xc99   :  { %5708 = vmatpush3.msra.mxu0 %v4512_v28  ;;  %5723 = vmatprep.mubr.msk.f32.mxu0 %vm5915_vm6, %v9511_v34  ;;  %vm4666_vm6 = vcmask 155648  }
 0xc9a   :  { %5709 = vmatprep.subr.mxu0 %v9511_v34 }
 0xc9b   :  { %5710 = vmatpush3.msra.mxu0 %v4511_v41 }
 0xc9c   :  { %5711 = vmatprep.subr.mxu0 %v9511_v34 }
 0xc9d   :  { %5712 = vmatpush3.msra.mxu0 %v4510_v44 }
 0xc9e   :  { %5713 = vmatprep.subr.mxu0 %v9511_v34 }
 0xc9f   :  { %5714 = vmatpush3.msra.mxu0 %v4509_v57 }
 0xca0   :  { %5715 = vmatprep.subr.mxu0 %v9511_v34 }
 0xca1   :  { %5716 = vmatpush3.msra.mxu0 %v4508_v13 }
 0xca2   :  { %5717 = vmatprep.subr.mxu0 %v9511_v34 }
 0xca3   :  { %v4498_v0 = vpop.f32.mrf.mxu1  ;;  %5718 = vmatpush3.msra.mxu0 %v4507_v62 }
 0xca4   :  { %5719 = vmatprep.subr.mxu0 %v9511_v34 }
 0xca5   :  { %v5706_v46 = vpop.f32.mrf.mxu1  ;;  %5720 = vmatpush3.msra.mxu0 %v4506_v35 }
 0xca6   :  { %5721 = vmatprep.subr.mxu0 %v9511_v34 }
 0xca7   :  { %5722 = vmatpush3.msra.mxu0 %v4505_v18 }
 0xd58   :  { %v4425_v5 = vpop.f32.mrf.mxu0 }
 0xd59   :  { %v4499_v1 = vadd.f32 %v4498_v0, %v4425_v5 }
 0xd5a   :  { %v5687_v63 = vpop.f32.mrf.mxu0 }
 0xd5b   :  { %v4503_v61 = vadd.f32 %v4502_v54, %v4499_v1 }
 0xd5d   :  { %v4504_v36 = vmax.f32 %v4503_v61, 0.0 }
 0xd5f   :  { %5724 = vmatmul.mubr.msk.f32.vlgmr.msra.gmra.mxu0 %vm4355_vm7, %v4504_v36 }
 0xe1f   :  { %v4583_v59 = vpop.f32.mrf.mxu0 }
 0xe20   :  { %v4584_v23 = vadd.f32 %v4583_v59, %v4513_v52 }
 0xe21   :  { %v5725_v26 = vpop.f32.mrf.mxu0 }
 0xe22   :  { %v4587_v32 = vmax.f32 %v4584_v23, 0.0 }
 0xe24   :  { %5735 = vmatmul.mubr.msk.f32.vlgmr.msra.gmra.mxu1 %vm3100_vm9, %v4587_v32 }
 0xee4   :  { %v4662_v30 = vpop.f32.mrf.mxu1 }
 0xee5   :  { %v4663_v9 = vadd.f32 %v4662_v30, %v4592_v22 }
 0xee6   :  { %v5736_v38 = vpop.f32.mrf.mxu1 }
 0xee7   :  { %4667 = vst.msk [vmem:[%s9279_s27] sm:$0x1] %vm4666_vm6, %v4663_v9 }

</bundles_post_ra>
